<compile_context>
chip_gen: v7x
topology: tpu7x:2x2x1
jax: 0.10.0
libtpu: 0.0.40
codegen_flags: <defaults>
</compile_context>

<pallas_src>
import jax
import jax.numpy as jnp
from jax.experimental import pallas as pl
from jax.experimental.pallas import tpu as pltpu

EPS = 1e-5
LANE = 128
_PAD_OFF = 8      # sublane-aligned W-offset of the interior inside the pad scratch
_PAD_EXTRA = 16   # extra W columns in the pad scratch (reflections live at 7 and W+8)


def _resnet_block_kernel(x_ref, w1_ref, w2_ref, o_ref, pad_ref, slab_ref):
    # x_ref : (1, H, W, C) f32         w*_ref : (3, 3, C, C) mxu_dtype
    # o_ref : (1, H, W, C)
    # pad_ref : VMEM (H+2, W+16, C) f32  -- reflection-padded plane, interior at W-off 8
    # slab_ref: VMEM (3, H+2, W, C) mxu_dtype -- kj-shifted slabs of pad_ref
    _, H, W, C = x_ref.shape
    mxu_dtype = slab_ref.dtype

    def reflect_pad(a):
        """ReflectionPad2d(1) of an (H, W, C) value into pad_ref."""
        # Interior: W-offset 8 is sublane-aligned -> plain unmasked stores.
        pad_ref[1:H + 1, _PAD_OFF:_PAD_OFF + W, :] = a
        pad_ref[0:1, _PAD_OFF:_PAD_OFF + W, :] = a[1:2, :, :]                   # top    <- row 1
        pad_ref[H + 1:H + 2, _PAD_OFF:_PAD_OFF + W, :] = a[H - 2:H - 1, :, :]   # bottom <- row H-2
        # Left/right columns (corners included) reflect the already row-padded plane.
        pad_ref[:, _PAD_OFF - 1:_PAD_OFF, :] = pad_ref[:, _PAD_OFF + 1:_PAD_OFF + 2, :]
        pad_ref[:, _PAD_OFF + W:_PAD_OFF + W + 1, :] = \
            pad_ref[:, _PAD_OFF + W - 2:_PAD_OFF + W - 1, :]

    def conv3x3(w_ref):
        """VALID 3x3 conv over pad_ref; weights (3, 3, C, C) -> 9 K=C MXU dots."""
        # One kj-shifted slab per kj (a single sublane relayout each), cast to
        # the MXU operand dtype once.
        for kj in range(3):
            lo = _PAD_OFF - 1 + kj
            slab_ref[kj] = pad_ref[:, lo:lo + W, :].astype(mxu_dtype)
        # ki row-slices of the slabs are tile-row aligned (first, untiled axis),
        # so the 9 dot operands need no further relayout.
        acc = None
        for ki in range(3):
            for kj in range(3):
                lhs = slab_ref[kj, ki:ki + H].reshape(H * W, C)
                d = jnp.dot(lhs, w_ref[ki, kj], preferred_element_type=jnp.float32)
                acc = d if acc is None else acc + d
        return acc.reshape(H, W, C)

    def instance_norm(a, relu):
        # nn.InstanceNorm2d(affine=False, eps=1e-5): biased variance over (H, W),
        # single traversal via E[x^2] - mean^2.  All math in f32 (VPU/EUP).
        inv_n = 1.0 / float(H * W)
        mean = jnp.sum(a, axis=(0, 1), keepdims=True) * inv_n
        ex2 = jnp.sum(a * a, axis=(0, 1), keepdims=True) * inv_n
        var = ex2 - mean * mean
        y = (a - mean) * jax.lax.rsqrt(var + EPS)
        if relu:
            y = jnp.maximum(y, 0.0)
        return y

    x = x_ref[0].astype(jnp.float32)            # (H, W, C)

    reflect_pad(x)
    y = instance_norm(conv3x3(w1_ref), relu=True)
    # TODO(synk): use_dropout=False config; training-mode Dropout(0.5) not implemented.
    reflect_pad(y)
    y = instance_norm(conv3x3(w2_ref), relu=False)

    o_ref[0] = (x + y).astype(o_ref.dtype)


def _pick_vmem_limit(H, W, Cp, mxu_bytes):
    """Size the scoped VMEM limit from the per-grid-step working set."""
    f32 = 4
    block = H * W * Cp * f32                      # one (1,H,W,Cp) activation block
    w_bytes = 3 * 3 * Cp * Cp * mxu_bytes         # one weight tensor
    pad_bytes = (H + 2) * (W + _PAD_EXTRA) * Cp * f32
    slab_bytes = 3 * (H + 2) * W * Cp * mxu_bytes
    live = 2 * block * 2                          # x / out, double-buffered
    live += 2 * 2 * w_bytes                       # two weights, 2 pipeline buffers each
    live += pad_bytes + slab_bytes                # persistent scratch
    live += 4 * block                             # acc / y / x values + headroom
    requested = max(32 * 1024 * 1024, 2 * live)
    try:
        cap = int(getattr(pltpu.get_tpu_info(), "vmem_capacity_bytes",
                          64 * 1024 * 1024))
    except Exception:  # pragma: no cover - conservative fallback off-TPU / old jax
        cap = 64 * 1024 * 1024
    if cap < 32 * 1024 * 1024:
        cap = 64 * 1024 * 1024
    return int(min(requested, int(cap * 0.9)))


def resnet_block_pallas(x_nchw, w1_oihw, b1, w2_oihw, b2, *, mxu_dtype=jnp.bfloat16):
    """x_nchw: (N, C, H, W) float32; weights in PyTorch OIHW layout.

    b1/b2 are accepted for interface parity but unused: a per-channel bias is
    exactly removed by the InstanceNorm(affine=False) mean subtraction that
    follows each conv, so skipping the adds is numerically exact.
    `mxu_dtype` controls only the matmul operand dtype (bf16 default); all
    elementwise / normalization math stays f32.
    """
    del b1, b2
    N, C, H, W = x_nchw.shape
    Cp = ((C + LANE - 1) // LANE) * LANE          # lane-dense channel axis

    x = jnp.transpose(x_nchw, (0, 2, 3, 1))       # NCHW -> NHWC
    if Cp != C:
        x = jnp.pad(x, ((0, 0), (0, 0), (0, 0), (0, Cp - C)))

    def prep_w(w_oihw):
        w = jnp.transpose(w_oihw, (2, 3, 1, 0))   # OIHW -> (kh, kw, Cin, Cout)
        if Cp != C:
            w = jnp.pad(w, ((0, 0), (0, 0), (0, Cp - C), (0, Cp - C)))
        return w.astype(mxu_dtype)                # (3, 3, Cp, Cp)

    w1 = prep_w(w1_oihw)
    w2 = prep_w(w2_oihw)

    mxu_bytes = jnp.dtype(mxu_dtype).itemsize
    vmem_limit = _pick_vmem_limit(H, W, Cp, mxu_bytes)

    out_nhwc = pl.pallas_call(
        _resnet_block_kernel,
        out_shape=jax.ShapeDtypeStruct((N, H, W, Cp), x.dtype),
        grid=(N,),
        in_specs=[
            pl.BlockSpec((1, H, W, Cp), lambda n: (n, 0, 0, 0)),
            pl.BlockSpec((3, 3, Cp, Cp), lambda n: (0, 0, 0, 0)),  # constant -> no re-DMA
            pl.BlockSpec((3, 3, Cp, Cp), lambda n: (0, 0, 0, 0)),
        ],
        out_specs=pl.BlockSpec((1, H, W, Cp), lambda n: (n, 0, 0, 0)),
        scratch_shapes=[
            pltpu.VMEM((H + 2, W + _PAD_EXTRA, Cp), jnp.float32),   # padded plane
            pltpu.VMEM((3, H + 2, W, Cp), mxu_dtype),               # kj-shifted slabs
        ],
        compiler_params=pltpu.CompilerParams(
            dimension_semantics=("parallel",),
            vmem_limit_bytes=vmem_limit,
        ),
    )(x, w1, w2)

    out_nhwc = out_nhwc[..., :C]                  # drop channel padding (exact zeros)
    return jnp.transpose(out_nhwc, (0, 3, 1, 2))  # NHWC -> NCHW


def resnet_block_reference(x, w1, b1, w2, b2):
    """Pure-JAX reference (NCHW, OIHW, with bias) mirroring the PyTorch forward."""
    def pad_reflect(a):
        return jnp.pad(a, ((0, 0), (0, 0), (1, 1), (1, 1)), mode="reflect")

    def conv(a, w, b):
        y = jax.lax.conv_general_dilated(
            a, w, window_strides=(1, 1), padding="VALID",
            dimension_numbers=("NCHW", "OIHW", "NCHW"))
        return y + b[None, :, None, None]

    def inorm(a):
        m = a.mean(axis=(2, 3), keepdims=True)
        v = ((a - m) ** 2).mean(axis=(2, 3), keepdims=True)
        return (a - m) / jnp.sqrt(v + EPS)

    y = conv(pad_reflect(x), w1, b1)
    y = inorm(y)
    y = jnp.maximum(y, 0.0)
    y = conv(pad_reflect(y), w2, b2)
    y = inorm(y)
    return x + y


if __name__ == "__main__":
    key = jax.random.PRNGKey(0)
    kx, k1, kb1, k2, kb2 = jax.random.split(key, 5)

    N, C, H, W = 2, 4, 16, 16  # dim = 4
    x = jax.random.normal(kx, (N, C, H, W), dtype=jnp.float32)

    # Deterministic synthetic parameters (Conv2d(dim, dim, 3, bias=True) x2).
    w1 = 0.1 * jax.random.normal(k1, (C, C, 3, 3), dtype=jnp.float32)   # OIHW
    b1 = 0.1 * jax.random.normal(kb1, (C,), dtype=jnp.float32)
    w2 = 0.1 * jax.random.normal(k2, (C, C, 3, 3), dtype=jnp.float32)
    b2 = 0.1 * jax.random.normal(kb2, (C,), dtype=jnp.float32)

    ref = jax.block_until_ready(resnet_block_reference(x, w1, b1, w2, b2))

    # Structural check with f32 MXU operands (tight tolerance).
    out_f32 = jax.block_until_ready(
        resnet_block_pallas(x, w1, b1, w2, b2, mxu_dtype=jnp.float32))
    assert out_f32.shape == (N, C, H, W)
    assert jnp.allclose(out_f32, ref, atol=1e-4, rtol=1e-4), (
        f"f32 path max abs err {jnp.max(jnp.abs(out_f32 - ref))}")

    # Production path with bf16 MXU operands (tolerance relaxed per review).
    out_bf16 = jax.block_until_ready(resnet_block_pallas(x, w1, b1, w2, b2))
    assert out_bf16.shape == (N, C, H, W)
    assert jnp.allclose(out_bf16, ref, atol=5e-2, rtol=5e-2), (
        f"bf16 path max abs err {jnp.max(jnp.abs(out_bf16 - ref))}")

    print("KERNEL_OK")
</pallas_src>

<mosaic_0001>
module attributes {stable_mosaic.version = 11 : i64} {
  func.func @_resnet_block_kernel(%arg0: i32, %arg1: memref<1x16x16x128xf32, #tpu.memory_space<vmem>>, %arg2: memref<3x3x128x128xf32, #tpu.memory_space<vmem>>, %arg3: memref<3x3x128x128xf32, #tpu.memory_space<vmem>>, %arg4: memref<1x16x16x128xf32, #tpu.memory_space<vmem>>, %arg5: memref<18x32x128xf32, #tpu.memory_space<vmem>>, %arg6: memref<3x18x16x128xf32, #tpu.memory_space<vmem>>) attributes {dimension_semantics = [#tpu.dimension_semantics<parallel>], iteration_bounds = array<i64: 2>, scalar_prefetch = 0 : i64, scratch_operands = 2 : i64, tpu.core_type = #tpu.core_type<tc>, window_params = [{transform_indices = @transform_0, window_bounds = array<i64: 1, 16, 16, 128>}, {pipeline_mode = #tpu.pipeline_mode<synchronous>, transform_indices = @transform_1, window_bounds = array<i64: 3, 3, 128, 128>}, {pipeline_mode = #tpu.pipeline_mode<synchronous>, transform_indices = @transform_2, window_bounds = array<i64: 3, 3, 128, 128>}, {transform_indices = @transform_3, window_bounds = array<i64: 1, 16, 16, 128>}]} {
    %c0 = arith.constant 0 : index
    %c0_0 = arith.constant 0 : index
    %c0_1 = arith.constant 0 : index
    %c0_2 = arith.constant 0 : index
    %0 = vector.load %arg1[%c0, %c0_0, %c0_1, %c0_2] : memref<1x16x16x128xf32, #tpu.memory_space<vmem>>, vector<1x16x16x128xf32>
    %1 = vector.shape_cast %0 : vector<1x16x16x128xf32> to vector<16x16x128xf32>
    %c1 = arith.constant 1 : index
    %c8 = arith.constant 8 : index
    %c0_3 = arith.constant 0 : index
    %2 = vector.load %arg5[%c1, %c8, %c0_3] : memref<18x32x128xf32, #tpu.memory_space<vmem>>, vector<16x16x128xf32>
    tpu.vector_store %arg5[%c1, %c8, %c0_3], %1 {strides = array<i32>} : memref<18x32x128xf32, #tpu.memory_space<vmem>>, vector<16x16x128xf32>,
    %3 = vector.extract_strided_slice %1 {offsets = [1, 0, 0], sizes = [1, 16, 128], strides = [1, 1, 1]} : vector<16x16x128xf32> to vector<1x16x128xf32>
    %c0_4 = arith.constant 0 : index
    %c8_5 = arith.constant 8 : index
    %c0_6 = arith.constant 0 : index
    %4 = vector.load %arg5[%c0_4, %c8_5, %c0_6] : memref<18x32x128xf32, #tpu.memory_space<vmem>>, vector<1x16x128xf32>
    tpu.vector_store %arg5[%c0_4, %c8_5, %c0_6], %3 {strides = array<i32>} : memref<18x32x128xf32, #tpu.memory_space<vmem>>, vector<1x16x128xf32>,
    %5 = vector.extract_strided_slice %1 {offsets = [14, 0, 0], sizes = [1, 16, 128], strides = [1, 1, 1]} : vector<16x16x128xf32> to vector<1x16x128xf32>
    %c17 = arith.constant 17 : index
    %c8_7 = arith.constant 8 : index
    %c0_8 = arith.constant 0 : index
    %6 = vector.load %arg5[%c17, %c8_7, %c0_8] : memref<18x32x128xf32, #tpu.memory_space<vmem>>, vector<1x16x128xf32>
    tpu.vector_store %arg5[%c17, %c8_7, %c0_8], %5 {strides = array<i32>} : memref<18x32x128xf32, #tpu.memory_space<vmem>>, vector<1x16x128xf32>,
    %c0_9 = arith.constant 0 : index
    %c9 = arith.constant 9 : index
    %c0_10 = arith.constant 0 : index
    %7 = vector.load %arg5[%c0_9, %c9, %c0_10] : memref<18x32x128xf32, #tpu.memory_space<vmem>>, vector<18x1x128xf32>
    %c0_11 = arith.constant 0 : index
    %c7 = arith.constant 7 : index
    %c0_12 = arith.constant 0 : index
    %8 = vector.load %arg5[%c0_11, %c7, %c0_12] : memref<18x32x128xf32, #tpu.memory_space<vmem>>, vector<18x1x128xf32>
    tpu.vector_store %arg5[%c0_11, %c7, %c0_12], %7 {strides = array<i32>} : memref<18x32x128xf32, #tpu.memory_space<vmem>>, vector<18x1x128xf32>,
    %c0_13 = arith.constant 0 : index
    %c22 = arith.constant 22 : index
    %c0_14 = arith.constant 0 : index
    %9 = vector.load %arg5[%c0_13, %c22, %c0_14] : memref<18x32x128xf32, #tpu.memory_space<vmem>>, vector<18x1x128xf32>
    %c0_15 = arith.constant 0 : index
    %c24 = arith.constant 24 : index
    %c0_16 = arith.constant 0 : index
    %10 = vector.load %arg5[%c0_15, %c24, %c0_16] : memref<18x32x128xf32, #tpu.memory_space<vmem>>, vector<18x1x128xf32>
    tpu.vector_store %arg5[%c0_15, %c24, %c0_16], %9 {strides = array<i32>} : memref<18x32x128xf32, #tpu.memory_space<vmem>>, vector<18x1x128xf32>,
    %c0_17 = arith.constant 0 : index
    %c7_18 = arith.constant 7 : index
    %c0_19 = arith.constant 0 : index
    %11 = vector.load %arg5[%c0_17, %c7_18, %c0_19] : memref<18x32x128xf32, #tpu.memory_space<vmem>>, vector<18x16x128xf32>
    %c0_20 = arith.constant 0 : index
    %c0_21 = arith.constant 0 : index
    %c0_22 = arith.constant 0 : index
    %c0_23 = arith.constant 0 : index
    %12 = vector.load %arg6[%c0_20, %c0_21, %c0_22, %c0_23] : memref<3x18x16x128xf32, #tpu.memory_space<vmem>>, vector<1x18x16x128xf32>
    %13 = vector.shape_cast %12 : vector<1x18x16x128xf32> to vector<18x16x128xf32>
    %14 = vector.shape_cast %11 : vector<18x16x128xf32> to vector<1x18x16x128xf32>
    tpu.vector_store %arg6[%c0_20, %c0_21, %c0_22, %c0_23], %14 {strides = array<i32>} : memref<3x18x16x128xf32, #tpu.memory_space<vmem>>, vector<1x18x16x128xf32>,
    %c0_24 = arith.constant 0 : index
    %c8_25 = arith.constant 8 : index
    %c0_26 = arith.constant 0 : index
    %15 = vector.load %arg5[%c0_24, %c8_25, %c0_26] : memref<18x32x128xf32, #tpu.memory_space<vmem>>, vector<18x16x128xf32>
    %c1_27 = arith.constant 1 : index
    %c0_28 = arith.constant 0 : index
    %c0_29 = arith.constant 0 : index
    %c0_30 = arith.constant 0 : index
    %16 = vector.load %arg6[%c1_27, %c0_28, %c0_29, %c0_30] : memref<3x18x16x128xf32, #tpu.memory_space<vmem>>, vector<1x18x16x128xf32>
    %17 = vector.shape_cast %16 : vector<1x18x16x128xf32> to vector<18x16x128xf32>
    %18 = vector.shape_cast %15 : vector<18x16x128xf32> to vector<1x18x16x128xf32>
    tpu.vector_store %arg6[%c1_27, %c0_28, %c0_29, %c0_30], %18 {strides = array<i32>} : memref<3x18x16x128xf32, #tpu.memory_space<vmem>>, vector<1x18x16x128xf32>,
    %c0_31 = arith.constant 0 : index
    %c9_32 = arith.constant 9 : index
    %c0_33 = arith.constant 0 : index
    %19 = vector.load %arg5[%c0_31, %c9_32, %c0_33] : memref<18x32x128xf32, #tpu.memory_space<vmem>>, vector<18x16x128xf32>
    %c2 = arith.constant 2 : index
    %c0_34 = arith.constant 0 : index
    %c0_35 = arith.constant 0 : index
    %c0_36 = arith.constant 0 : index
    %20 = vector.load %arg6[%c2, %c0_34, %c0_35, %c0_36] : memref<3x18x16x128xf32, #tpu.memory_space<vmem>>, vector<1x18x16x128xf32>
    %21 = vector.shape_cast %20 : vector<1x18x16x128xf32> to vector<18x16x128xf32>
    %22 = vector.shape_cast %19 : vector<18x16x128xf32> to vector<1x18x16x128xf32>
    tpu.vector_store %arg6[%c2, %c0_34, %c0_35, %c0_36], %22 {strides = array<i32>} : memref<3x18x16x128xf32, #tpu.memory_space<vmem>>, vector<1x18x16x128xf32>,
    %c0_37 = arith.constant 0 : index
    %c0_38 = arith.constant 0 : index
    %c0_39 = arith.constant 0 : index
    %c0_40 = arith.constant 0 : index
    %23 = vector.load %arg6[%c0_37, %c0_38, %c0_39, %c0_40] : memref<3x18x16x128xf32, #tpu.memory_space<vmem>>, vector<1x16x16x128xf32>
    %24 = vector.shape_cast %23 : vector<1x16x16x128xf32> to vector<16x16x128xf32>
    %25 = vector.shape_cast %24 : vector<16x16x128xf32> to vector<256x128xf32>
    %c0_41 = arith.constant 0 : index
    %c0_42 = arith.constant 0 : index
    %c0_43 = arith.constant 0 : index
    %c0_44 = arith.constant 0 : index
    %26 = vector.load %arg2[%c0_41, %c0_42, %c0_43, %c0_44] : memref<3x3x128x128xf32, #tpu.memory_space<vmem>>, vector<1x1x128x128xf32>
    %27 = vector.shape_cast %26 : vector<1x1x128x128xf32> to vector<128x128xf32>
    %cst = arith.constant dense<0.000000e+00> : vector<256x128xf32>
    %28 = tpu.matmul %25, %27, %cst {dimension_numbers = #tpu.dot_dimension_numbers<[1], [0], [0], [1], [0, 0, 1, 1], [], []>} : vector<256x128xf32>, vector<128x128xf32>, vector<256x128xf32> -> vector<256x128xf32>
    %c1_45 = arith.constant 1 : index
    %c0_46 = arith.constant 0 : index
    %c0_47 = arith.constant 0 : index
    %c0_48 = arith.constant 0 : index
    %29 = vector.load %arg6[%c1_45, %c0_46, %c0_47, %c0_48] : memref<3x18x16x128xf32, #tpu.memory_space<vmem>>, vector<1x16x16x128xf32>
    %30 = vector.shape_cast %29 : vector<1x16x16x128xf32> to vector<16x16x128xf32>
    %31 = vector.shape_cast %30 : vector<16x16x128xf32> to vector<256x128xf32>
    %c0_49 = arith.constant 0 : index
    %c1_50 = arith.constant 1 : index
    %c0_51 = arith.constant 0 : index
    %c0_52 = arith.constant 0 : index
    %32 = vector.load %arg2[%c0_49, %c1_50, %c0_51, %c0_52] : memref<3x3x128x128xf32, #tpu.memory_space<vmem>>, vector<1x1x128x128xf32>
    %33 = vector.shape_cast %32 : vector<1x1x128x128xf32> to vector<128x128xf32>
    %cst_53 = arith.constant dense<0.000000e+00> : vector<256x128xf32>
    %34 = tpu.matmul %31, %33, %cst_53 {dimension_numbers = #tpu.dot_dimension_numbers<[1], [0], [0], [1], [0, 0, 1, 1], [], []>} : vector<256x128xf32>, vector<128x128xf32>, vector<256x128xf32> -> vector<256x128xf32>
    %35 = arith.addf %28, %34 : vector<256x128xf32>
    %c2_54 = arith.constant 2 : index
    %c0_55 = arith.constant 0 : index
    %c0_56 = arith.constant 0 : index
    %c0_57 = arith.constant 0 : index
    %36 = vector.load %arg6[%c2_54, %c0_55, %c0_56, %c0_57] : memref<3x18x16x128xf32, #tpu.memory_space<vmem>>, vector<1x16x16x128xf32>
    %37 = vector.shape_cast %36 : vector<1x16x16x128xf32> to vector<16x16x128xf32>
    %38 = vector.shape_cast %37 : vector<16x16x128xf32> to vector<256x128xf32>
    %c0_58 = arith.constant 0 : index
    %c2_59 = arith.constant 2 : index
    %c0_60 = arith.constant 0 : index
    %c0_61 = arith.constant 0 : index
    %39 = vector.load %arg2[%c0_58, %c2_59, %c0_60, %c0_61] : memref<3x3x128x128xf32, #tpu.memory_space<vmem>>, vector<1x1x128x128xf32>
    %40 = vector.shape_cast %39 : vector<1x1x128x128xf32> to vector<128x128xf32>
    %cst_62 = arith.constant dense<0.000000e+00> : vector<256x128xf32>
    %41 = tpu.matmul %38, %40, %cst_62 {dimension_numbers = #tpu.dot_dimension_numbers<[1], [0], [0], [1], [0, 0, 1, 1], [], []>} : vector<256x128xf32>, vector<128x128xf32>, vector<256x128xf32> -> vector<256x128xf32>
    %42 = arith.addf %35, %41 : vector<256x128xf32>
    %c0_63 = arith.constant 0 : index
    %c1_64 = arith.constant 1 : index
    %c0_65 = arith.constant 0 : index
    %c0_66 = arith.constant 0 : index
    %43 = vector.load %arg6[%c0_63, %c1_64, %c0_65, %c0_66] : memref<3x18x16x128xf32, #tpu.memory_space<vmem>>, vector<1x16x16x128xf32>
    %44 = vector.shape_cast %43 : vector<1x16x16x128xf32> to vector<16x16x128xf32>
    %45 = vector.shape_cast %44 : vector<16x16x128xf32> to vector<256x128xf32>
    %c1_67 = arith.constant 1 : index
    %c0_68 = arith.constant 0 : index
    %c0_69 = arith.constant 0 : index
    %c0_70 = arith.constant 0 : index
    %46 = vector.load %arg2[%c1_67, %c0_68, %c0_69, %c0_70] : memref<3x3x128x128xf32, #tpu.memory_space<vmem>>, vector<1x1x128x128xf32>
    %47 = vector.shape_cast %46 : vector<1x1x128x128xf32> to vector<128x128xf32>
    %cst_71 = arith.constant dense<0.000000e+00> : vector<256x128xf32>
    %48 = tpu.matmul %45, %47, %cst_71 {dimension_numbers = #tpu.dot_dimension_numbers<[1], [0], [0], [1], [0, 0, 1, 1], [], []>} : vector<256x128xf32>, vector<128x128xf32>, vector<256x128xf32> -> vector<256x128xf32>
    %49 = arith.addf %42, %48 : vector<256x128xf32>
    %c1_72 = arith.constant 1 : index
    %c1_73 = arith.constant 1 : index
    %c0_74 = arith.constant 0 : index
    %c0_75 = arith.constant 0 : index
    %50 = vector.load %arg6[%c1_72, %c1_73, %c0_74, %c0_75] : memref<3x18x16x128xf32, #tpu.memory_space<vmem>>, vector<1x16x16x128xf32>
    %51 = vector.shape_cast %50 : vector<1x16x16x128xf32> to vector<16x16x128xf32>
    %52 = vector.shape_cast %51 : vector<16x16x128xf32> to vector<256x128xf32>
    %c1_76 = arith.constant 1 : index
    %c1_77 = arith.constant 1 : index
    %c0_78 = arith.constant 0 : index
    %c0_79 = arith.constant 0 : index
    %53 = vector.load %arg2[%c1_76, %c1_77, %c0_78, %c0_79] : memref<3x3x128x128xf32, #tpu.memory_space<vmem>>, vector<1x1x128x128xf32>
    %54 = vector.shape_cast %53 : vector<1x1x128x128xf32> to vector<128x128xf32>
    %cst_80 = arith.constant dense<0.000000e+00> : vector<256x128xf32>
    %55 = tpu.matmul %52, %54, %cst_80 {dimension_numbers = #tpu.dot_dimension_numbers<[1], [0], [0], [1], [0, 0, 1, 1], [], []>} : vector<256x128xf32>, vector<128x128xf32>, vector<256x128xf32> -> vector<256x128xf32>
    %56 = arith.addf %49, %55 : vector<256x128xf32>
    %c2_81 = arith.constant 2 : index
    %c1_82 = arith.constant 1 : index
    %c0_83 = arith.constant 0 : index
    %c0_84 = arith.constant 0 : index
    %57 = vector.load %arg6[%c2_81, %c1_82, %c0_83, %c0_84] : memref<3x18x16x128xf32, #tpu.memory_space<vmem>>, vector<1x16x16x128xf32>
    %58 = vector.shape_cast %57 : vector<1x16x16x128xf32> to vector<16x16x128xf32>
    %59 = vector.shape_cast %58 : vector<16x16x128xf32> to vector<256x128xf32>
    %c1_85 = arith.constant 1 : index
    %c2_86 = arith.constant 2 : index
    %c0_87 = arith.constant 0 : index
    %c0_88 = arith.constant 0 : index
    %60 = vector.load %arg2[%c1_85, %c2_86, %c0_87, %c0_88] : memref<3x3x128x128xf32, #tpu.memory_space<vmem>>, vector<1x1x128x128xf32>
    %61 = vector.shape_cast %60 : vector<1x1x128x128xf32> to vector<128x128xf32>
    %cst_89 = arith.constant dense<0.000000e+00> : vector<256x128xf32>
    %62 = tpu.matmul %59, %61, %cst_89 {dimension_numbers = #tpu.dot_dimension_numbers<[1], [0], [0], [1], [0, 0, 1, 1], [], []>} : vector<256x128xf32>, vector<128x128xf32>, vector<256x128xf32> -> vector<256x128xf32>
    %63 = arith.addf %56, %62 : vector<256x128xf32>
    %c0_90 = arith.constant 0 : index
    %c2_91 = arith.constant 2 : index
    %c0_92 = arith.constant 0 : index
    %c0_93 = arith.constant 0 : index
    %64 = vector.load %arg6[%c0_90, %c2_91, %c0_92, %c0_93] : memref<3x18x16x128xf32, #tpu.memory_space<vmem>>, vector<1x16x16x128xf32>
    %65 = vector.shape_cast %64 : vector<1x16x16x128xf32> to vector<16x16x128xf32>
    %66 = vector.shape_cast %65 : vector<16x16x128xf32> to vector<256x128xf32>
    %c2_94 = arith.constant 2 : index
    %c0_95 = arith.constant 0 : index
    %c0_96 = arith.constant 0 : index
    %c0_97 = arith.constant 0 : index
    %67 = vector.load %arg2[%c2_94, %c0_95, %c0_96, %c0_97] : memref<3x3x128x128xf32, #tpu.memory_space<vmem>>, vector<1x1x128x128xf32>
    %68 = vector.shape_cast %67 : vector<1x1x128x128xf32> to vector<128x128xf32>
    %cst_98 = arith.constant dense<0.000000e+00> : vector<256x128xf32>
    %69 = tpu.matmul %66, %68, %cst_98 {dimension_numbers = #tpu.dot_dimension_numbers<[1], [0], [0], [1], [0, 0, 1, 1], [], []>} : vector<256x128xf32>, vector<128x128xf32>, vector<256x128xf32> -> vector<256x128xf32>
    %70 = arith.addf %63, %69 : vector<256x128xf32>
    %c1_99 = arith.constant 1 : index
    %c2_100 = arith.constant 2 : index
    %c0_101 = arith.constant 0 : index
    %c0_102 = arith.constant 0 : index
    %71 = vector.load %arg6[%c1_99, %c2_100, %c0_101, %c0_102] : memref<3x18x16x128xf32, #tpu.memory_space<vmem>>, vector<1x16x16x128xf32>
    %72 = vector.shape_cast %71 : vector<1x16x16x128xf32> to vector<16x16x128xf32>
    %73 = vector.shape_cast %72 : vector<16x16x128xf32> to vector<256x128xf32>
    %c2_103 = arith.constant 2 : index
    %c1_104 = arith.constant 1 : index
    %c0_105 = arith.constant 0 : index
    %c0_106 = arith.constant 0 : index
    %74 = vector.load %arg2[%c2_103, %c1_104, %c0_105, %c0_106] : memref<3x3x128x128xf32, #tpu.memory_space<vmem>>, vector<1x1x128x128xf32>
    %75 = vector.shape_cast %74 : vector<1x1x128x128xf32> to vector<128x128xf32>
    %cst_107 = arith.constant dense<0.000000e+00> : vector<256x128xf32>
    %76 = tpu.matmul %73, %75, %cst_107 {dimension_numbers = #tpu.dot_dimension_numbers<[1], [0], [0], [1], [0, 0, 1, 1], [], []>} : vector<256x128xf32>, vector<128x128xf32>, vector<256x128xf32> -> vector<256x128xf32>
    %77 = arith.addf %70, %76 : vector<256x128xf32>
    %c2_108 = arith.constant 2 : index
    %c2_109 = arith.constant 2 : index
    %c0_110 = arith.constant 0 : index
    %c0_111 = arith.constant 0 : index
    %78 = vector.load %arg6[%c2_108, %c2_109, %c0_110, %c0_111] : memref<3x18x16x128xf32, #tpu.memory_space<vmem>>, vector<1x16x16x128xf32>
    %79 = vector.shape_cast %78 : vector<1x16x16x128xf32> to vector<16x16x128xf32>
    %80 = vector.shape_cast %79 : vector<16x16x128xf32> to vector<256x128xf32>
    %c2_112 = arith.constant 2 : index
    %c2_113 = arith.constant 2 : index
    %c0_114 = arith.constant 0 : index
    %c0_115 = arith.constant 0 : index
    %81 = vector.load %arg2[%c2_112, %c2_113, %c0_114, %c0_115] : memref<3x3x128x128xf32, #tpu.memory_space<vmem>>, vector<1x1x128x128xf32>
    %82 = vector.shape_cast %81 : vector<1x1x128x128xf32> to vector<128x128xf32>
    %cst_116 = arith.constant dense<0.000000e+00> : vector<256x128xf32>
    %83 = tpu.matmul %80, %82, %cst_116 {dimension_numbers = #tpu.dot_dimension_numbers<[1], [0], [0], [1], [0, 0, 1, 1], [], []>} : vector<256x128xf32>, vector<128x128xf32>, vector<256x128xf32> -> vector<256x128xf32>
    %84 = arith.addf %77, %83 : vector<256x128xf32>
    %85 = vector.shape_cast %84 : vector<256x128xf32> to vector<16x16x128xf32>
    %cst_117 = arith.constant dense<0.000000e+00> : vector<128xf32>
    %86 = vector.multi_reduction <add>, %85, %cst_117 [0, 1] : vector<16x16x128xf32> to vector<128xf32>
    %87 = vector.shape_cast %86 : vector<128xf32> to vector<1x1x128xf32>
    %cst_118 = arith.constant 3.906250e-03 : f32
    %88 = vector.broadcast %cst_118 : f32 to vector<1x1x128xf32>
    %89 = arith.mulf %87, %88 : vector<1x1x128xf32>
    %90 = arith.mulf %85, %85 : vector<16x16x128xf32>
    %cst_119 = arith.constant dense<0.000000e+00> : vector<128xf32>
    %91 = vector.multi_reduction <add>, %90, %cst_119 [0, 1] : vector<16x16x128xf32> to vector<128xf32>
    %92 = vector.shape_cast %91 : vector<128xf32> to vector<1x1x128xf32>
    %cst_120 = arith.constant 3.906250e-03 : f32
    %93 = vector.broadcast %cst_120 : f32 to vector<1x1x128xf32>
    %94 = arith.mulf %92, %93 : vector<1x1x128xf32>
    %95 = arith.mulf %89, %89 : vector<1x1x128xf32>
    %96 = arith.subf %94, %95 : vector<1x1x128xf32>
    %97 = vector.broadcast %89 : vector<1x1x128xf32> to vector<16x16x128xf32>
    %98 = arith.subf %85, %97 : vector<16x16x128xf32>
    %cst_121 = arith.constant 9.99999974E-6 : f32
    %99 = vector.broadcast %cst_121 : f32 to vector<1x1x128xf32>
    %100 = arith.addf %96, %99 : vector<1x1x128xf32>
    %101 = math.rsqrt %100 : vector<1x1x128xf32>
    %102 = vector.broadcast %101 : vector<1x1x128xf32> to vector<16x16x128xf32>
    %103 = arith.mulf %98, %102 : vector<16x16x128xf32>
    %cst_122 = arith.constant 0.000000e+00 : f32
    %104 = vector.broadcast %cst_122 : f32 to vector<16x16x128xf32>
    %105 = arith.maximumf %103, %104 : vector<16x16x128xf32>
    %c1_123 = arith.constant 1 : index
    %c8_124 = arith.constant 8 : index
    %c0_125 = arith.constant 0 : index
    %106 = vector.load %arg5[%c1_123, %c8_124, %c0_125] : memref<18x32x128xf32, #tpu.memory_space<vmem>>, vector<16x16x128xf32>
    tpu.vector_store %arg5[%c1_123, %c8_124, %c0_125], %105 {strides = array<i32>} : memref<18x32x128xf32, #tpu.memory_space<vmem>>, vector<16x16x128xf32>,
    %107 = vector.extract_strided_slice %105 {offsets = [1, 0, 0], sizes = [1, 16, 128], strides = [1, 1, 1]} : vector<16x16x128xf32> to vector<1x16x128xf32>
    %c0_126 = arith.constant 0 : index
    %c8_127 = arith.constant 8 : index
    %c0_128 = arith.constant 0 : index
    %108 = vector.load %arg5[%c0_126, %c8_127, %c0_128] : memref<18x32x128xf32, #tpu.memory_space<vmem>>, vector<1x16x128xf32>
    tpu.vector_store %arg5[%c0_126, %c8_127, %c0_128], %107 {strides = array<i32>} : memref<18x32x128xf32, #tpu.memory_space<vmem>>, vector<1x16x128xf32>,
    %109 = vector.extract_strided_slice %105 {offsets = [14, 0, 0], sizes = [1, 16, 128], strides = [1, 1, 1]} : vector<16x16x128xf32> to vector<1x16x128xf32>
    %c17_129 = arith.constant 17 : index
    %c8_130 = arith.constant 8 : index
    %c0_131 = arith.constant 0 : index
    %110 = vector.load %arg5[%c17_129, %c8_130, %c0_131] : memref<18x32x128xf32, #tpu.memory_space<vmem>>, vector<1x16x128xf32>
    tpu.vector_store %arg5[%c17_129, %c8_130, %c0_131], %109 {strides = array<i32>} : memref<18x32x128xf32, #tpu.memory_space<vmem>>, vector<1x16x128xf32>,
    %c0_132 = arith.constant 0 : index
    %c9_133 = arith.constant 9 : index
    %c0_134 = arith.constant 0 : index
    %111 = vector.load %arg5[%c0_132, %c9_133, %c0_134] : memref<18x32x128xf32, #tpu.memory_space<vmem>>, vector<18x1x128xf32>
    %c0_135 = arith.constant 0 : index
    %c7_136 = arith.constant 7 : index
    %c0_137 = arith.constant 0 : index
    %112 = vector.load %arg5[%c0_135, %c7_136, %c0_137] : memref<18x32x128xf32, #tpu.memory_space<vmem>>, vector<18x1x128xf32>
    tpu.vector_store %arg5[%c0_135, %c7_136, %c0_137], %111 {strides = array<i32>} : memref<18x32x128xf32, #tpu.memory_space<vmem>>, vector<18x1x128xf32>,
    %c0_138 = arith.constant 0 : index
    %c22_139 = arith.constant 22 : index
    %c0_140 = arith.constant 0 : index
    %113 = vector.load %arg5[%c0_138, %c22_139, %c0_140] : memref<18x32x128xf32, #tpu.memory_space<vmem>>, vector<18x1x128xf32>
    %c0_141 = arith.constant 0 : index
    %c24_142 = arith.constant 24 : index
    %c0_143 = arith.constant 0 : index
    %114 = vector.load %arg5[%c0_141, %c24_142, %c0_143] : memref<18x32x128xf32, #tpu.memory_space<vmem>>, vector<18x1x128xf32>
    tpu.vector_store %arg5[%c0_141, %c24_142, %c0_143], %113 {strides = array<i32>} : memref<18x32x128xf32, #tpu.memory_space<vmem>>, vector<18x1x128xf32>,
    %c0_144 = arith.constant 0 : index
    %c7_145 = arith.constant 7 : index
    %c0_146 = arith.constant 0 : index
    %115 = vector.load %arg5[%c0_144, %c7_145, %c0_146] : memref<18x32x128xf32, #tpu.memory_space<vmem>>, vector<18x16x128xf32>
    %c0_147 = arith.constant 0 : index
    %c0_148 = arith.constant 0 : index
    %c0_149 = arith.constant 0 : index
    %c0_150 = arith.constant 0 : index
    %116 = vector.load %arg6[%c0_147, %c0_148, %c0_149, %c0_150] : memref<3x18x16x128xf32, #tpu.memory_space<vmem>>, vector<1x18x16x128xf32>
    %117 = vector.shape_cast %116 : vector<1x18x16x128xf32> to vector<18x16x128xf32>
    %118 = vector.shape_cast %115 : vector<18x16x128xf32> to vector<1x18x16x128xf32>
    tpu.vector_store %arg6[%c0_147, %c0_148, %c0_149, %c0_150], %118 {strides = array<i32>} : memref<3x18x16x128xf32, #tpu.memory_space<vmem>>, vector<1x18x16x128xf32>,
    %c0_151 = arith.constant 0 : index
    %c8_152 = arith.constant 8 : index
    %c0_153 = arith.constant 0 : index
    %119 = vector.load %arg5[%c0_151, %c8_152, %c0_153] : memref<18x32x128xf32, #tpu.memory_space<vmem>>, vector<18x16x128xf32>
    %c1_154 = arith.constant 1 : index
    %c0_155 = arith.constant 0 : index
    %c0_156 = arith.constant 0 : index
    %c0_157 = arith.constant 0 : index
    %120 = vector.load %arg6[%c1_154, %c0_155, %c0_156, %c0_157] : memref<3x18x16x128xf32, #tpu.memory_space<vmem>>, vector<1x18x16x128xf32>
    %121 = vector.shape_cast %120 : vector<1x18x16x128xf32> to vector<18x16x128xf32>
    %122 = vector.shape_cast %119 : vector<18x16x128xf32> to vector<1x18x16x128xf32>
    tpu.vector_store %arg6[%c1_154, %c0_155, %c0_156, %c0_157], %122 {strides = array<i32>} : memref<3x18x16x128xf32, #tpu.memory_space<vmem>>, vector<1x18x16x128xf32>,
    %c0_158 = arith.constant 0 : index
    %c9_159 = arith.constant 9 : index
    %c0_160 = arith.constant 0 : index
    %123 = vector.load %arg5[%c0_158, %c9_159, %c0_160] : memref<18x32x128xf32, #tpu.memory_space<vmem>>, vector<18x16x128xf32>
    %c2_161 = arith.constant 2 : index
    %c0_162 = arith.constant 0 : index
    %c0_163 = arith.constant 0 : index
    %c0_164 = arith.constant 0 : index
    %124 = vector.load %arg6[%c2_161, %c0_162, %c0_163, %c0_164] : memref<3x18x16x128xf32, #tpu.memory_space<vmem>>, vector<1x18x16x128xf32>
    %125 = vector.shape_cast %124 : vector<1x18x16x128xf32> to vector<18x16x128xf32>
    %126 = vector.shape_cast %123 : vector<18x16x128xf32> to vector<1x18x16x128xf32>
    tpu.vector_store %arg6[%c2_161, %c0_162, %c0_163, %c0_164], %126 {strides = array<i32>} : memref<3x18x16x128xf32, #tpu.memory_space<vmem>>, vector<1x18x16x128xf32>,
    %c0_165 = arith.constant 0 : index
    %c0_166 = arith.constant 0 : index
    %c0_167 = arith.constant 0 : index
    %c0_168 = arith.constant 0 : index
    %127 = vector.load %arg6[%c0_165, %c0_166, %c0_167, %c0_168] : memref<3x18x16x128xf32, #tpu.memory_space<vmem>>, vector<1x16x16x128xf32>
    %128 = vector.shape_cast %127 : vector<1x16x16x128xf32> to vector<16x16x128xf32>
    %129 = vector.shape_cast %128 : vector<16x16x128xf32> to vector<256x128xf32>
    %c0_169 = arith.constant 0 : index
    %c0_170 = arith.constant 0 : index
    %c0_171 = arith.constant 0 : index
    %c0_172 = arith.constant 0 : index
    %130 = vector.load %arg3[%c0_169, %c0_170, %c0_171, %c0_172] : memref<3x3x128x128xf32, #tpu.memory_space<vmem>>, vector<1x1x128x128xf32>
    %131 = vector.shape_cast %130 : vector<1x1x128x128xf32> to vector<128x128xf32>
    %cst_173 = arith.constant dense<0.000000e+00> : vector<256x128xf32>
    %132 = tpu.matmul %129, %131, %cst_173 {dimension_numbers = #tpu.dot_dimension_numbers<[1], [0], [0], [1], [0, 0, 1, 1], [], []>} : vector<256x128xf32>, vector<128x128xf32>, vector<256x128xf32> -> vector<256x128xf32>
    %c1_174 = arith.constant 1 : index
    %c0_175 = arith.constant 0 : index
    %c0_176 = arith.constant 0 : index
    %c0_177 = arith.constant 0 : index
    %133 = vector.load %arg6[%c1_174, %c0_175, %c0_176, %c0_177] : memref<3x18x16x128xf32, #tpu.memory_space<vmem>>, vector<1x16x16x128xf32>
    %134 = vector.shape_cast %133 : vector<1x16x16x128xf32> to vector<16x16x128xf32>
    %135 = vector.shape_cast %134 : vector<16x16x128xf32> to vector<256x128xf32>
    %c0_178 = arith.constant 0 : index
    %c1_179 = arith.constant 1 : index
    %c0_180 = arith.constant 0 : index
    %c0_181 = arith.constant 0 : index
    %136 = vector.load %arg3[%c0_178, %c1_179, %c0_180, %c0_181] : memref<3x3x128x128xf32, #tpu.memory_space<vmem>>, vector<1x1x128x128xf32>
    %137 = vector.shape_cast %136 : vector<1x1x128x128xf32> to vector<128x128xf32>
    %cst_182 = arith.constant dense<0.000000e+00> : vector<256x128xf32>
    %138 = tpu.matmul %135, %137, %cst_182 {dimension_numbers = #tpu.dot_dimension_numbers<[1], [0], [0], [1], [0, 0, 1, 1], [], []>} : vector<256x128xf32>, vector<128x128xf32>, vector<256x128xf32> -> vector<256x128xf32>
    %139 = arith.addf %132, %138 : vector<256x128xf32>
    %c2_183 = arith.constant 2 : index
    %c0_184 = arith.constant 0 : index
    %c0_185 = arith.constant 0 : index
    %c0_186 = arith.constant 0 : index
    %140 = vector.load %arg6[%c2_183, %c0_184, %c0_185, %c0_186] : memref<3x18x16x128xf32, #tpu.memory_space<vmem>>, vector<1x16x16x128xf32>
    %141 = vector.shape_cast %140 : vector<1x16x16x128xf32> to vector<16x16x128xf32>
    %142 = vector.shape_cast %141 : vector<16x16x128xf32> to vector<256x128xf32>
    %c0_187 = arith.constant 0 : index
    %c2_188 = arith.constant 2 : index
    %c0_189 = arith.constant 0 : index
    %c0_190 = arith.constant 0 : index
    %143 = vector.load %arg3[%c0_187, %c2_188, %c0_189, %c0_190] : memref<3x3x128x128xf32, #tpu.memory_space<vmem>>, vector<1x1x128x128xf32>
    %144 = vector.shape_cast %143 : vector<1x1x128x128xf32> to vector<128x128xf32>
    %cst_191 = arith.constant dense<0.000000e+00> : vector<256x128xf32>
    %145 = tpu.matmul %142, %144, %cst_191 {dimension_numbers = #tpu.dot_dimension_numbers<[1], [0], [0], [1], [0, 0, 1, 1], [], []>} : vector<256x128xf32>, vector<128x128xf32>, vector<256x128xf32> -> vector<256x128xf32>
    %146 = arith.addf %139, %145 : vector<256x128xf32>
    %c0_192 = arith.constant 0 : index
    %c1_193 = arith.constant 1 : index
    %c0_194 = arith.constant 0 : index
    %c0_195 = arith.constant 0 : index
    %147 = vector.load %arg6[%c0_192, %c1_193, %c0_194, %c0_195] : memref<3x18x16x128xf32, #tpu.memory_space<vmem>>, vector<1x16x16x128xf32>
    %148 = vector.shape_cast %147 : vector<1x16x16x128xf32> to vector<16x16x128xf32>
    %149 = vector.shape_cast %148 : vector<16x16x128xf32> to vector<256x128xf32>
    %c1_196 = arith.constant 1 : index
    %c0_197 = arith.constant 0 : index
    %c0_198 = arith.constant 0 : index
    %c0_199 = arith.constant 0 : index
    %150 = vector.load %arg3[%c1_196, %c0_197, %c0_198, %c0_199] : memref<3x3x128x128xf32, #tpu.memory_space<vmem>>, vector<1x1x128x128xf32>
    %151 = vector.shape_cast %150 : vector<1x1x128x128xf32> to vector<128x128xf32>
    %cst_200 = arith.constant dense<0.000000e+00> : vector<256x128xf32>
    %152 = tpu.matmul %149, %151, %cst_200 {dimension_numbers = #tpu.dot_dimension_numbers<[1], [0], [0], [1], [0, 0, 1, 1], [], []>} : vector<256x128xf32>, vector<128x128xf32>, vector<256x128xf32> -> vector<256x128xf32>
    %153 = arith.addf %146, %152 : vector<256x128xf32>
    %c1_201 = arith.constant 1 : index
    %c1_202 = arith.constant 1 : index
    %c0_203 = arith.constant 0 : index
    %c0_204 = arith.constant 0 : index
    %154 = vector.load %arg6[%c1_201, %c1_202, %c0_203, %c0_204] : memref<3x18x16x128xf32, #tpu.memory_space<vmem>>, vector<1x16x16x128xf32>
    %155 = vector.shape_cast %154 : vector<1x16x16x128xf32> to vector<16x16x128xf32>
    %156 = vector.shape_cast %155 : vector<16x16x128xf32> to vector<256x128xf32>
    %c1_205 = arith.constant 1 : index
    %c1_206 = arith.constant 1 : index
    %c0_207 = arith.constant 0 : index
    %c0_208 = arith.constant 0 : index
    %157 = vector.load %arg3[%c1_205, %c1_206, %c0_207, %c0_208] : memref<3x3x128x128xf32, #tpu.memory_space<vmem>>, vector<1x1x128x128xf32>
    %158 = vector.shape_cast %157 : vector<1x1x128x128xf32> to vector<128x128xf32>
    %cst_209 = arith.constant dense<0.000000e+00> : vector<256x128xf32>
    %159 = tpu.matmul %156, %158, %cst_209 {dimension_numbers = #tpu.dot_dimension_numbers<[1], [0], [0], [1], [0, 0, 1, 1], [], []>} : vector<256x128xf32>, vector<128x128xf32>, vector<256x128xf32> -> vector<256x128xf32>
    %160 = arith.addf %153, %159 : vector<256x128xf32>
    %c2_210 = arith.constant 2 : index
    %c1_211 = arith.constant 1 : index
    %c0_212 = arith.constant 0 : index
    %c0_213 = arith.constant 0 : index
    %161 = vector.load %arg6[%c2_210, %c1_211, %c0_212, %c0_213] : memref<3x18x16x128xf32, #tpu.memory_space<vmem>>, vector<1x16x16x128xf32>
    %162 = vector.shape_cast %161 : vector<1x16x16x128xf32> to vector<16x16x128xf32>
    %163 = vector.shape_cast %162 : vector<16x16x128xf32> to vector<256x128xf32>
    %c1_214 = arith.constant 1 : index
    %c2_215 = arith.constant 2 : index
    %c0_216 = arith.constant 0 : index
    %c0_217 = arith.constant 0 : index
    %164 = vector.load %arg3[%c1_214, %c2_215, %c0_216, %c0_217] : memref<3x3x128x128xf32, #tpu.memory_space<vmem>>, vector<1x1x128x128xf32>
    %165 = vector.shape_cast %164 : vector<1x1x128x128xf32> to vector<128x128xf32>
    %cst_218 = arith.constant dense<0.000000e+00> : vector<256x128xf32>
    %166 = tpu.matmul %163, %165, %cst_218 {dimension_numbers = #tpu.dot_dimension_numbers<[1], [0], [0], [1], [0, 0, 1, 1], [], []>} : vector<256x128xf32>, vector<128x128xf32>, vector<256x128xf32> -> vector<256x128xf32>
    %167 = arith.addf %160, %166 : vector<256x128xf32>
    %c0_219 = arith.constant 0 : index
    %c2_220 = arith.constant 2 : index
    %c0_221 = arith.constant 0 : index
    %c0_222 = arith.constant 0 : index
    %168 = vector.load %arg6[%c0_219, %c2_220, %c0_221, %c0_222] : memref<3x18x16x128xf32, #tpu.memory_space<vmem>>, vector<1x16x16x128xf32>
    %169 = vector.shape_cast %168 : vector<1x16x16x128xf32> to vector<16x16x128xf32>
    %170 = vector.shape_cast %169 : vector<16x16x128xf32> to vector<256x128xf32>
    %c2_223 = arith.constant 2 : index
    %c0_224 = arith.constant 0 : index
    %c0_225 = arith.constant 0 : index
    %c0_226 = arith.constant 0 : index
    %171 = vector.load %arg3[%c2_223, %c0_224, %c0_225, %c0_226] : memref<3x3x128x128xf32, #tpu.memory_space<vmem>>, vector<1x1x128x128xf32>
    %172 = vector.shape_cast %171 : vector<1x1x128x128xf32> to vector<128x128xf32>
    %cst_227 = arith.constant dense<0.000000e+00> : vector<256x128xf32>
    %173 = tpu.matmul %170, %172, %cst_227 {dimension_numbers = #tpu.dot_dimension_numbers<[1], [0], [0], [1], [0, 0, 1, 1], [], []>} : vector<256x128xf32>, vector<128x128xf32>, vector<256x128xf32> -> vector<256x128xf32>
    %174 = arith.addf %167, %173 : vector<256x128xf32>
    %c1_228 = arith.constant 1 : index
    %c2_229 = arith.constant 2 : index
    %c0_230 = arith.constant 0 : index
    %c0_231 = arith.constant 0 : index
    %175 = vector.load %arg6[%c1_228, %c2_229, %c0_230, %c0_231] : memref<3x18x16x128xf32, #tpu.memory_space<vmem>>, vector<1x16x16x128xf32>
    %176 = vector.shape_cast %175 : vector<1x16x16x128xf32> to vector<16x16x128xf32>
    %177 = vector.shape_cast %176 : vector<16x16x128xf32> to vector<256x128xf32>
    %c2_232 = arith.constant 2 : index
    %c1_233 = arith.constant 1 : index
    %c0_234 = arith.constant 0 : index
    %c0_235 = arith.constant 0 : index
    %178 = vector.load %arg3[%c2_232, %c1_233, %c0_234, %c0_235] : memref<3x3x128x128xf32, #tpu.memory_space<vmem>>, vector<1x1x128x128xf32>
    %179 = vector.shape_cast %178 : vector<1x1x128x128xf32> to vector<128x128xf32>
    %cst_236 = arith.constant dense<0.000000e+00> : vector<256x128xf32>
    %180 = tpu.matmul %177, %179, %cst_236 {dimension_numbers = #tpu.dot_dimension_numbers<[1], [0], [0], [1], [0, 0, 1, 1], [], []>} : vector<256x128xf32>, vector<128x128xf32>, vector<256x128xf32> -> vector<256x128xf32>
    %181 = arith.addf %174, %180 : vector<256x128xf32>
    %c2_237 = arith.constant 2 : index
    %c2_238 = arith.constant 2 : index
    %c0_239 = arith.constant 0 : index
    %c0_240 = arith.constant 0 : index
    %182 = vector.load %arg6[%c2_237, %c2_238, %c0_239, %c0_240] : memref<3x18x16x128xf32, #tpu.memory_space<vmem>>, vector<1x16x16x128xf32>
    %183 = vector.shape_cast %182 : vector<1x16x16x128xf32> to vector<16x16x128xf32>
    %184 = vector.shape_cast %183 : vector<16x16x128xf32> to vector<256x128xf32>
    %c2_241 = arith.constant 2 : index
    %c2_242 = arith.constant 2 : index
    %c0_243 = arith.constant 0 : index
    %c0_244 = arith.constant 0 : index
    %185 = vector.load %arg3[%c2_241, %c2_242, %c0_243, %c0_244] : memref<3x3x128x128xf32, #tpu.memory_space<vmem>>, vector<1x1x128x128xf32>
    %186 = vector.shape_cast %185 : vector<1x1x128x128xf32> to vector<128x128xf32>
    %cst_245 = arith.constant dense<0.000000e+00> : vector<256x128xf32>
    %187 = tpu.matmul %184, %186, %cst_245 {dimension_numbers = #tpu.dot_dimension_numbers<[1], [0], [0], [1], [0, 0, 1, 1], [], []>} : vector<256x128xf32>, vector<128x128xf32>, vector<256x128xf32> -> vector<256x128xf32>
    %188 = arith.addf %181, %187 : vector<256x128xf32>
    %189 = vector.shape_cast %188 : vector<256x128xf32> to vector<16x16x128xf32>
    %cst_246 = arith.constant dense<0.000000e+00> : vector<128xf32>
    %190 = vector.multi_reduction <add>, %189, %cst_246 [0, 1] : vector<16x16x128xf32> to vector<128xf32>
    %191 = vector.shape_cast %190 : vector<128xf32> to vector<1x1x128xf32>
    %cst_247 = arith.constant 3.906250e-03 : f32
    %192 = vector.broadcast %cst_247 : f32 to vector<1x1x128xf32>
    %193 = arith.mulf %191, %192 : vector<1x1x128xf32>
    %194 = arith.mulf %189, %189 : vector<16x16x128xf32>
    %cst_248 = arith.constant dense<0.000000e+00> : vector<128xf32>
    %195 = vector.multi_reduction <add>, %194, %cst_248 [0, 1] : vector<16x16x128xf32> to vector<128xf32>
    %196 = vector.shape_cast %195 : vector<128xf32> to vector<1x1x128xf32>
    %cst_249 = arith.constant 3.906250e-03 : f32
    %197 = vector.broadcast %cst_249 : f32 to vector<1x1x128xf32>
    %198 = arith.mulf %196, %197 : vector<1x1x128xf32>
    %199 = arith.mulf %193, %193 : vector<1x1x128xf32>
    %200 = arith.subf %198, %199 : vector<1x1x128xf32>
    %201 = vector.broadcast %193 : vector<1x1x128xf32> to vector<16x16x128xf32>
    %202 = arith.subf %189, %201 : vector<16x16x128xf32>
    %cst_250 = arith.constant 9.99999974E-6 : f32
    %203 = vector.broadcast %cst_250 : f32 to vector<1x1x128xf32>
    %204 = arith.addf %200, %203 : vector<1x1x128xf32>
    %205 = math.rsqrt %204 : vector<1x1x128xf32>
    %206 = vector.broadcast %205 : vector<1x1x128xf32> to vector<16x16x128xf32>
    %207 = arith.mulf %202, %206 : vector<16x16x128xf32>
    %208 = arith.addf %1, %207 : vector<16x16x128xf32>
    %c0_251 = arith.constant 0 : index
    %c0_252 = arith.constant 0 : index
    %c0_253 = arith.constant 0 : index
    %c0_254 = arith.constant 0 : index
    %209 = vector.load %arg4[%c0_251, %c0_252, %c0_253, %c0_254] : memref<1x16x16x128xf32, #tpu.memory_space<vmem>>, vector<1x16x16x128xf32>
    %210 = vector.shape_cast %209 : vector<1x16x16x128xf32> to vector<16x16x128xf32>
    %211 = vector.shape_cast %208 : vector<16x16x128xf32> to vector<1x16x16x128xf32>
    tpu.vector_store %arg4[%c0_251, %c0_252, %c0_253, %c0_254], %211 {strides = array<i32>} : memref<1x16x16x128xf32, #tpu.memory_space<vmem>>, vector<1x16x16x128xf32>,
    return
  }
  func.func @transform_0(%arg0: i32) -> (i32, i32, i32, i32) {
    %c0_i32 = arith.constant 0 : i32
    %c0_i32_0 = arith.constant 0 : i32
    %c0_i32_1 = arith.constant 0 : i32
    %c0_i32_2 = arith.constant 0 : i32
    return %arg0, %c0_i32, %c0_i32_0, %c0_i32_1 : i32, i32, i32, i32
  }
  func.func @transform_1(%arg0: i32) -> (i32, i32, i32, i32) {
    %c0_i32 = arith.constant 0 : i32
    %c0_i32_0 = arith.constant 0 : i32
    %c0_i32_1 = arith.constant 0 : i32
    %c0_i32_2 = arith.constant 0 : i32
    %c0_i32_3 = arith.constant 0 : i32
    return %c0_i32, %c0_i32_0, %c0_i32_1, %c0_i32_2 : i32, i32, i32, i32
  }
  func.func @transform_2(%arg0: i32) -> (i32, i32, i32, i32) {
    %c0_i32 = arith.constant 0 : i32
    %c0_i32_0 = arith.constant 0 : i32
    %c0_i32_1 = arith.constant 0 : i32
    %c0_i32_2 = arith.constant 0 : i32
    %c0_i32_3 = arith.constant 0 : i32
    return %c0_i32, %c0_i32_0, %c0_i32_1, %c0_i32_2 : i32, i32, i32, i32
  }
  func.func @transform_3(%arg0: i32) -> (i32, i32, i32, i32) {
    %c0_i32 = arith.constant 0 : i32
    %c0_i32_0 = arith.constant 0 : i32
    %c0_i32_1 = arith.constant 0 : i32
    %c0_i32_2 = arith.constant 0 : i32
    return %arg0, %c0_i32, %c0_i32_0, %c0_i32_1 : i32, i32, i32, i32
  }
}

</mosaic_0001>

<bundles_post_ra>
// kernel: tpu_custom_call.1
= control target key start
LH: loop header
LB: loop body
LE: loop exit
PB: predicated region body
PF: predicated region fallthrough
CT: control target
= control target key end

     0   :  { %8 = vsyncpa [#allocation5], 0  ;;  %s12426_s0 = inlined_call_operand.hbm [shape: f32[2,16,16,128], index: 0, kind: input, shape index: {}]   ;;  %s12427_s1 = inlined_call_operand.hbm [shape: f32[3,3,128,128], index: 1, kind: input, shape index: {}]   ;;  %s12428_s2 = inlined_call_operand.hbm [shape: f32[3,3,128,128], index: 2, kind: input, shape index: {}]   ;;  %s12429_s3 = inlined_call_operand.hbm [shape: f32[2,16,16,128], index: 3, kind: output, shape index: {}]  }
   0x1   :  { %10 = vsyncpa [#allocation5 + $0x1], 0 }
   0x2   :  { %11 = vsyncpa [#allocation8], 0 }
   0x3   :  { %12 = vsyncpa [#allocation6], 0 }
   0x4   :  { %14 = vsyncpa [#allocation6 + $0x1], 0  ;;  %s10571_s12 = smov 0   ;;  %s10573_s13 = smov 0  }
   0x5   :  { %s10575_s14 = smov 0   ;;  %s10577_s15 = smov 0  }
   0x6 LB: > { %s10592_s16 = sadd.s32 4294967295, %s10541_s15   ;;  %s6840_s17 = sadd.s32 4294967294, %s10541_s15   ;;  %s10541_s15 = sphi %s10577_s15, %s12796_s15   ;;  %s10537_s14 = sphi %s10575_s14, %s12795_s14   ;;  %s10533_s13 = sphi %s10573_s13, %s12794_s13   ;;  %s10529_s12 = sphi %s10571_s12, %s12793_s12  }
   0x7   : > { %p40_p0 = scmp.ne.s32.totalorder %s10533_s13, %s10529_s12  ;;  %p12430_p1 = scmp.eq.s32.totalorder %s10592_s16, 0 }
   0x8   : > { %p112_p3 = scmp.eq.s32.totalorder %s6840_s17, 1  ;;  %p6841_p5 = scmp.ge.s32.totalorder %s10541_s15, 1 }
   0x9   : > { %p10601_p4 = por %p12430_p1, %p40_p0  ;;  %p119_p7 = scmp.lt.s32.totalorder %s10541_s15, 3 }
   0xa   : > { %p10606_p6 = por %p112_p3, %p40_p0  ;;  %s10543_s21 = smov [#allocation7]  }
   0xb   : > { %s12574_s18 = scalar_select %p10601_p4, 1, 0 }
   0xc   : > { %s12575_s19 = scalar_select %p10606_p6, 1, 0 }
   0xd   : > { %p10611_p8 = pnand %p6841_p5, %p119_p7  ;;  %s131_s22 = sshll.u32 %s10543_s21, 4  ;;  %s10615_s22 = int_to_ptr.vmem [resolvable:$true] %s131_s22 }
   0xe   : > { %s10544_s24 = smov [#allocation9]   ;;  %s10385_s28 = scalar_lea.hbm %s12427_s1, 18432 }
   0xf   : > { %p10264_p9 = pneg %p10611_p8  ;;  %s144_s25 = sshll.u32 %s10544_s24, 4  ;;  %s10626_s25 = int_to_ptr.vmem [resolvable:$true] %s144_s25 }
  0x10   : > { %p10386_p12 = scmp.ne.s32.totalorder %s12427_s1, %s10385_s28  ;;  %p10392_p5 = scmp.lt.u32.totalorder %s10385_s28, %s12427_s1 }
  0x11   : > { %p10622_p11 = pnand %p10264_p9, %p12430_p1 }
  0x13   : > { %p10387_p13 = pneg %p10622_p11 }
  0x15   : > { %p10388_p0 = pnand %p10387_p13, %p10386_p12 }
  0x17   : > { %p10389_p3 = pneg %p10388_p0 }
  0x19   : > { %p10394_p7 = pnand %p10392_p5, %p10389_p3 }
  0x1b   : > { %10397 = shalt.err (!%p10394_p7)
}
  0x1c   : > { %s10398_s6 = scalar_lea.vmem %s10615_s22, 18432  ;;  %p10406_p2 = scmp.lt.s32.totalorder %s10615_s22, %s10615_s22 }
  0x1d   : > { %p10399_p9 = scmp.ne.s32.totalorder %s10615_s22, %s10398_s6  ;;  %p10407_p12 = scmp.lt.s32.totalorder %s10398_s6, %s10398_s6 }
  0x1f   : > { %p10401_p10 = pnand %p10399_p9, %p10387_p13  ;;  %p10408_p0 = por %p10407_p12, %p10406_p2 }
  0x21   : > { %p10402_p1 = pneg %p10401_p10 }
  0x23   : > { %p10409_p6 = pnand %p10408_p0, %p10402_p1 }
  0x25   : > { %10412 = shalt.err (!%p10409_p6)
}
  0x26   : > { %s10545_s7 = smov 128   ;;  %s10546_s8 = smov 8  }
  0x27   : > { %10267 = dma.hbm_to_vmem [thread:$0]  (!%p10622_p11), %s12427_s1, 18432, %s10615_s22, [#allocation8], %s10545_s7, %s10545_s7, %s10546_s8  }
  0x28   : > { %s10413_s21 = scalar_lea.hbm %s12428_s2, 18432 }
  0x29   : > { %p10414_p1 = scmp.ne.s32.totalorder %s12428_s2, %s10413_s21  ;;  %p10420_p10 = scmp.lt.u32.totalorder %s10413_s21, %s12428_s2 }
  0x2b   : > { %p10416_p2 = pnand %p10414_p1, %p10387_p13 }
  0x2d   : > { %p10417_p6 = pneg %p10416_p2 }
  0x2f   : > { %p10422_p3 = pnand %p10420_p10, %p10417_p6 }
  0x31   : > { %10425 = shalt.err (!%p10422_p3)
}
  0x32   : > { %s10426_s22 = scalar_lea.vmem %s10626_s25, 18432  ;;  %p10434_p12 = scmp.lt.s32.totalorder %s10626_s25, %s10626_s25 }
  0x33   : > { %p10427_p5 = scmp.ne.s32.totalorder %s10626_s25, %s10426_s22  ;;  %p10435_p0 = scmp.lt.s32.totalorder %s10426_s22, %s10426_s22 }
  0x35   : > { %p10429_p7 = pnand %p10427_p5, %p10387_p13  ;;  %p10436_p1 = por %p10435_p0, %p10434_p12 }
  0x37   : > { %p10430_p9 = pneg %p10429_p7 }
  0x39   : > { %p10437_p2 = pnand %p10436_p1, %p10430_p9 }
  0x3b   : > { %10440 = shalt.err (!%p10437_p2)
}
  0x3c   : > { %10270 = dma.hbm_to_vmem [thread:$0]  (!%p10622_p11), %s12428_s2, 18432, %s10626_s25, [#allocation8], %s10545_s7, %s10545_s7, %s10546_s8  }
  0x3d   : > { %s10687_s23 = sadd.s32 1, %s10541_s15   ;;  %s27_s4 = sadd.s32 1, %s10537_s14 }
  0x3e   : > { %s24_s5 = ssub.s32 %s10541_s15, %s10687_s23  ;;  %p34_p13 = scmp.ne.s32.totalorder %s10537_s14, %s10533_s13 }
  0x3f   : > { %p25_p6 = scmp.eq.s32.totalorder %s24_s5, 0  ;;  %p35_p10 = scmp.eq.s32.totalorder %s10541_s15, 0 }
  0x40   : > { %p12578_p3 = scmp.eq.s32.totalorder %s10592_s16, 1  ;;  %p10281_p7 = scmp.lt.s32.totalorder %s10541_s15, 2 }
  0x41   : > { %s10703_s9 = scalar_select %p25_p6, %s10537_s14, %s27_s4  }
  0x42   : > { %p10697_p5 = por %p12578_p3, %p34_p13  ;;  %p36_p9 = por %p35_p10, %p34_p13 }
  0x43   : > { %s158_s10 = sand.u32 1, %s10537_s14   ;;  %s6858_s25 = sshll.u32 %s10541_s15, 12 }
  0x44   : > { %s12579_s6 = scalar_select %p10697_p5, 1, 0 }
  0x45   : > { %s6845_s11 = sshll.u32 %s158_s10, 8  ;;  %s10710_s24 = scalar_lea.hbm %s12426_s0, %s6858_s25 }
  0x46   : > { %s162_s26 = scalar_lea.vmem [#allocation4], %s6845_s11  ;;  %p10714_p11 = pnand %p10281_p7, %p36_p9 }
  0x47   : > { %s169_s27 = sshll.u32 %s162_s26, 4  ;;  %s10718_s22 = scalar_lea.sflag [#allocation5], %s158_s10  ;;  %s10712_s27 = int_to_ptr.vmem [resolvable:$true] %s169_s27 }
  0x48   : > { %s10441_s29 = scalar_lea.hbm %s10710_s24, 4096  ;;  %p10443_p0 = pneg %p10714_p11 }
  0x49   : > { %p10442_p12 = scmp.ne.s32.totalorder %s10710_s24, %s10441_s29  ;;  %s10446_s5 = scalar_lea.hbm %s12426_s0, 8192 }
  0x4a   : > { %p10447_p13 = scmp.lt.u32.totalorder %s10710_s24, %s12426_s0  ;;  %p10448_p6 = scmp.lt.u32.totalorder %s10446_s5, %s10441_s29 }
  0x4b   : > { %p10444_p1 = pnand %p10443_p0, %p10442_p12  ;;  %p10450_p3 = scmp.lt.u32.totalorder %s10441_s29, %s10710_s24 }
  0x4c   : > { %p10449_p10 = por %p10448_p6, %p10447_p13 }
  0x4d   : > { %p10445_p2 = pneg %p10444_p1 }
  0x4e   : > { %p10451_p7 = por %p10450_p3, %p10449_p10 }
  0x50   : > { %p10452_p9 = pnand %p10451_p7, %p10445_p2 }
  0x52   : > { %10455 = shalt.err (!%p10452_p9)
}
  0x53   : > { %s10456_s10 = scalar_lea.vmem %s10712_s27, 4096  ;;  %s10547_s17 = smov [#allocation4]  }
  0x54   : > { %p10457_p12 = scmp.ne.s32.totalorder %s10712_s27, %s10456_s10  ;;  %s10461_s21 = sshll.u32 %s10547_s17, 4  ;;  %s10462_s21 = int_to_ptr.vmem [resolvable:$false] %s10461_s21 }
  0x55   : > { %s10463_s26 = scalar_lea.vmem %s10462_s21, 8192  ;;  %p10464_p4 = scmp.lt.s32.totalorder %s10712_s27, %s10462_s21 }
  0x56   : > { %p10459_p1 = pnand %p10457_p12, %p10443_p0  ;;  %p10465_p13 = scmp.lt.s32.totalorder %s10463_s26, %s10456_s10 }
  0x58   : > { %p10460_p5 = pneg %p10459_p1  ;;  %p10466_p6 = por %p10465_p13, %p10464_p4 }
  0x5a   : > { %p10467_p10 = pnand %p10466_p6, %p10460_p5 }
  0x5c   : > { %10470 = shalt.err (!%p10467_p10)
}
  0x5d   : > { %10274 = dma.hbm_to_vmem [thread:$0]  (!%p10714_p11), %s10710_s24, 4096, %s10712_s27, %s10718_s22, %s10545_s7, %s10545_s7, %s10546_s8  }
  0x5e   : > { %181 = sbr.rel (%p10611_p8) target bundleno = 1834 (0x72a), region = 32 }
  0x65   : > { %s10752_s29 = sand.u32 1, %s10533_s13   ;;  %p12581_p4 = scmp.ne.s32.totalorder %s12574_s18, 0 }
  0x66   : > { %s6849_s30 = sshll.u32 %s10752_s29, 8  ;;  %s184_s4 = scalar_lea.sflag [#allocation5], %s10752_s29 }
  0x67   : > { %s10758_s28 = scalar_lea.vmem [#allocation4], %s6849_s30 }
  0x68   : > { %10516 = dma.done.wait (%p12581_p4), %s184_s4, 4096  }
  0x69   : > { %10518 = vsyncadd (%p12581_p4), %s184_s4, 4294963200  ;;  %p12582_p5 = scmp.eq.s32.totalorder %s10592_s16, 0 }
  0x6b   : > { %10520 = dma.done.wait (%p12582_p5), [#allocation8], 36864   ;;  %p12583_p8 = pmov %p12582_p5 }
  0x6c   : > { %v659_v0 = vld [vmem:[#allocation7 + $0x80] sm:$0xff]  ;;  %v660_v1 = vld [vmem:[#allocation7 + $0x88] sm:$0xff]  ;;  %v661_v2 = vld [vmem:[#allocation7 + $0x90] sm:$0xff]  ;;  %s12310_s18 = scalar_lea.vmem [#allocation10], %s6849_s30  ;;  %s6859_s20 = sshll.u32 %s10592_s16, 12 }
  0x6d   : > { %10522 = vsyncadd (%p12583_p8), [#allocation8], 4294930432  ;;  %v9164_v3 = vpack.c.bf16 %v660_v1, %v659_v0  ;;  %v662_v4 = vld [vmem:[#allocation7 + $0x98] sm:$0xff]  ;;  %v663_v6 = vld [vmem:[#allocation7 + $0xa0] sm:$0xff]  ;;  %s6748_s7 = sshll.u32 %s12310_s18, 4  ;;  %s12364_s24 = scalar_lea.hbm %s12429_s3, %s6859_s20  ;;  %s12366_s7 = int_to_ptr.vmem [resolvable:$true] %s6748_s7 }
  0x6e   : > { %v9168_v5 = vpack.c.bf16 %v662_v4, %v661_v2  ;;  %v664_v7 = vld [vmem:[#allocation7 + $0xa8] sm:$0xff]  ;;  %v10769_v9 = vld [vmem:[%s10758_s28 + $0x10] sm:$0xff]  ;;  %v10772_v10 = vld [vmem:[%s10758_s28 + $0x18] sm:$0xff]  ;;  %s6735_s27 = scalar_lea.sflag [#allocation6], %s10752_s29  ;;  %s10471_s22 = scalar_lea.vmem %s12366_s7, 4096 }
  0x6f   : > { %9165 = vmatprep.subr.bf16.mxu0 %v9164_v3  ;;  %v9172_v8 = vpack.c.bf16 %v664_v7, %v663_v6  ;;  %v665_v11 = vld [vmem:[#allocation7 + $0xb0] sm:$0xff]  ;;  %v666_v12 = vld [vmem:[#allocation7 + $0xb8] sm:$0xff]  ;;  %283 = vst [vmem:[#allocation2 + $0x8] sm:$0xff] %v10769_v9  ;;  %7756 = vmatprep.mubr.f32.mxu0 %v10769_v9  ;;  %253 = vst [vmem:[#allocation2 + $0x48] sm:$0xff] %v10769_v9  ;;  %p10472_p11 = scmp.ne.s32.totalorder %s12366_s7, %s10471_s22  ;;  %p12790_p0 = scmp.ne.s32.totalorder %s12579_s6, 0 }
  0x70   : > { %9167 = vmatpush3.bf16.msra.mxu0 %v9164_v3  ;;  %284 = vst [vmem:[#allocation2 + $0x10] sm:$0xff] %v10772_v10  ;;  %254 = vst [vmem:[#allocation2 + $0x50] sm:$0xff] %v10772_v10  ;;  %v10780_v13 = vld [vmem:[%s10758_s28] sm:$0xff]  ;;  %v10784_v14 = vld [vmem:[%s10758_s28 + $0x8] sm:$0xff]  ;;  %v9176_v18 = vpack.c.bf16 %v666_v12, %v665_v11  ;;  %s10548_s5 = smov [#allocation10]  }
  0x71   : > { %9169 = vmatprep.subr.bf16.mxu0 %v9168_v5  ;;  %251 = vst [vmem:[#allocation2 + $0x28] sm:$0xff] %v10780_v13  ;;  %252 = vst [vmem:[#allocation2 + $0x30] sm:$0xff] %v10784_v14  ;;  %v10788_v15 = vld [vmem:[%s10758_s28 + $0x20] sm:$0xff]  ;;  %v10791_v16 = vld [vmem:[%s10758_s28 + $0x28] sm:$0xff]  ;;  %p10473_p2 = pnand %p10472_p11, %p12790_p0  ;;  %s10475_s11 = sshll.u32 %s10548_s5, 4  ;;  %s10476_s11 = int_to_ptr.vmem [resolvable:$false] %s10475_s11 }
  0x72   : > { %v10794_v17 = vld [vmem:[%s10758_s28 + $0x30] sm:$0xff]  ;;  %v667_v19 = vld [vmem:[#allocation7 + $0xc0] sm:$0xff]  ;;  %v668_v20 = vld [vmem:[#allocation7 + $0xc8] sm:$0xff]  ;;  %255 = vst [vmem:[#allocation2 + $0x68] sm:$0xff] %v10788_v15  ;;  %s10477_s25 = scalar_lea.vmem %s10476_s11, 8192  ;;  %p10478_p7 = scmp.lt.s32.totalorder %s12366_s7, %s10476_s11 }
  0x73   : > { %256 = vst [vmem:[#allocation2 + $0x70] sm:$0xff] %v10791_v16  ;;  %257 = vst [vmem:[#allocation2 + $0x88] sm:$0xff] %v10794_v17  ;;  %v10800_v21 = vld [vmem:[%s10758_s28 + $0x38] sm:$0xff]  ;;  %v10804_v22 = vld [vmem:[%s10758_s28 + $0x40] sm:$0xff]  ;;  %v9180_v29 = vpack.c.bf16 %v668_v20, %v667_v19  ;;  %p10474_p3 = pneg %p10473_p2  ;;  %p10479_p9 = scmp.lt.s32.totalorder %s10477_s25, %s10471_s22 }
  0x74   : > { %9171 = vmatpush3.bf16.msra.mxu0 %v9168_v5  ;;  %258 = vst [vmem:[#allocation2 + $0x90] sm:$0xff] %v10800_v21  ;;  %v10807_v23 = vld [vmem:[%s10758_s28 + $0x48] sm:$0xff]  ;;  %v10810_v24 = vld [vmem:[%s10758_s28 + $0x50] sm:$0xff]  ;;  %259 = vst [vmem:[#allocation2 + $0xa8] sm:$0xff] %v10804_v22 }
  0x75   : > { %9173 = vmatprep.subr.bf16.mxu0 %v9172_v8  ;;  %260 = vst [vmem:[#allocation2 + $0xb0] sm:$0xff] %v10807_v23  ;;  %261 = vst [vmem:[#allocation2 + $0xc8] sm:$0xff] %v10810_v24  ;;  %v10816_v25 = vld [vmem:[%s10758_s28 + $0x58] sm:$0xff]  ;;  %v10820_v26 = vld [vmem:[%s10758_s28 + $0x60] sm:$0xff]  ;;  %p10480_p12 = por %p10479_p9, %p10478_p7 }
  0x76   : > { %262 = vst [vmem:[#allocation2 + $0xd0] sm:$0xff] %v10816_v25  ;;  %v10823_v27 = vld [vmem:[%s10758_s28 + $0x68] sm:$0xff]  ;;  %v10826_v28 = vld [vmem:[%s10758_s28 + $0x70] sm:$0xff]  ;;  %v670_v31 = vld [vmem:[#allocation7 + $0xd8] sm:$0xff] }
  0x77   : > { %v669_v30 = vld [vmem:[#allocation7 + $0xd0] sm:$0xff]  ;;  %263 = vst [vmem:[#allocation2 + $0xe8] sm:$0xff] %v10820_v26  ;;  %264 = vst [vmem:[#allocation2 + $0xf0] sm:$0xff] %v10823_v27  ;;  %v10832_v32 = vld [vmem:[%s10758_s28 + $0x78] sm:$0xff]  ;;  %p10481_p1 = pnand %p10480_p12, %p10474_p3 }
  0x78   : > { %9175 = vmatpush3.bf16.msra.mxu0 %v9172_v8  ;;  %265 = vst [vmem:[#allocation2 + $0x108] sm:$0xff] %v10826_v28  ;;  %266 = vst [vmem:[#allocation2 + $0x110] sm:$0xff] %v10832_v32  ;;  %v10836_v33 = vld [vmem:[%s10758_s28 + $0x80] sm:$0xff]  ;;  %v10839_v34 = vld [vmem:[%s10758_s28 + $0x88] sm:$0xff]  ;;  %v9184_v40 = vpack.c.bf16 %v670_v31, %v669_v30 }
  0x79   : > { %9177 = vmatprep.subr.bf16.mxu0 %v9176_v18  ;;  %v10842_v35 = vld [vmem:[%s10758_s28 + $0x90] sm:$0xff]  ;;  %267 = vst [vmem:[#allocation2 + $0x128] sm:$0xff] %v10836_v33  ;;  %268 = vst [vmem:[#allocation2 + $0x130] sm:$0xff] %v10839_v34  ;;  %v10848_v36 = vld [vmem:[%s10758_s28 + $0x98] sm:$0xff] }
  0x7a   : > { %269 = vst [vmem:[#allocation2 + $0x148] sm:$0xff] %v10842_v35  ;;  %270 = vst [vmem:[#allocation2 + $0x150] sm:$0xff] %v10848_v36  ;;  %v10852_v37 = vld [vmem:[%s10758_s28 + $0xa0] sm:$0xff]  ;;  %v10855_v38 = vld [vmem:[%s10758_s28 + $0xa8] sm:$0xff] }
  0x7b   : > { %v10858_v39 = vld [vmem:[%s10758_s28 + $0xb0] sm:$0xff]  ;;  %v671_v41 = vld [vmem:[#allocation7 + $0xe0] sm:$0xff]  ;;  %v672_v42 = vld [vmem:[#allocation7 + $0xe8] sm:$0xff]  ;;  %271 = vst [vmem:[#allocation2 + $0x168] sm:$0xff] %v10852_v37 }
  0x7c   : > { %9179 = vmatpush3.bf16.msra.mxu0 %v9176_v18  ;;  %272 = vst [vmem:[#allocation2 + $0x170] sm:$0xff] %v10855_v38  ;;  %273 = vst [vmem:[#allocation2 + $0x188] sm:$0xff] %v10858_v39  ;;  %v10864_v43 = vld [vmem:[%s10758_s28 + $0xb8] sm:$0xff]  ;;  %v10868_v44 = vld [vmem:[%s10758_s28 + $0xc0] sm:$0xff]  ;;  %v9188_v51 = vpack.c.bf16 %v672_v42, %v671_v41 }
  0x7d   : > { %9181 = vmatprep.subr.bf16.mxu0 %v9180_v29  ;;  %274 = vst [vmem:[#allocation2 + $0x190] sm:$0xff] %v10864_v43  ;;  %v10871_v45 = vld [vmem:[%s10758_s28 + $0xc8] sm:$0xff]  ;;  %v10874_v46 = vld [vmem:[%s10758_s28 + $0xd0] sm:$0xff]  ;;  %275 = vst [vmem:[#allocation2 + $0x1a8] sm:$0xff] %v10868_v44 }
  0x7e   : > { %276 = vst [vmem:[#allocation2 + $0x1b0] sm:$0xff] %v10871_v45  ;;  %277 = vst [vmem:[#allocation2 + $0x1c8] sm:$0xff] %v10874_v46  ;;  %v10880_v47 = vld [vmem:[%s10758_s28 + $0xd8] sm:$0xff]  ;;  %v10884_v48 = vld [vmem:[%s10758_s28 + $0xe0] sm:$0xff] }
  0x7f   : > { %278 = vst [vmem:[#allocation2 + $0x1d0] sm:$0xff] %v10880_v47  ;;  %v10887_v49 = vld [vmem:[%s10758_s28 + $0xe8] sm:$0xff]  ;;  %v673_v52 = vld [vmem:[#allocation7 + $0xf0] sm:$0xff]  ;;  %279 = vst [vmem:[#allocation2 + $0x1e8] sm:$0xff] %v10884_v48 }
  0x80   : > { %9183 = vmatpush3.bf16.msra.mxu0 %v9180_v29  ;;  %v288_v50 = vld [vmem:[#allocation2 + $0x9] sm:$0x1]  ;;  %286 = vst [vmem:[#allocation2 + $0x228] sm:$0xff] %v10884_v48  ;;  %280 = vst [vmem:[#allocation2 + $0x1f0] sm:$0xff] %v10887_v49  ;;  %v674_v53 = vld [vmem:[#allocation7 + $0xf8] sm:$0xff] }
  0x81   : > { %9185 = vmatprep.subr.bf16.mxu0 %v9184_v40  ;;  %287 = vst [vmem:[#allocation2 + $0x230] sm:$0xff] %v10887_v49  ;;  %306 = vst [vmem:[#allocation2 + $0x7] sm:$0x1] %v288_v50  ;;  %v289_v54 = vld [vmem:[#allocation2 + $0x29] sm:$0x1]  ;;  %v9192_v58 = vpack.c.bf16 %v674_v53, %v673_v52  ;;  %v610_v59 = vld [vmem:[#allocation7] sm:$0xff] }
  0x82   : > { %v290_v55 = vld [vmem:[#allocation2 + $0x49] sm:$0x1]  ;;  %307 = vst [vmem:[#allocation2 + $0x27] sm:$0x1] %v289_v54  ;;  %v612_v2 = vld [vmem:[#allocation7 + $0x10] sm:$0xff]  ;;  %v613_v3 = vld [vmem:[#allocation7 + $0x18] sm:$0xff] }
  0x83   : > { %308 = vst [vmem:[#allocation2 + $0x47] sm:$0x1] %v290_v55  ;;  %v291_v56 = vld [vmem:[#allocation2 + $0x69] sm:$0x1]  ;;  %v9200_v6 = vpack.c.bf16 %v613_v3, %v612_v2  ;;  %v614_v8 = vld [vmem:[#allocation7 + $0x20] sm:$0xff]  ;;  %v616_v29 = vld [vmem:[#allocation7 + $0x30] sm:$0xff] }
  0x84   : > { %9187 = vmatpush3.bf16.msra.mxu0 %v9184_v40  ;;  %v292_v57 = vld [vmem:[#allocation2 + $0x89] sm:$0x1]  ;;  %309 = vst [vmem:[#allocation2 + $0x67] sm:$0x1] %v291_v56  ;;  %v617_v30 = vld [vmem:[#allocation7 + $0x38] sm:$0xff]  ;;  %v620_v53 = vld [vmem:[#allocation7 + $0x50] sm:$0xff] }
  0x85   : > { %9189 = vmatprep.subr.bf16.mxu0 %v9188_v51  ;;  %310 = vst [vmem:[#allocation2 + $0x87] sm:$0x1] %v292_v57  ;;  %v611_v60 = vld [vmem:[#allocation7 + $0x8] sm:$0xff]  ;;  %v324_v40 = vld [vmem:[#allocation2 + $0x16] sm:$0x1]  ;;  %v9208_v41 = vpack.c.bf16 %v617_v30, %v616_v29  ;;  %v621_v54 = vld [vmem:[#allocation7 + $0x58] sm:$0xff] }
  0x86   : > { %v293_v61 = vld [vmem:[#allocation2 + $0xa9] sm:$0x1]  ;;  %v9196_v0 = vpack.c.bf16 %v611_v60, %v610_v59  ;;  %342 = vst [vmem:[#allocation2 + $0x18] sm:$0x1] %v324_v40  ;;  %v325_v50 = vld [vmem:[#allocation2 + $0x36] sm:$0x1] }
  0x87   : > { %v294_v62 = vld [vmem:[#allocation2 + $0xc9] sm:$0x1]  ;;  %311 = vst [vmem:[#allocation2 + $0xa7] sm:$0x1] %v293_v61  ;;  %343 = vst [vmem:[#allocation2 + $0x38] sm:$0x1] %v325_v50 }
  0x88   : > { %312 = vst [vmem:[#allocation2 + $0xc7] sm:$0x1] %v294_v62  ;;  %9191 = vmatpush3.bf16.msra.mxu0 %v9188_v51  ;;  %v295_v63 = vld [vmem:[#allocation2 + $0xe9] sm:$0x1]  ;;  %v326_v51 = vld [vmem:[#allocation2 + $0x56] sm:$0x1] }
  0x89   : > { %9193 = vmatprep.subr.bf16.mxu0 %v9192_v58  ;;  %313 = vst [vmem:[#allocation2 + $0xe7] sm:$0x1] %v295_v63  ;;  %v296_v1 = vld [vmem:[#allocation2 + $0x109] sm:$0x1]  ;;  %344 = vst [vmem:[#allocation2 + $0x58] sm:$0x1] %v326_v51 }
  0x8a   : > { %314 = vst [vmem:[#allocation2 + $0x107] sm:$0x1] %v296_v1  ;;  %v297_v4 = vld [vmem:[#allocation2 + $0x129] sm:$0x1]  ;;  %v328_v52 = vld [vmem:[#allocation2 + $0x96] sm:$0x1] }
  0x8b   : > { %v298_v5 = vld [vmem:[#allocation2 + $0x149] sm:$0x1]  ;;  %315 = vst [vmem:[#allocation2 + $0x127] sm:$0x1] %v297_v4  ;;  %346 = vst [vmem:[#allocation2 + $0x98] sm:$0x1] %v328_v52 }
  0x8c   : > { %9195 = vmatpush3.bf16.msra.mxu0 %v9192_v58  ;;  %316 = vst [vmem:[#allocation2 + $0x147] sm:$0x1] %v298_v5  ;;  %v299_v7 = vld [vmem:[#allocation2 + $0x169] sm:$0x1]  ;;  %v329_v55 = vld [vmem:[#allocation2 + $0xb6] sm:$0x1] }
  0x8d   : > { %9197 = vmatprep.subr.bf16.mxu0 %v9196_v0  ;;  %v615_v11 = vld [vmem:[#allocation7 + $0x28] sm:$0xff]  ;;  %317 = vst [vmem:[#allocation2 + $0x167] sm:$0x1] %v299_v7  ;;  %347 = vst [vmem:[#allocation2 + $0xb8] sm:$0x1] %v329_v55  ;;  %v624_v59 = vld [vmem:[#allocation7 + $0x70] sm:$0xff] }
  0x8e   : > { %v300_v12 = vld [vmem:[#allocation2 + $0x189] sm:$0x1]  ;;  %v9204_v19 = vpack.c.bf16 %v615_v11, %v614_v8  ;;  %v330_v57 = vld [vmem:[#allocation2 + $0xd6] sm:$0x1]  ;;  %v625_v60 = vld [vmem:[#allocation7 + $0x78] sm:$0xff] }
  0x8f   : > { %7757 = vmatmul.mubr.f32.vlgmr.msra.gmra.mrb[0].mxu0 %v10772_v10  ;;  %318 = vst [vmem:[#allocation2 + $0x187] sm:$0x1] %v300_v12  ;;  %v301_v18 = vld [vmem:[#allocation2 + $0x1a9] sm:$0x1]  ;;  %348 = vst [vmem:[#allocation2 + $0xd8] sm:$0x1] %v330_v57 }
  0x90   : > { %9199 = vmatpush3.bf16.msra.mxu0 %v9196_v0  ;;  %7759 = vmatprep.mubr.f32.mxu0 %v10780_v13  ;;  %319 = vst [vmem:[#allocation2 + $0x1a7] sm:$0x1] %v301_v18  ;;  %v302_v20 = vld [vmem:[#allocation2 + $0x1c9] sm:$0x1]  ;;  %v618_v13 = vld [vmem:[#allocation7 + $0x40] sm:$0xff]  ;;  %v10933_v0 = vld [vmem:[#allocation2 + $0x4f] sm:$0xff] }
  0x91   : > { %9201 = vmatprep.subr.bf16.mxu0 %v9200_v6  ;;  %320 = vst [vmem:[#allocation2 + $0x1c7] sm:$0x1] %v302_v20  ;;  %v303_v31 = vld [vmem:[#allocation2 + $0x1e9] sm:$0x1]  ;;  %v1158_v61 = vld [vmem:[#allocation7 + $0x100] sm:$0xff]  ;;  %v10939_v5 = vld [vmem:[#allocation2 + $0x6f] sm:$0xff] }
  0x92   : > { %321 = vst [vmem:[#allocation2 + $0x1e7] sm:$0x1] %v303_v31  ;;  %v619_v42 = vld [vmem:[#allocation7 + $0x48] sm:$0xff]  ;;  %v333_v63 = vld [vmem:[#allocation2 + $0x136] sm:$0x1]  ;;  %v1166_v3 = vld [vmem:[#allocation7 + $0x140] sm:$0xff] }
  0x93   : > { %7760 = vmatmul.mubr.f32.gmra.mrb[2].mxu0 %v10784_v14  ;;  %v9212_v14 = vpack.c.bf16 %v619_v42, %v618_v13  ;;  %v623_v56 = vld [vmem:[#allocation7 + $0x68] sm:$0xff]  ;;  %351 = vst [vmem:[#allocation2 + $0x138] sm:$0x1] %v333_v63  ;;  %v1168_v8 = vld [vmem:[#allocation7 + $0x150] sm:$0xff]  ;;  %v1169_v11 = vld [vmem:[#allocation7 + $0x158] sm:$0xff] }
  0x94   : > { %7762 = vmatprep.mubr.f32.mxu0 %v10769_v9  ;;  %9203 = vmatpush3.bf16.msra.mxu0 %v9200_v6  ;;  %v327_v9 = vld [vmem:[#allocation2 + $0x76] sm:$0x1]  ;;  %v1159_v62 = vld [vmem:[#allocation7 + $0x108] sm:$0xff]  ;;  %v1170_v20 = vld [vmem:[#allocation7 + $0x160] sm:$0xff] }
  0x95   : > { %9205 = vmatprep.subr.bf16.mxu0 %v9204_v19  ;;  %345 = vst [vmem:[#allocation2 + $0x78] sm:$0x1] %v327_v9  ;;  %v10935_v1 = vld [vmem:[#allocation2 + $0x67] sm:$0xff]  ;;  %v10945_v12 = vld [vmem:[#allocation2 + $0x8f] sm:$0xff]  ;;  %v1173_v13 = vld [vmem:[#allocation7 + $0x178] sm:$0xff] }
  0x96   : > { %v1167_v4 = vld [vmem:[#allocation7 + $0x148] sm:$0xff]  ;;  %v11008_v63 = vld [vmem:[%s10758_s28 + $0xf8] sm:$0xff] }
  0x97   : > { %7763 = vmatmul.mubr.f32.gmra.mrb[4].mxu0 %v10772_v10  ;;  %v9216_v10 = vpack.c.bf16 %v621_v54, %v620_v53  ;;  %v10941_v6 = vld [vmem:[#allocation2 + $0x87] sm:$0xff]  ;;  %v9244_v7 = vpack.c.bf16 %v1167_v4, %v1166_v3  ;;  %v10951_v30 = vld [vmem:[#allocation2 + $0xaf] sm:$0xff]  ;;  %12585 = vst [vmem:[#allocation15_spill] sm:$0xff] %v11008_v63  ;;  %282 = vst [vmem:[#allocation2 + $0x210] sm:$0xff] %v11008_v63 }
  0x98   : > { %7765 = vmatprep.mubr.f32.mxu0 %v10788_v15  ;;  %9207 = vmatpush3.bf16.msra.mxu0 %v9204_v19  ;;  %v622_v15 = vld [vmem:[#allocation7 + $0x60] sm:$0xff]  ;;  %v9248_v19 = vpack.c.bf16 %v1169_v11, %v1168_v8  ;;  %v1171_v29 = vld [vmem:[#allocation7 + $0x168] sm:$0xff] }
  0x99   : > { %9209 = vmatprep.subr.bf16.mxu0 %v9208_v41  ;;  %v9220_v58 = vpack.c.bf16 %v623_v56, %v622_v15  ;;  %v10947_v18 = vld [vmem:[#allocation2 + $0xa7] sm:$0xff]  ;;  %v9252_v40 = vpack.c.bf16 %v1171_v29, %v1170_v20  ;;  %v10957_v42 = vld [vmem:[#allocation2 + $0xcf] sm:$0xff] }
  0x9a   : > { %v10953_v31 = vld [vmem:[#allocation2 + $0xc7] sm:$0xff]  ;;  %v10963_v52 = vld [vmem:[#allocation2 + $0xef] sm:$0xff] }
  0x9b   : > { %7766 = vmatmul.mubr.f32.gmra.mrb[6].mxu0 %v10791_v16  ;;  %v331_v16 = vld [vmem:[#allocation2 + $0xf6] sm:$0x1]  ;;  %v10959_v50 = vld [vmem:[#allocation2 + $0xe7] sm:$0xff] }
  0x9c   : > { %7768 = vmatprep.mubr.f32.mxu0 %v10794_v17  ;;  %9211 = vmatpush3.bf16.msra.mxu0 %v9208_v41  ;;  %349 = vst [vmem:[#allocation2 + $0xf8] sm:$0x1] %v331_v16  ;;  %v9224_v17 = vpack.c.bf16 %v625_v60, %v624_v59  ;;  %v1172_v41 = vld [vmem:[#allocation7 + $0x170] sm:$0xff]  ;;  %v1466_v9 = vld [vmem:[#allocation7 + $0x188] sm:$0xff] }
  0x9d   : > { %9213 = vmatprep.subr.bf16.mxu0 %v9212_v14  ;;  %v9256_v51 = vpack.c.bf16 %v1173_v13, %v1172_v41  ;;  %v10965_v53 = vld [vmem:[#allocation2 + $0x107] sm:$0xff]  ;;  %v10969_v55 = vld [vmem:[#allocation2 + $0x10f] sm:$0xff] }
  0x9e   : > { %v10975_v15 = vld [vmem:[#allocation2 + $0x12f] sm:$0xff]  ;;  %v10977_v56 = vld [vmem:[#allocation2 + $0x147] sm:$0xff] }
  0x9f   : > { %7769 = vmatmul.mubr.f32.gmra.mrb[8].mxu0 %v10800_v21  ;;  %v332_v21 = vld [vmem:[#allocation2 + $0x116] sm:$0x1]  ;;  %v10989_v60 = vld [vmem:[#allocation2 + $0x187] sm:$0xff] }
  0xa0   : > { %7771 = vmatprep.mubr.f32.mxu0 %v10804_v22  ;;  %9215 = vmatpush3.bf16.msra.mxu0 %v9212_v14  ;;  %350 = vst [vmem:[#allocation2 + $0x118] sm:$0x1] %v332_v21  ;;  %v9228_v22 = vpack.c.bf16 %v1159_v62, %v1158_v61  ;;  %v1465_v14 = vld [vmem:[#allocation7 + $0x180] sm:$0xff]  ;;  %v10981_v57 = vld [vmem:[#allocation2 + $0x14f] sm:$0xff] }
  0xa1   : > { %9217 = vmatprep.subr.bf16.mxu0 %v9216_v10  ;;  %v9260_v54 = vpack.c.bf16 %v1466_v9, %v1465_v14  ;;  %v10987_v59 = vld [vmem:[#allocation2 + $0x16f] sm:$0xff]  ;;  %v10999_v61 = vld [vmem:[#allocation2 + $0x1a7] sm:$0xff] }
  0xa2   : > { %v10992_v16 = vld [vmem:[%s10758_s28 + $0xf0] sm:$0xff]  ;;  %v11005_v21 = vld [vmem:[#allocation2 + $0x1c7] sm:$0xff] }
  0xa3   : > { %7772 = vmatmul.mubr.f32.gmra.mrb[10].mxu0 %v10807_v23  ;;  %v334_v23 = vld [vmem:[#allocation2 + $0x156] sm:$0x1]  ;;  %12584 = vst [vmem:[#allocation14_spill] sm:$0xff] %v10992_v16  ;;  %281 = vst [vmem:[#allocation2 + $0x208] sm:$0xff] %v10992_v16  ;;  %v11033_v3 = vld [vmem:[#allocation2 + $0x69] sm:$0xff] }
  0xa4   : > { %7774 = vmatprep.mubr.f32.mxu0 %v10810_v24  ;;  %9219 = vmatpush3.bf16.msra.mxu0 %v9216_v10  ;;  %352 = vst [vmem:[#allocation2 + $0x158] sm:$0x1] %v334_v23  ;;  %v335_v24 = vld [vmem:[#allocation2 + $0x176] sm:$0x1]  ;;  %v10971_v10 = vld [vmem:[#allocation2 + $0x127] sm:$0xff] }
  0xa5   : > { %9221 = vmatprep.subr.bf16.mxu0 %v9220_v58  ;;  %353 = vst [vmem:[#allocation2 + $0x178] sm:$0x1] %v335_v24  ;;  %v11003_v62 = vld [vmem:[#allocation2 + $0x1af] sm:$0xff]  ;;  %v11015_v24 = vld [vmem:[#allocation2 + $0x1e7] sm:$0xff] }
  0xa6   : > { %v11013_v23 = vld [vmem:[#allocation2 + $0x1cf] sm:$0xff]  ;;  %12586 = vst [vmem:[#allocation16_spill] sm:$0xff] %v11015_v24  ;;  %v1477_v14 = vld [vmem:[#allocation7 + $0x1e0] sm:$0xff] }
  0xa7   : > { %7775 = vmatmul.mubr.f32.gmra.mrb[12].mxu0 %v10816_v25  ;;  %v336_v25 = vld [vmem:[#allocation2 + $0x196] sm:$0x1]  ;;  %v1474_v8 = vld [vmem:[#allocation7 + $0x1c8] sm:$0xff] }
  0xa8   : > { %7777 = vmatprep.mubr.f32.mxu0 %v10820_v26  ;;  %9223 = vmatpush3.bf16.msra.mxu0 %v9220_v58  ;;  %354 = vst [vmem:[#allocation2 + $0x198] sm:$0x1] %v336_v25  ;;  %v337_v26 = vld [vmem:[#allocation2 + $0x1b6] sm:$0x1]  ;;  %v10983_v58 = vld [vmem:[#allocation2 + $0x167] sm:$0xff] }
  0xa9   : > { %9225 = vmatprep.subr.bf16.mxu0 %v9224_v17  ;;  %355 = vst [vmem:[#allocation2 + $0x1b8] sm:$0x1] %v337_v26  ;;  %v11019_v25 = vld [vmem:[#allocation2 + $0x1ef] sm:$0xff] }
  0xaa   : > { %12587 = vst [vmem:[#allocation17_spill] sm:$0xff] %v11019_v25  ;;  %v505_v26 = vld [vmem:[#allocation2 + $0x9] sm:$0xff]  ;;  %v11037_v11 = vld [vmem:[#allocation2 + $0x71] sm:$0xff] }
  0xab   : > { %7778 = vmatmul.mubr.f32.gmra.mrb[14].mxu0 %v10823_v27  ;;  %v338_v27 = vld [vmem:[#allocation2 + $0x1d6] sm:$0x1]  ;;  %v11045_v13 = vld [vmem:[#allocation2 + $0xa9] sm:$0xff] }
  0xac   : > { %7780 = vmatprep.mubr.f32.mxu0 %v10826_v28  ;;  %9227 = vmatpush3.bf16.msra.mxu0 %v9224_v17  ;;  %356 = vst [vmem:[#allocation2 + $0x1d8] sm:$0x1] %v338_v27  ;;  %v339_v28 = vld [vmem:[#allocation2 + $0x1f6] sm:$0x1]  ;;  %v1478_v9 = vld [vmem:[#allocation7 + $0x1e8] sm:$0xff] }
  0xad   : > { %9229 = vmatprep.subr.bf16.mxu0 %v9228_v22  ;;  %357 = vst [vmem:[#allocation2 + $0x1f8] sm:$0x1] %v339_v28  ;;  %v10997_v17 = vld [vmem:[#allocation2 + $0x18f] sm:$0xff]  ;;  %v1468_v28 = vld [vmem:[#allocation7 + $0x198] sm:$0xff] }
  0xae   : > { %v1467_v27 = vld [vmem:[#allocation7 + $0x190] sm:$0xff] }
  0xaf   : > { %7781 = vmatmul.mubr.f32.gmra.mrb[16].mxu0 %v10832_v32  ;;  %v360_v32 = vld [vmem:[#allocation2 + $0x7] sm:$0xff]  ;;  %v1475_v29 = vld [vmem:[#allocation7 + $0x1d0] sm:$0xff] }
  0xb0   : > { %7783 = vmatprep.mubr.f32.mxu0 %v10836_v33  ;;  %v1160_v33 = vld [vmem:[#allocation7 + $0x110] sm:$0xff] }
  0xb1   : > { %v11043_v41 = vld [vmem:[#allocation2 + $0x91] sm:$0xff] }
  0xb3   : > { %7784 = vmatmul.mubr.f32.gmra.mrb[18].mxu0 %v10839_v34  ;;  %v1161_v34 = vld [vmem:[#allocation7 + $0x118] sm:$0xff] }
  0xb4   : > { %7786 = vmatprep.mubr.f32.mxu0 %v10842_v35  ;;  %v361_v35 = vld [vmem:[#allocation2 + $0xf] sm:$0xff] }
  0xb7   : > { %7787 = vmatmul.mubr.f32.gmra.mrb[20].mxu0 %v10848_v36  ;;  %v10924_v36 = vld [vmem:[#allocation2 + $0x27] sm:$0xff] }
  0xb8   : > { %7789 = vmatprep.mubr.f32.mxu0 %v10852_v37  ;;  %v9232_v37 = vpack.c.bf16 %v1161_v34, %v1160_v33  ;;  %v11022_v33 = vld [vmem:[#allocation2 + $0x29] sm:$0xff]  ;;  %v9264_v34 = vpack.c.bf16 %v1468_v28, %v1467_v27  ;;  %v1480_v28 = vld [vmem:[#allocation7 + $0x1f8] sm:$0xff] }
  0xb9   : > { %v1479_v27 = vld [vmem:[#allocation7 + $0x1f0] sm:$0xff] }
  0xbb   : > { %7790 = vmatmul.mubr.f32.gmra.mrb[22].mxu0 %v10855_v38  ;;  %v1162_v38 = vld [vmem:[#allocation7 + $0x120] sm:$0xff] }
  0xbc   : > { %7792 = vmatprep.mubr.f32.mxu0 %v10858_v39  ;;  %v1163_v39 = vld [vmem:[#allocation7 + $0x128] sm:$0xff] }
  0xbf   : > { %7793 = vmatmul.mubr.f32.gmra.mrb[24].mxu0 %v10864_v43  ;;  %v10927_v43 = vld [vmem:[#allocation2 + $0x2f] sm:$0xff] }
  0xc0   : > { %7795 = vmatprep.mubr.f32.mxu0 %v10868_v44  ;;  %v10929_v44 = vld [vmem:[#allocation2 + $0x47] sm:$0xff] }
  0xc3   : > { %7796 = vmatmul.mubr.f32.gmra.mrb[26].mxu0 %v10871_v45  ;;  %v9236_v45 = vpack.c.bf16 %v1163_v39, %v1162_v38  ;;  %v11025_v38 = vld [vmem:[#allocation2 + $0x31] sm:$0xff]  ;;  %v11027_v39 = vld [vmem:[#allocation2 + $0x49] sm:$0xff] }
  0xc4   : > { %7798 = vmatprep.mubr.f32.mxu0 %v10874_v46  ;;  %v1164_v46 = vld [vmem:[#allocation7 + $0x130] sm:$0xff] }
  0xc7   : > { %7799 = vmatmul.mubr.f32.gmra.mrb[28].mxu0 %v10880_v47  ;;  %v1165_v47 = vld [vmem:[#allocation7 + $0x138] sm:$0xff] }
  0xc8   : > { %7801 = vmatprep.mubr.f32.mxu0 %v10884_v48  ;;  %v9240_v2 = vpack.c.bf16 %v1165_v47, %v1164_v46  ;;  %v1471_v46 = vld [vmem:[#allocation7 + $0x1b0] sm:$0xff]  ;;  %v1472_v47 = vld [vmem:[#allocation7 + $0x1b8] sm:$0xff] }
  0xc9   : > { %v9272_v4 = vpack.c.bf16 %v1472_v47, %v1471_v46  ;;  %v11061_v46 = vld [vmem:[#allocation2 + $0xf1] sm:$0xff]  ;;  %v11063_v47 = vld [vmem:[#allocation2 + $0x109] sm:$0xff] }
  0xcb   : > { %7802 = vmatmul.mubr.f32.gmra.mrb[30].mxu0 %v10887_v49 }
  0xcc   : > { %7836 = vmatprep.mubr.f32.mxu0 %v360_v32  ;;  %v506_v32 = vld [vmem:[#allocation2 + $0x11] sm:$0xff] }
  0xcf   : > { %7837 = vmatmul.mubr.f32.vlgmr.msra.gmra.mrb[0].mxu0 %v361_v35  ;;  %v1469_v35 = vld [vmem:[#allocation7 + $0x1a0] sm:$0xff] }
  0xd0   : > { %9231 = vmatpush3.bf16.msra.mxu0 %v9228_v22  ;;  %7839 = vmatprep.mubr.f32.mxu0 %v10924_v36  ;;  %v304_v22 = vld [vmem:[#allocation2 + $0x209] sm:$0x1] }
  0xd1   : > { %9233 = vmatprep.subr.bf16.mxu0 %v9232_v37  ;;  %322 = vst [vmem:[#allocation2 + $0x207] sm:$0x1] %v304_v22  ;;  %v11051_v22 = vld [vmem:[#allocation2 + $0xc9] sm:$0xff] }
  0xd3   : > { %7840 = vmatmul.mubr.f32.gmra.mrb[2].mxu0 %v10927_v43 }
  0xd4   : > { %7842 = vmatprep.mubr.f32.mxu0 %v10929_v44  ;;  %9235 = vmatpush3.bf16.msra.mxu0 %v9232_v37  ;;  %v1470_v37 = vld [vmem:[#allocation7 + $0x1a8] sm:$0xff] }
  0xd5   : > { %9237 = vmatprep.subr.bf16.mxu0 %v9236_v45 }
  0xd7   : > { %7843 = vmatmul.mubr.f32.gmra.mrb[4].mxu0 %v10933_v0 }
  0xd8   : > { %7845 = vmatprep.mubr.f32.mxu0 %v10935_v1  ;;  %9239 = vmatpush3.bf16.msra.mxu0 %v9236_v45  ;;  %v9268_v45 = vpack.c.bf16 %v1470_v37, %v1469_v35  ;;  %v9288_v35 = vpack.c.bf16 %v1480_v28, %v1479_v27  ;;  %v1772_v37 = vld [vmem:[#allocation7 + $0x200] sm:$0xff]  ;;  %v11093_v27 = vld [vmem:[#allocation2 + $0x1a9] sm:$0xff]  ;;  %v11097_v28 = vld [vmem:[#allocation2 + $0x1b1] sm:$0xff] }
  0xd9   : > { %9241 = vmatprep.subr.bf16.mxu0 %v9240_v2  ;;  %12592 = vst [vmem:[#allocation22_spill] sm:$0xff] %v11093_v27  ;;  %12593 = vst [vmem:[#allocation23_spill] sm:$0xff] %v11097_v28 }
  0xdb   : > { %7846 = vmatmul.mubr.f32.gmra.mrb[6].mxu0 %v10939_v5 }
  0xdc   : > { %7848 = vmatprep.mubr.f32.mxu0 %v10941_v6  ;;  %9243 = vmatpush3.bf16.msra.mxu0 %v9240_v2  ;;  %v11031_v2 = vld [vmem:[#allocation2 + $0x51] sm:$0xff] }
  0xdd   : > { %9245 = vmatprep.subr.bf16.mxu0 %v9244_v7 }
  0xdf   : > { %7849 = vmatmul.mubr.f32.gmra.mrb[8].mxu0 %v10945_v12 }
  0xe0   : > { %7851 = vmatprep.mubr.f32.mxu0 %v10947_v18  ;;  %9247 = vmatpush3.bf16.msra.mxu0 %v9244_v7  ;;  %v1473_v7 = vld [vmem:[#allocation7 + $0x1c0] sm:$0xff] }
  0xe1   : > { %9249 = vmatprep.subr.bf16.mxu0 %v9248_v19  ;;  %v9276_v20 = vpack.c.bf16 %v1474_v8, %v1473_v7  ;;  %v11067_v7 = vld [vmem:[#allocation2 + $0x111] sm:$0xff]  ;;  %v11069_v8 = vld [vmem:[#allocation2 + $0x129] sm:$0xff] }
  0xe3   : > { %7852 = vmatmul.mubr.f32.gmra.mrb[10].mxu0 %v10951_v30 }
  0xe4   : > { %7854 = vmatprep.mubr.f32.mxu0 %v10953_v31  ;;  %9251 = vmatpush3.bf16.msra.mxu0 %v9248_v19  ;;  %v11039_v19 = vld [vmem:[#allocation2 + $0x89] sm:$0xff] }
  0xe5   : > { %9253 = vmatprep.subr.bf16.mxu0 %v9252_v40 }
  0xe7   : > { %7855 = vmatmul.mubr.f32.gmra.mrb[12].mxu0 %v10957_v42 }
  0xe8   : > { %7857 = vmatprep.mubr.f32.mxu0 %v10959_v50  ;;  %9255 = vmatpush3.bf16.msra.mxu0 %v9252_v40  ;;  %v1476_v40 = vld [vmem:[#allocation7 + $0x1d8] sm:$0xff] }
  0xe9   : > { %9257 = vmatprep.subr.bf16.mxu0 %v9256_v51 }
  0xeb   : > { %7858 = vmatmul.mubr.f32.gmra.mrb[14].mxu0 %v10963_v52 }
  0xec   : > { %7860 = vmatprep.mubr.f32.mxu0 %v10965_v53  ;;  %9259 = vmatpush3.bf16.msra.mxu0 %v9256_v51  ;;  %v9280_v51 = vpack.c.bf16 %v1476_v40, %v1475_v29  ;;  %v11075_v29 = vld [vmem:[#allocation2 + $0x149] sm:$0xff]  ;;  %v11079_v40 = vld [vmem:[#allocation2 + $0x151] sm:$0xff] }
  0xed   : > { %9261 = vmatprep.subr.bf16.mxu0 %v9260_v54 }
  0xef   : > { %7861 = vmatmul.mubr.f32.gmra.mrb[16].mxu0 %v10969_v55 }
  0xf0   : > { %7863 = vmatprep.mubr.f32.mxu0 %v10971_v10 }
  0xf3   : > { %7864 = vmatmul.mubr.f32.gmra.mrb[18].mxu0 %v10975_v15 }
  0xf4   : > { %7866 = vmatprep.mubr.f32.mxu0 %v10977_v56 }
  0xf7   : > { %7867 = vmatmul.mubr.f32.gmra.mrb[20].mxu0 %v10981_v57 }
  0xf8   : > { %7869 = vmatprep.mubr.f32.mxu0 %v10983_v58 }
  0xfb   : > { %7870 = vmatmul.mubr.f32.gmra.mrb[22].mxu0 %v10987_v59 }
  0xfc   : > { %7872 = vmatprep.mubr.f32.mxu0 %v10989_v60 }
  0xff   : > { %7873 = vmatmul.mubr.f32.gmra.mrb[24].mxu0 %v10997_v17 }
 0x100   : > { %7875 = vmatprep.mubr.f32.mxu0 %v10999_v61 }
 0x103   : > { %7876 = vmatmul.mubr.f32.gmra.mrb[26].mxu0 %v11003_v62 }
 0x104   : > { %7878 = vmatprep.mubr.f32.mxu0 %v11005_v21 }
 0x107   : > { %7879 = vmatmul.mubr.f32.gmra.mrb[28].mxu0 %v11013_v23 }
 0x108   : > { %7881 = vmatprep.mubr.f32.mxu0 %v11015_v24 }
 0x10b   : > { %7882 = vmatmul.mubr.f32.gmra.mrb[30].mxu0 %v11019_v25 }
 0x10c   : > { %7916 = vmatprep.mubr.f32.mxu0 %v505_v26  ;;  %v9284_v26 = vpack.c.bf16 %v1478_v9, %v1477_v14  ;;  %v11085_v14 = vld [vmem:[#allocation2 + $0x171] sm:$0xff]  ;;  %v11087_v9 = vld [vmem:[#allocation2 + $0x189] sm:$0xff] }
 0x10d   : > { %12589 = vst [vmem:[#allocation19_spill] sm:$0xff] %v11085_v14  ;;  %12590 = vst [vmem:[#allocation20_spill] sm:$0xff] %v11087_v9 }
 0x10f   : > { %7917 = vmatmul.mubr.f32.vlgmr.msra.gmra.mrb[0].mxu0 %v506_v32  ;;  %v11055_v32 = vld [vmem:[#allocation2 + $0xd1] sm:$0xff] }
 0x110   : > { %9263 = vmatpush3.bf16.msra.mxu0 %v9260_v54  ;;  %7919 = vmatprep.mubr.f32.mxu0 %v11022_v33  ;;  %v11049_v54 = vld [vmem:[#allocation2 + $0xb1] sm:$0xff] }
 0x111   : > { %9265 = vmatprep.subr.bf16.mxu0 %v9264_v34 }
 0x113   : > { %7920 = vmatmul.mubr.f32.gmra.mrb[2].mxu0 %v11025_v38 }
 0x114   : > { %7922 = vmatprep.mubr.f32.mxu0 %v11027_v39  ;;  %9267 = vmatpush3.bf16.msra.mxu0 %v9264_v34  ;;  %v11057_v34 = vld [vmem:[#allocation2 + $0xe9] sm:$0xff] }
 0x115   : > { %9269 = vmatprep.subr.bf16.mxu0 %v9268_v45 }
 0x117   : > { %7923 = vmatmul.mubr.f32.gmra.mrb[4].mxu0 %v11031_v2 }
 0x118   : > { %7925 = vmatprep.mubr.f32.mxu0 %v11033_v3  ;;  %9271 = vmatpush3.bf16.msra.mxu0 %v9268_v45  ;;  %v1773_v45 = vld [vmem:[#allocation7 + $0x208] sm:$0xff] }
 0x119   : > { %9273 = vmatprep.subr.bf16.mxu0 %v9272_v4 }
 0x11b   : > { %7926 = vmatmul.mubr.f32.gmra.mrb[6].mxu0 %v11037_v11 }
 0x11c   : > { %7928 = vmatprep.mubr.f32.mxu0 %v11039_v19  ;;  %9275 = vmatpush3.bf16.msra.mxu0 %v9272_v4  ;;  %v9292_v4 = vpack.c.bf16 %v1773_v45, %v1772_v37  ;;  %v11103_v37 = vld [vmem:[#allocation2 + $0x1d1] sm:$0xff]  ;;  %v11105_v45 = vld [vmem:[#allocation2 + $0x1e9] sm:$0xff] }
 0x11d   : > { %9277 = vmatprep.subr.bf16.mxu0 %v9276_v20  ;;  %12595 = vst [vmem:[#allocation25_spill] sm:$0xff] %v11103_v37  ;;  %12596 = vst [vmem:[#allocation26_spill] sm:$0xff] %v11105_v45 }
 0x11f   : > { %7929 = vmatmul.mubr.f32.gmra.mrb[8].mxu0 %v11043_v41 }
 0x120   : > { %7931 = vmatprep.mubr.f32.mxu0 %v11045_v13  ;;  %9279 = vmatpush3.bf16.msra.mxu0 %v9276_v20  ;;  %v11073_v20 = vld [vmem:[#allocation2 + $0x131] sm:$0xff] }
 0x121   : > { %9281 = vmatprep.subr.bf16.mxu0 %v9280_v51 }
 0x123   : > { %7932 = vmatmul.mubr.f32.gmra.mrb[10].mxu0 %v11049_v54 }
 0x124   : > { %7934 = vmatprep.mubr.f32.mxu0 %v11051_v22  ;;  %9283 = vmatpush3.bf16.msra.mxu0 %v9280_v51  ;;  %v11081_v51 = vld [vmem:[#allocation2 + $0x169] sm:$0xff] }
 0x125   : > { %9285 = vmatprep.subr.bf16.mxu0 %v9284_v26  ;;  %12588 = vst [vmem:[#allocation18_spill] sm:$0xff] %v11081_v51 }
 0x127   : > { %7935 = vmatmul.mubr.f32.gmra.mrb[12].mxu0 %v11055_v32 }
 0x128   : > { %7937 = vmatprep.mubr.f32.mxu0 %v11057_v34  ;;  %9287 = vmatpush3.bf16.msra.mxu0 %v9284_v26  ;;  %v11091_v26 = vld [vmem:[#allocation2 + $0x191] sm:$0xff] }
 0x129   : > { %9289 = vmatprep.subr.bf16.mxu0 %v9288_v35  ;;  %12591 = vst [vmem:[#allocation21_spill] sm:$0xff] %v11091_v26 }
 0x12b   : > { %7938 = vmatmul.mubr.f32.gmra.mrb[14].mxu0 %v11061_v46 }
 0x12c   : > { %7940 = vmatprep.mubr.f32.mxu0 %v11063_v47  ;;  %9291 = vmatpush3.bf16.msra.mxu0 %v9288_v35  ;;  %v11099_v35 = vld [vmem:[#allocation2 + $0x1c9] sm:$0xff] }
 0x12d   : > { %9293 = vmatprep.subr.bf16.mxu0 %v9292_v4  ;;  %12594 = vst [vmem:[#allocation24_spill] sm:$0xff] %v11099_v35 }
 0x12f   : > { %7941 = vmatmul.mubr.f32.gmra.mrb[16].mxu0 %v11067_v7 }
 0x130   : > { %7943 = vmatprep.mubr.f32.mxu0 %v11069_v8 }
 0x133   : > { %7944 = vmatmul.mubr.f32.gmra.mrb[18].mxu0 %v11073_v20 }
 0x134   : > { %7946 = vmatprep.mubr.f32.mxu0 %v11075_v29 }
 0x137   : > { %7947 = vmatmul.mubr.f32.gmra.mrb[20].mxu0 %v11079_v40 }
 0x138   : > { %7949 = vmatprep.mubr.f32.mxu0 %v11081_v51  ;;  %v1777_v51 = vld [vmem:[#allocation7 + $0x228] sm:$0xff] }
 0x13b   : > { %7950 = vmatmul.mubr.f32.gmra.mrb[22].mxu0 %v11085_v14 }
 0x13c   : > { %7952 = vmatprep.mubr.f32.mxu0 %v11087_v9  ;;  %v11109_v9 = vld [vmem:[#allocation2 + $0x1f1] sm:$0xff] }
 0x13d   : > { %12597 = vst [vmem:[#allocation27_spill] sm:$0xff] %v11109_v9 }
 0x13f   : > { %7953 = vmatmul.mubr.f32.gmra.mrb[24].mxu0 %v11091_v26  ;;  %v1774_v26 = vld [vmem:[#allocation7 + $0x210] sm:$0xff] }
 0x140   : > { %7955 = vmatprep.mubr.f32.mxu0 %v11093_v27  ;;  %v1775_v27 = vld [vmem:[#allocation7 + $0x218] sm:$0xff] }
 0x141   : > { %v9296_v14 = vpack.c.bf16 %v1775_v27, %v1774_v26  ;;  %v1781_v26 = vld [vmem:[#allocation7 + $0x248] sm:$0xff]  ;;  %v1784_v27 = vld [vmem:[#allocation7 + $0x260] sm:$0xff] }
 0x143   : > { %7956 = vmatmul.mubr.f32.gmra.mrb[26].mxu0 %v11097_v28  ;;  %v1776_v28 = vld [vmem:[#allocation7 + $0x220] sm:$0xff] }
 0x144   : > { %7958 = vmatprep.mubr.f32.mxu0 %v11099_v35  ;;  %v1778_v35 = vld [vmem:[#allocation7 + $0x230] sm:$0xff] }
 0x147   : > { %7959 = vmatmul.mubr.f32.gmra.mrb[28].mxu0 %v11103_v37  ;;  %v9300_v37 = vpack.c.bf16 %v1777_v51, %v1776_v28  ;;  %v1783_v51 = vld [vmem:[#allocation7 + $0x258] sm:$0xff]  ;;  %v1785_v28 = vld [vmem:[#allocation7 + $0x268] sm:$0xff] }
 0x148   : > { %7961 = vmatprep.mubr.f32.mxu0 %v11105_v45  ;;  %v1779_v45 = vld [vmem:[#allocation7 + $0x238] sm:$0xff] }
 0x14b   : > { %7962 = vmatmul.mubr.f32.gmra.mrb[30].mxu0 %v11109_v9  ;;  %v9304_v9 = vpack.c.bf16 %v1779_v45, %v1778_v35  ;;  %v9316_v35 = vpack.c.bf16 %v1785_v28, %v1784_v27  ;;  %v1787_v45 = vld [vmem:[#allocation7 + $0x278] sm:$0xff]  ;;  %v2081_v27 = vld [vmem:[#allocation7 + $0x290] sm:$0xff] }
 0x14c   : > { %7996 = vmatprep.mubr.f32.mxu0 %v10924_v36  ;;  %v1780_v36 = vld [vmem:[#allocation7 + $0x240] sm:$0xff]  ;;  %v2082_v28 = vld [vmem:[#allocation7 + $0x298] sm:$0xff] }
 0x14f   : > { %7997 = vmatmul.mubr.f32.vlgmr.msra.gmra.mrb[0].mxu0 %v10927_v43  ;;  %v9308_v43 = vpack.c.bf16 %v1781_v26, %v1780_v36  ;;  %v2079_v36 = vld [vmem:[#allocation7 + $0x280] sm:$0xff]  ;;  %v2080_v26 = vld [vmem:[#allocation7 + $0x288] sm:$0xff] }
 0x150   : > { %9295 = vmatpush3.bf16.msra.mxu0 %v9292_v4  ;;  %7999 = vmatprep.mubr.f32.mxu0 %v10929_v44  ;;  %v1782_v4 = vld [vmem:[#allocation7 + $0x250] sm:$0xff] }
 0x151   : > { %9297 = vmatprep.subr.bf16.mxu0 %v9296_v14 }
 0x153   : > { %8000 = vmatmul.mubr.f32.gmra.mrb[2].mxu0 %v10933_v0 }
 0x154   : > { %8002 = vmatprep.mubr.f32.mxu0 %v10935_v1  ;;  %9299 = vmatpush3.bf16.msra.mxu0 %v9296_v14  ;;  %v9312_v14 = vpack.c.bf16 %v1783_v51, %v1782_v4  ;;  %v340_v4 = vld [vmem:[#allocation2 + $0x216] sm:$0x1]  ;;  %v11141_v51 = vld [vmem:[#allocation2 + $0x207] sm:$0xff] }
 0x155   : > { %9301 = vmatprep.subr.bf16.mxu0 %v9300_v37  ;;  %358 = vst [vmem:[#allocation2 + $0x218] sm:$0x1] %v340_v4  ;;  %12598 = vst [vmem:[#allocation28_spill] sm:$0xff] %v11141_v51 }
 0x157   : > { %8003 = vmatmul.mubr.f32.gmra.mrb[4].mxu0 %v10939_v5 }
 0x158   : > { %8005 = vmatprep.mubr.f32.mxu0 %v10941_v6  ;;  %9303 = vmatpush3.bf16.msra.mxu0 %v9300_v37  ;;  %v1786_v37 = vld [vmem:[#allocation7 + $0x270] sm:$0xff] }
 0x159   : > { %9305 = vmatprep.subr.bf16.mxu0 %v9304_v9 }
 0x15b   : > { %8006 = vmatmul.mubr.f32.gmra.mrb[6].mxu0 %v10945_v12 }
 0x15c   : > { %8008 = vmatprep.mubr.f32.mxu0 %v10947_v18  ;;  %9307 = vmatpush3.bf16.msra.mxu0 %v9304_v9  ;;  %v9320_v9 = vpack.c.bf16 %v1787_v45, %v1786_v37  ;;  %v9328_v37 = vpack.c.bf16 %v2082_v28, %v2081_v27  ;;  %v2083_v45 = vld [vmem:[#allocation7 + $0x2a0] sm:$0xff]  ;;  %v11160_v27 = vld [vmem:[#allocation2 + $0x68] sm:$0xff] }
 0x15d   : > { %9309 = vmatprep.subr.bf16.mxu0 %v9308_v43  ;;  %12604 = vst [vmem:[#allocation34_spill] sm:$0xff] %v11160_v27 }
 0x15f   : > { %8009 = vmatmul.mubr.f32.gmra.mrb[8].mxu0 %v10951_v30 }
 0x160   : > { %8011 = vmatprep.mubr.f32.mxu0 %v10953_v31  ;;  %9311 = vmatpush3.bf16.msra.mxu0 %v9308_v43  ;;  %v9324_v43 = vpack.c.bf16 %v2080_v26, %v2079_v36  ;;  %v11151_v36 = vld [vmem:[#allocation2 + $0x30] sm:$0xff]  ;;  %v11154_v26 = vld [vmem:[#allocation2 + $0x8] sm:$0xff] }
 0x161   : > { %9313 = vmatprep.subr.bf16.mxu0 %v9312_v14  ;;  %12601 = vst [vmem:[#allocation31_spill] sm:$0xff] %v11151_v36  ;;  %12602 = vst [vmem:[#allocation32_spill] sm:$0xff] %v11154_v26 }
 0x163   : > { %8012 = vmatmul.mubr.f32.gmra.mrb[10].mxu0 %v10957_v42 }
 0x164   : > { %8014 = vmatprep.mubr.f32.mxu0 %v10959_v50  ;;  %9315 = vmatpush3.bf16.msra.mxu0 %v9312_v14  ;;  %v11145_v14 = vld [vmem:[#allocation2 + $0x20f] sm:$0xff] }
 0x165   : > { %9317 = vmatprep.subr.bf16.mxu0 %v9316_v35  ;;  %12599 = vst [vmem:[#allocation29_spill] sm:$0xff] %v11145_v14 }
 0x167   : > { %8015 = vmatmul.mubr.f32.gmra.mrb[12].mxu0 %v10963_v52 }
 0x168   : > { %8017 = vmatprep.mubr.f32.mxu0 %v10965_v53  ;;  %9319 = vmatpush3.bf16.msra.mxu0 %v9316_v35  ;;  %v11148_v35 = vld [vmem:[#allocation2 + $0x28] sm:$0xff] }
 0x169   : > { %9321 = vmatprep.subr.bf16.mxu0 %v9320_v9  ;;  %12600 = vst [vmem:[#allocation30_spill] sm:$0xff] %v11148_v35 }
 0x16b   : > { %8018 = vmatmul.mubr.f32.gmra.mrb[14].mxu0 %v10969_v55 }
 0x16c   : > { %8020 = vmatprep.mubr.f32.mxu0 %v10971_v10  ;;  %9323 = vmatpush3.bf16.msra.mxu0 %v9320_v9  ;;  %v2084_v9 = vld [vmem:[#allocation7 + $0x2a8] sm:$0xff] }
 0x16d   : > { %9325 = vmatprep.subr.bf16.mxu0 %v9324_v43  ;;  %v9332_v4 = vpack.c.bf16 %v2084_v9, %v2083_v45  ;;  %v11166_v45 = vld [vmem:[#allocation2 + $0x88] sm:$0xff] }
 0x16e   : > { %12606 = vst [vmem:[#allocation36_spill] sm:$0xff] %v11166_v45 }
 0x16f   : > { %8021 = vmatmul.mubr.f32.gmra.mrb[16].mxu0 %v10975_v15 }
 0x170   : > { %8023 = vmatprep.mubr.f32.mxu0 %v10977_v56 }
 0x173   : > { %8024 = vmatmul.mubr.f32.gmra.mrb[18].mxu0 %v10981_v57 }
 0x174   : > { %8026 = vmatprep.mubr.f32.mxu0 %v10983_v58 }
 0x177   : > { %8027 = vmatmul.mubr.f32.gmra.mrb[20].mxu0 %v10987_v59 }
 0x178   : > { %8029 = vmatprep.mubr.f32.mxu0 %v10989_v60 }
 0x17b   : > { %8030 = vmatmul.mubr.f32.gmra.mrb[22].mxu0 %v10997_v17 }
 0x17c   : > { %8032 = vmatprep.mubr.f32.mxu0 %v10999_v61 }
 0x17f   : > { %8033 = vmatmul.mubr.f32.gmra.mrb[24].mxu0 %v11003_v62 }
 0x180   : > { %8035 = vmatprep.mubr.f32.mxu0 %v11005_v21 }
 0x183   : > { %8036 = vmatmul.mubr.f32.gmra.mrb[26].mxu0 %v11013_v23 }
 0x184   : > { %8038 = vmatprep.mubr.f32.mxu0 %v11015_v24  ;;  %v11169_v24 = vld [vmem:[#allocation2 + $0x90] sm:$0xff] }
 0x185   : > { %12607 = vst [vmem:[#allocation37_spill] sm:$0xff] %v11169_v24 }
 0x187   : > { %8039 = vmatmul.mubr.f32.gmra.mrb[28].mxu0 %v11019_v25  ;;  %v11157_v25 = vld [vmem:[#allocation2 + $0x10] sm:$0xff] }
 0x188   : > { %8041 = vmatprep.mubr.f32.mxu0 %v11141_v51  ;;  %v2085_v51 = vld [vmem:[#allocation7 + $0x2b0] sm:$0xff]  ;;  %12603 = vst [vmem:[#allocation33_spill] sm:$0xff] %v11157_v25 }
 0x18b   : > { %8042 = vmatmul.mubr.f32.gmra.mrb[30].mxu0 %v11145_v14  ;;  %v2086_v14 = vld [vmem:[#allocation7 + $0x2b8] sm:$0xff] }
 0x18c   : > { %8076 = vmatprep.mubr.f32.mxu0 %v11148_v35  ;;  %v9336_v28 = vpack.c.bf16 %v2086_v14, %v2085_v51  ;;  %v11163_v35 = vld [vmem:[#allocation2 + $0x70] sm:$0xff]  ;;  %v11172_v51 = vld [vmem:[#allocation2 + $0xa8] sm:$0xff] }
 0x18d   : > { %12605 = vst [vmem:[#allocation35_spill] sm:$0xff] %v11163_v35  ;;  %12608 = vst [vmem:[#allocation38_spill] sm:$0xff] %v11172_v51 }
 0x18f   : > { %8077 = vmatmul.mubr.f32.vlgmr.msra.gmra.mrb[0].mxu0 %v11151_v36  ;;  %v2088_v36 = vld [vmem:[#allocation7 + $0x2c8] sm:$0xff] }
 0x190   : > { %9327 = vmatpush3.bf16.msra.mxu0 %v9324_v43  ;;  %8079 = vmatprep.mubr.f32.mxu0 %v11154_v26  ;;  %v2087_v43 = vld [vmem:[#allocation7 + $0x2c0] sm:$0xff]  ;;  %v2090_v26 = vld [vmem:[#allocation7 + $0x2d8] sm:$0xff] }
 0x191   : > { %9329 = vmatprep.subr.bf16.mxu0 %v9328_v37  ;;  %v9340_v9 = vpack.c.bf16 %v2088_v36, %v2087_v43  ;;  %v11178_v36 = vld [vmem:[#allocation2 + $0xc8] sm:$0xff]  ;;  %v2093_v43 = vld [vmem:[#allocation7 + $0x2f0] sm:$0xff] }
 0x192   : > { %12610 = vst [vmem:[#allocation40_spill] sm:$0xff] %v11178_v36 }
 0x193   : > { %8080 = vmatmul.mubr.f32.gmra.mrb[2].mxu0 %v11157_v25  ;;  %v2089_v25 = vld [vmem:[#allocation7 + $0x2d0] sm:$0xff] }
 0x194   : > { %8082 = vmatprep.mubr.f32.mxu0 %v11160_v27  ;;  %9331 = vmatpush3.bf16.msra.mxu0 %v9328_v37  ;;  %v9344_v14 = vpack.c.bf16 %v2090_v26, %v2089_v25  ;;  %v2091_v37 = vld [vmem:[#allocation7 + $0x2e0] sm:$0xff]  ;;  %v11175_v27 = vld [vmem:[#allocation2 + $0xb0] sm:$0xff]  ;;  %v11184_v25 = vld [vmem:[#allocation2 + $0xe8] sm:$0xff] }
 0x195   : > { %9333 = vmatprep.subr.bf16.mxu0 %v9332_v4  ;;  %12609 = vst [vmem:[#allocation39_spill] sm:$0xff] %v11175_v27  ;;  %12612 = vst [vmem:[#allocation42_spill] sm:$0xff] %v11184_v25 }
 0x197   : > { %8083 = vmatmul.mubr.f32.gmra.mrb[4].mxu0 %v11163_v35  ;;  %v2092_v35 = vld [vmem:[#allocation7 + $0x2e8] sm:$0xff] }
 0x198   : > { %8085 = vmatprep.mubr.f32.mxu0 %v11166_v45  ;;  %9335 = vmatpush3.bf16.msra.mxu0 %v9332_v4  ;;  %v9348_v4 = vpack.c.bf16 %v2092_v35, %v2091_v37  ;;  %v11181_v45 = vld [vmem:[#allocation2 + $0xd0] sm:$0xff]  ;;  %v11190_v35 = vld [vmem:[#allocation2 + $0x108] sm:$0xff] }
 0x199   : > { %9337 = vmatprep.subr.bf16.mxu0 %v9336_v28  ;;  %12611 = vst [vmem:[#allocation41_spill] sm:$0xff] %v11181_v45  ;;  %12614 = vst [vmem:[#allocation44_spill] sm:$0xff] %v11190_v35  ;;  %v11193_v37 = vld [vmem:[#allocation2 + $0x110] sm:$0xff] }
 0x19a   : > { %12615 = vst [vmem:[#allocation45_spill] sm:$0xff] %v11193_v37 }
 0x19b   : > { %8086 = vmatmul.mubr.f32.gmra.mrb[6].mxu0 %v11169_v24  ;;  %v2094_v24 = vld [vmem:[#allocation7 + $0x2f8] sm:$0xff] }
 0x19c   : > { %8088 = vmatprep.mubr.f32.mxu0 %v11172_v51  ;;  %9339 = vmatpush3.bf16.msra.mxu0 %v9336_v28  ;;  %v9352_v26 = vpack.c.bf16 %v2094_v24, %v2093_v43  ;;  %v2386_v28 = vld [vmem:[#allocation7 + $0x300] sm:$0xff]  ;;  %v11187_v51 = vld [vmem:[#allocation2 + $0xf0] sm:$0xff]  ;;  %v11202_v43 = vld [vmem:[#allocation2 + $0x148] sm:$0xff] }
 0x19d   : > { %9341 = vmatprep.subr.bf16.mxu0 %v9340_v9  ;;  %12613 = vst [vmem:[#allocation43_spill] sm:$0xff] %v11187_v51  ;;  %v11199_v24 = vld [vmem:[#allocation2 + $0x130] sm:$0xff]  ;;  %12618 = vst [vmem:[#allocation48_spill] sm:$0xff] %v11202_v43 }
 0x19e   : > { %12617 = vst [vmem:[#allocation47_spill] sm:$0xff] %v11199_v24 }
 0x19f   : > { %8089 = vmatmul.mubr.f32.gmra.mrb[8].mxu0 %v11175_v27  ;;  %v2387_v27 = vld [vmem:[#allocation7 + $0x308] sm:$0xff] }
 0x1a0   : > { %8091 = vmatprep.mubr.f32.mxu0 %v11178_v36  ;;  %9343 = vmatpush3.bf16.msra.mxu0 %v9340_v9  ;;  %v9356_v9 = vpack.c.bf16 %v2387_v27, %v2386_v28  ;;  %v11208_v27 = vld [vmem:[#allocation2 + $0x168] sm:$0xff]  ;;  %v11211_v28 = vld [vmem:[#allocation2 + $0x170] sm:$0xff] }
 0x1a1   : > { %9345 = vmatprep.subr.bf16.mxu0 %v9344_v14  ;;  %12620 = vst [vmem:[#allocation50_spill] sm:$0xff] %v11208_v27  ;;  %12621 = vst [vmem:[#allocation51_spill] sm:$0xff] %v11211_v28 }
 0x1a3   : > { %8092 = vmatmul.mubr.f32.gmra.mrb[10].mxu0 %v11181_v45 }
 0x1a4   : > { %8094 = vmatprep.mubr.f32.mxu0 %v11184_v25  ;;  %9347 = vmatpush3.bf16.msra.mxu0 %v9344_v14  ;;  %v11196_v14 = vld [vmem:[#allocation2 + $0x128] sm:$0xff] }
 0x1a5   : > { %9349 = vmatprep.subr.bf16.mxu0 %v9348_v4  ;;  %12616 = vst [vmem:[#allocation46_spill] sm:$0xff] %v11196_v14 }
 0x1a7   : > { %8095 = vmatmul.mubr.f32.gmra.mrb[12].mxu0 %v11187_v51 }
 0x1a8   : > { %8097 = vmatprep.mubr.f32.mxu0 %v11190_v35  ;;  %9351 = vmatpush3.bf16.msra.mxu0 %v9348_v4  ;;  %v11205_v4 = vld [vmem:[#allocation2 + $0x150] sm:$0xff] }
 0x1a9   : > { %9353 = vmatprep.subr.bf16.mxu0 %v9352_v26  ;;  %12619 = vst [vmem:[#allocation49_spill] sm:$0xff] %v11205_v4 }
 0x1ab   : > { %8098 = vmatmul.mubr.f32.gmra.mrb[14].mxu0 %v11193_v37 }
 0x1ac   : > { %8100 = vmatprep.mubr.f32.mxu0 %v11196_v14  ;;  %9355 = vmatpush3.bf16.msra.mxu0 %v9352_v26  ;;  %v11214_v26 = vld [vmem:[#allocation2 + $0x188] sm:$0xff]  ;;  %v11229_v14 = vld [vmem:[#allocation2 + $0x1d0] sm:$0xff] }
 0x1ad   : > { %9357 = vmatprep.subr.bf16.mxu0 %v9356_v9  ;;  %12622 = vst [vmem:[#allocation52_spill] sm:$0xff] %v11214_v26  ;;  %12627 = vst [vmem:[#allocation57_spill] sm:$0xff] %v11229_v14 }
 0x1af   : > { %8101 = vmatmul.mubr.f32.gmra.mrb[16].mxu0 %v11199_v24  ;;  %v11217_v24 = vld [vmem:[#allocation2 + $0x190] sm:$0xff] }
 0x1b0   : > { %8103 = vmatprep.mubr.f32.mxu0 %v11202_v43  ;;  %12623 = vst [vmem:[#allocation53_spill] sm:$0xff] %v11217_v24  ;;  %v11220_v43 = vld [vmem:[#allocation2 + $0x1a8] sm:$0xff] }
 0x1b1   : > { %12624 = vst [vmem:[#allocation54_spill] sm:$0xff] %v11220_v43 }
 0x1b3   : > { %8104 = vmatmul.mubr.f32.gmra.mrb[18].mxu0 %v11205_v4  ;;  %v11223_v4 = vld [vmem:[#allocation2 + $0x1b0] sm:$0xff] }
 0x1b4   : > { %8106 = vmatprep.mubr.f32.mxu0 %v11208_v27  ;;  %12625 = vst [vmem:[#allocation55_spill] sm:$0xff] %v11223_v4  ;;  %v11226_v27 = vld [vmem:[#allocation2 + $0x1c8] sm:$0xff] }
 0x1b5   : > { %12626 = vst [vmem:[#allocation56_spill] sm:$0xff] %v11226_v27 }
 0x1b7   : > { %8107 = vmatmul.mubr.f32.gmra.mrb[20].mxu0 %v11211_v28  ;;  %v305_v28 = vld [vmem:[#allocation2 + $0x229] sm:$0x1] }
 0x1b8   : > { %8109 = vmatprep.mubr.f32.mxu0 %v11214_v26  ;;  %323 = vst [vmem:[#allocation2 + $0x227] sm:$0x1] %v305_v28  ;;  %v2391_v26 = vld [vmem:[#allocation7 + $0x328] sm:$0xff]  ;;  %v2392_v28 = vld [vmem:[#allocation7 + $0x330] sm:$0xff] }
 0x1bb   : > { %8110 = vmatmul.mubr.f32.gmra.mrb[22].mxu0 %v11217_v24  ;;  %v2389_v24 = vld [vmem:[#allocation7 + $0x318] sm:$0xff] }
 0x1bc   : > { %8112 = vmatprep.mubr.f32.mxu0 %v11220_v43  ;;  %v2388_v43 = vld [vmem:[#allocation7 + $0x310] sm:$0xff] }
 0x1bf   : > { %8113 = vmatmul.mubr.f32.gmra.mrb[24].mxu0 %v11223_v4  ;;  %v9360_v4 = vpack.c.bf16 %v2389_v24, %v2388_v43  ;;  %v2395_v24 = vld [vmem:[#allocation7 + $0x348] sm:$0xff]  ;;  %v2397_v43 = vld [vmem:[#allocation7 + $0x358] sm:$0xff] }
 0x1c0   : > { %8115 = vmatprep.mubr.f32.mxu0 %v11226_v27  ;;  %v2390_v27 = vld [vmem:[#allocation7 + $0x320] sm:$0xff] }
 0x1c3   : > { %8116 = vmatmul.mubr.f32.gmra.mrb[26].mxu0 %v11229_v14 }
 0x1c4   : > { %8118 = vmatprep.mubr.f32.mxu0 %v10884_v48  ;;  %v9364_v48 = vpack.c.bf16 %v2391_v26, %v2390_v27  ;;  %v2398_v27 = vld [vmem:[#allocation7 + $0x360] sm:$0xff]  ;;  %v2399_v26 = vld [vmem:[#allocation7 + $0x368] sm:$0xff] }
 0x1c7   : > { %8119 = vmatmul.mubr.f32.gmra.mrb[28].mxu0 %v10887_v49  ;;  %v2393_v49 = vld [vmem:[#allocation7 + $0x338] sm:$0xff] }
 0x1c8   : > { %8121 = vmatprep.mubr.f32.mxu0 %v10992_v16 }
 0x1cb   : > { %8122 = vmatmul.mubr.f32.gmra.mrb[30].mxu0 %v11008_v63  ;;  %v9368_v63 = vpack.c.bf16 %v2393_v49, %v2392_v28  ;;  %v2400_v28 = vld [vmem:[#allocation7 + $0x370] sm:$0xff]  ;;  %v2401_v49 = vld [vmem:[#allocation7 + $0x378] sm:$0xff] }
 0x1cc   : > { %8156 = vmatprep.mubr.f32.mxu0 %v11022_v33  ;;  %v2394_v33 = vld [vmem:[#allocation7 + $0x340] sm:$0xff] }
 0x1cf   : > { %8157 = vmatmul.mubr.f32.vlgmr.msra.gmra.mrb[0].mxu0 %v11025_v38  ;;  %v9372_v38 = vpack.c.bf16 %v2395_v24, %v2394_v33  ;;  %v2693_v33 = vld [vmem:[#allocation7 + $0x380] sm:$0xff]  ;;  %v2694_v24 = vld [vmem:[#allocation7 + $0x388] sm:$0xff] }
 0x1d0   : > { %9359 = vmatpush3.bf16.msra.mxu0 %v9356_v9  ;;  %8159 = vmatprep.mubr.f32.mxu0 %v11027_v39  ;;  %v2396_v9 = vld [vmem:[#allocation7 + $0x350] sm:$0xff] }
 0x1d1   : > { %9361 = vmatprep.subr.bf16.mxu0 %v9360_v4 }
 0x1d3   : > { %8160 = vmatmul.mubr.f32.gmra.mrb[2].mxu0 %v11031_v2 }
 0x1d4   : > { %8162 = vmatprep.mubr.f32.mxu0 %v11033_v3  ;;  %9363 = vmatpush3.bf16.msra.mxu0 %v9360_v4  ;;  %v9376_v4 = vpack.c.bf16 %v2397_v43, %v2396_v9  ;;  %v12628_v9 = vld [vmem:[#allocation18_spill] sm:$0xff]  ;;  %v12629_v43 = vld [vmem:[#allocation19_spill] sm:$0xff] }
 0x1d5   : > { %9365 = vmatprep.subr.bf16.mxu0 %v9364_v48 }
 0x1d7   : > { %8163 = vmatmul.mubr.f32.gmra.mrb[4].mxu0 %v11037_v11 }
 0x1d8   : > { %8165 = vmatprep.mubr.f32.mxu0 %v11039_v19  ;;  %9367 = vmatpush3.bf16.msra.mxu0 %v9364_v48  ;;  %v9380_v48 = vpack.c.bf16 %v2399_v26, %v2398_v27  ;;  %v12631_v27 = vld [vmem:[#allocation21_spill] sm:$0xff]  ;;  %v12632_v26 = vld [vmem:[#allocation22_spill] sm:$0xff] }
 0x1d9   : > { %9369 = vmatprep.subr.bf16.mxu0 %v9368_v63 }
 0x1db   : > { %8166 = vmatmul.mubr.f32.gmra.mrb[6].mxu0 %v11043_v41 }
 0x1dc   : > { %8168 = vmatprep.mubr.f32.mxu0 %v11045_v13  ;;  %9371 = vmatpush3.bf16.msra.mxu0 %v9368_v63  ;;  %v9384_v63 = vpack.c.bf16 %v2401_v49, %v2400_v28  ;;  %v12634_v28 = vld [vmem:[#allocation24_spill] sm:$0xff]  ;;  %v12635_v49 = vld [vmem:[#allocation25_spill] sm:$0xff] }
 0x1dd   : > { %9373 = vmatprep.subr.bf16.mxu0 %v9372_v38 }
 0x1df   : > { %8169 = vmatmul.mubr.f32.gmra.mrb[8].mxu0 %v11049_v54 }
 0x1e0   : > { %8171 = vmatprep.mubr.f32.mxu0 %v11051_v22  ;;  %9375 = vmatpush3.bf16.msra.mxu0 %v9372_v38  ;;  %v9388_v38 = vpack.c.bf16 %v2694_v24, %v2693_v33  ;;  %v11265_v33 = vld [vmem:[#allocation2 + $0x209] sm:$0xff] }
 0x1e1   : > { %9377 = vmatprep.subr.bf16.mxu0 %v9376_v4  ;;  %12637 = vst [vmem:[#allocation18_spill] sm:$0xff] %v11265_v33  ;;  %v12638_v24 = vld [vmem:[#allocation27_spill] sm:$0xff] }
 0x1e3   : > { %8172 = vmatmul.mubr.f32.gmra.mrb[10].mxu0 %v11055_v32 }
 0x1e4   : > { %8174 = vmatprep.mubr.f32.mxu0 %v11057_v34  ;;  %9379 = vmatpush3.bf16.msra.mxu0 %v9376_v4  ;;  %v12630_v4 = vld [vmem:[#allocation20_spill] sm:$0xff] }
 0x1e5   : > { %9381 = vmatprep.subr.bf16.mxu0 %v9380_v48 }
 0x1e7   : > { %8175 = vmatmul.mubr.f32.gmra.mrb[12].mxu0 %v11061_v46 }
 0x1e8   : > { %8177 = vmatprep.mubr.f32.mxu0 %v11063_v47  ;;  %9383 = vmatpush3.bf16.msra.mxu0 %v9380_v48  ;;  %v12633_v48 = vld [vmem:[#allocation23_spill] sm:$0xff] }
 0x1e9   : > { %9385 = vmatprep.subr.bf16.mxu0 %v9384_v63 }
 0x1eb   : > { %8178 = vmatmul.mubr.f32.gmra.mrb[14].mxu0 %v11067_v7 }
 0x1ec   : > { %8180 = vmatprep.mubr.f32.mxu0 %v11069_v8  ;;  %9387 = vmatpush3.bf16.msra.mxu0 %v9384_v63  ;;  %v12636_v63 = vld [vmem:[#allocation26_spill] sm:$0xff] }
 0x1ed   : > { %9389 = vmatprep.subr.bf16.mxu0 %v9388_v38 }
 0x1ef   : > { %8181 = vmatmul.mubr.f32.gmra.mrb[16].mxu0 %v11073_v20 }
 0x1f0   : > { %8183 = vmatprep.mubr.f32.mxu0 %v11075_v29 }
 0x1f3   : > { %8184 = vmatmul.mubr.f32.gmra.mrb[18].mxu0 %v11079_v40 }
 0x1f4   : > { %8186 = vmatprep.mubr.f32.mxu0 %v12628_v9 }
 0x1f7   : > { %8187 = vmatmul.mubr.f32.gmra.mrb[20].mxu0 %v12629_v43  ;;  %v11269_v43 = vld [vmem:[#allocation2 + $0x211] sm:$0xff] }
 0x1f8   : > { %8189 = vmatprep.mubr.f32.mxu0 %v12630_v4  ;;  %12639 = vst [vmem:[#allocation25_spill] sm:$0xff] %v11269_v43  ;;  %v2695_v4 = vld [vmem:[#allocation7 + $0x390] sm:$0xff] }
 0x1fb   : > { %8190 = vmatmul.mubr.f32.gmra.mrb[22].mxu0 %v12631_v27  ;;  %v2696_v27 = vld [vmem:[#allocation7 + $0x398] sm:$0xff] }
 0x1fc   : > { %8192 = vmatprep.mubr.f32.mxu0 %v12632_v26  ;;  %v2698_v26 = vld [vmem:[#allocation7 + $0x3a8] sm:$0xff] }
 0x1ff   : > { %8193 = vmatmul.mubr.f32.gmra.mrb[24].mxu0 %v12633_v48  ;;  %v9392_v48 = vpack.c.bf16 %v2696_v27, %v2695_v4  ;;  %v2702_v4 = vld [vmem:[#allocation7 + $0x3c8] sm:$0xff] }
 0x200   : > { %8195 = vmatprep.mubr.f32.mxu0 %v12634_v28  ;;  %v2697_v28 = vld [vmem:[#allocation7 + $0x3a0] sm:$0xff]  ;;  %v2706_v27 = vld [vmem:[#allocation7 + $0x3e8] sm:$0xff] }
 0x203   : > { %8196 = vmatmul.mubr.f32.gmra.mrb[26].mxu0 %v12635_v49 }
 0x204   : > { %8198 = vmatprep.mubr.f32.mxu0 %v12636_v63  ;;  %v2699_v63 = vld [vmem:[#allocation7 + $0x3b0] sm:$0xff] }
 0x207   : > { %8199 = vmatmul.mubr.f32.gmra.mrb[28].mxu0 %v12638_v24  ;;  %v9396_v24 = vpack.c.bf16 %v2698_v26, %v2697_v28  ;;  %v2708_v26 = vld [vmem:[#allocation7 + $0x3f8] sm:$0xff] }
 0x208   : > { %8201 = vmatprep.mubr.f32.mxu0 %v11265_v33  ;;  %v2700_v33 = vld [vmem:[#allocation7 + $0x3b8] sm:$0xff] }
 0x209   : > { %v3007_v28 = vld [vmem:[#allocation7 + $0x438] sm:$0xff] }
 0x20b   : > { %8202 = vmatmul.mubr.f32.gmra.mrb[30].mxu0 %v11269_v43  ;;  %v9400_v43 = vpack.c.bf16 %v2700_v33, %v2699_v63  ;;  %v12647_v63 = vld [vmem:[#allocation35_spill] sm:$0xff]  ;;  %v12648_v33 = vld [vmem:[#allocation36_spill] sm:$0xff] }
 0x20c   : > { %8236 = vmatprep.mubr.f32.mxu0 %v10929_v44  ;;  %v2701_v44 = vld [vmem:[#allocation7 + $0x3c0] sm:$0xff] }
 0x20f   : > { %8237 = vmatmul.mubr.f32.vlgmr.msra.gmra.mrb[0].mxu0 %v10933_v0  ;;  %v9404_v0 = vpack.c.bf16 %v2702_v4, %v2701_v44  ;;  %v3008_v44 = vld [vmem:[#allocation7 + $0x440] sm:$0xff]  ;;  %v3009_v4 = vld [vmem:[#allocation7 + $0x448] sm:$0xff] }
 0x210   : > { %9391 = vmatpush3.bf16.msra.mxu0 %v9388_v38  ;;  %8239 = vmatprep.mubr.f32.mxu0 %v10935_v1  ;;  %v2703_v1 = vld [vmem:[#allocation7 + $0x3d0] sm:$0xff]  ;;  %v2704_v38 = vld [vmem:[#allocation7 + $0x3d8] sm:$0xff] }
 0x211   : > { %9393 = vmatprep.subr.bf16.mxu0 %v9392_v48 }
 0x213   : > { %8240 = vmatmul.mubr.f32.gmra.mrb[2].mxu0 %v10939_v5  ;;  %v9408_v5 = vpack.c.bf16 %v2704_v38, %v2703_v1  ;;  %v12650_v1 = vld [vmem:[#allocation38_spill] sm:$0xff]  ;;  %v9436_v38 = vpack.c.bf16 %v3009_v4, %v3008_v44  ;;  %v3892_v4 = vld [vmem:[#allocation9 + $0xb0] sm:$0xff] }
 0x214   : > { %8242 = vmatprep.mubr.f32.mxu0 %v10941_v6  ;;  %9395 = vmatpush3.bf16.msra.mxu0 %v9392_v48  ;;  %v2705_v6 = vld [vmem:[#allocation7 + $0x3e0] sm:$0xff]  ;;  %v3006_v48 = vld [vmem:[#allocation7 + $0x430] sm:$0xff] }
 0x215   : > { %9397 = vmatprep.subr.bf16.mxu0 %v9396_v24 }
 0x217   : > { %8243 = vmatmul.mubr.f32.gmra.mrb[4].mxu0 %v10945_v12  ;;  %v9412_v12 = vpack.c.bf16 %v2706_v27, %v2705_v6  ;;  %v3011_v6 = vld [vmem:[#allocation7 + $0x458] sm:$0xff]  ;;  %v12651_v27 = vld [vmem:[#allocation39_spill] sm:$0xff] }
 0x218   : > { %8245 = vmatprep.mubr.f32.mxu0 %v10947_v18  ;;  %9399 = vmatpush3.bf16.msra.mxu0 %v9396_v24  ;;  %v2707_v18 = vld [vmem:[#allocation7 + $0x3f0] sm:$0xff]  ;;  %v9432_v24 = vpack.c.bf16 %v3007_v28, %v3006_v48  ;;  %v466_v48 = vld [vmem:[#allocation2 + $0x228] sm:$0xff] }
 0x219   : > { %9401 = vmatprep.subr.bf16.mxu0 %v9400_v43  ;;  %v12665_v28 = vld [vmem:[#allocation15_spill] sm:$0xff] }
 0x21b   : > { %8246 = vmatmul.mubr.f32.gmra.mrb[6].mxu0 %v10951_v30  ;;  %v9416_v30 = vpack.c.bf16 %v2708_v26, %v2707_v18  ;;  %v3012_v18 = vld [vmem:[#allocation7 + $0x460] sm:$0xff]  ;;  %v3013_v26 = vld [vmem:[#allocation7 + $0x468] sm:$0xff] }
 0x21c   : > { %8248 = vmatprep.mubr.f32.mxu0 %v10953_v31  ;;  %9403 = vmatpush3.bf16.msra.mxu0 %v9400_v43  ;;  %v3000_v31 = vld [vmem:[#allocation7 + $0x400] sm:$0xff]  ;;  %v3001_v43 = vld [vmem:[#allocation7 + $0x408] sm:$0xff] }
 0x21d   : > { %9405 = vmatprep.subr.bf16.mxu0 %v9404_v0 }
 0x21f   : > { %8249 = vmatmul.mubr.f32.gmra.mrb[8].mxu0 %v10957_v42  ;;  %v9420_v42 = vpack.c.bf16 %v3001_v43, %v3000_v31  ;;  %v3014_v31 = vld [vmem:[#allocation7 + $0x470] sm:$0xff]  ;;  %v3015_v43 = vld [vmem:[#allocation7 + $0x478] sm:$0xff] }
 0x220   : > { %8251 = vmatprep.mubr.f32.mxu0 %v10959_v50  ;;  %9407 = vmatpush3.bf16.msra.mxu0 %v9404_v0  ;;  %v12640_v50 = vld [vmem:[#allocation16_spill] sm:$0xff]  ;;  %v12649_v0 = vld [vmem:[#allocation37_spill] sm:$0xff] }
 0x221   : > { %9409 = vmatprep.subr.bf16.mxu0 %v9408_v5 }
 0x223   : > { %8252 = vmatmul.mubr.f32.gmra.mrb[10].mxu0 %v10963_v52  ;;  %v341_v52 = vld [vmem:[#allocation2 + $0x236] sm:$0x1] }
 0x224   : > { %8254 = vmatprep.mubr.f32.mxu0 %v10965_v53  ;;  %9411 = vmatpush3.bf16.msra.mxu0 %v9408_v5  ;;  %v12641_v53 = vld [vmem:[#allocation17_spill] sm:$0xff]  ;;  %359 = vst [vmem:[#allocation2 + $0x238] sm:$0x1] %v341_v52  ;;  %v3010_v5 = vld [vmem:[#allocation7 + $0x450] sm:$0xff]  ;;  %v12653_v52 = vld [vmem:[#allocation47_spill] sm:$0xff] }
 0x225   : > { %9413 = vmatprep.subr.bf16.mxu0 %v9412_v12 }
 0x227   : > { %8255 = vmatmul.mubr.f32.gmra.mrb[12].mxu0 %v10969_v55  ;;  %v12642_v55 = vld [vmem:[#allocation28_spill] sm:$0xff] }
 0x228   : > { %8257 = vmatprep.mubr.f32.mxu0 %v10971_v10  ;;  %9415 = vmatpush3.bf16.msra.mxu0 %v9412_v12  ;;  %v394_v10 = vld [vmem:[#allocation2 + $0x227] sm:$0xff]  ;;  %v9440_v12 = vpack.c.bf16 %v3011_v6, %v3010_v5 }
 0x229   : > { %9417 = vmatprep.subr.bf16.mxu0 %v9416_v30  ;;  %v3894_v6 = vld [vmem:[#allocation9 + $0xc0] sm:$0xff] }
 0x22b   : > { %8258 = vmatmul.mubr.f32.gmra.mrb[14].mxu0 %v10975_v15  ;;  %v12643_v15 = vld [vmem:[#allocation29_spill] sm:$0xff] }
 0x22c   : > { %8260 = vmatprep.mubr.f32.mxu0 %v10977_v56  ;;  %9419 = vmatpush3.bf16.msra.mxu0 %v9416_v30  ;;  %v395_v56 = vld [vmem:[#allocation2 + $0x22f] sm:$0xff]  ;;  %v9444_v30 = vpack.c.bf16 %v3013_v26, %v3012_v18 }
 0x22d   : > { %9421 = vmatprep.subr.bf16.mxu0 %v9420_v42  ;;  %v3896_v26 = vld [vmem:[#allocation9 + $0xd0] sm:$0xff] }
 0x22f   : > { %8261 = vmatmul.mubr.f32.gmra.mrb[16].mxu0 %v10981_v57  ;;  %v3002_v57 = vld [vmem:[#allocation7 + $0x410] sm:$0xff] }
 0x230   : > { %8263 = vmatprep.mubr.f32.mxu0 %v10983_v58  ;;  %v3003_v58 = vld [vmem:[#allocation7 + $0x418] sm:$0xff] }
 0x233   : > { %8264 = vmatmul.mubr.f32.gmra.mrb[18].mxu0 %v10987_v59  ;;  %v12644_v59 = vld [vmem:[#allocation32_spill] sm:$0xff] }
 0x234   : > { %8266 = vmatprep.mubr.f32.mxu0 %v10989_v60  ;;  %v9424_v60 = vpack.c.bf16 %v3003_v58, %v3002_v57  ;;  %v12659_v57 = vld [vmem:[#allocation53_spill] sm:$0xff]  ;;  %v12660_v58 = vld [vmem:[#allocation54_spill] sm:$0xff] }
 0x237   : > { %8267 = vmatmul.mubr.f32.gmra.mrb[20].mxu0 %v10997_v17  ;;  %v3004_v17 = vld [vmem:[#allocation7 + $0x420] sm:$0xff] }
 0x238   : > { %8269 = vmatprep.mubr.f32.mxu0 %v10999_v61  ;;  %v3005_v61 = vld [vmem:[#allocation7 + $0x428] sm:$0xff] }
 0x23b   : > { %8270 = vmatmul.mubr.f32.gmra.mrb[22].mxu0 %v11003_v62  ;;  %v12645_v62 = vld [vmem:[#allocation33_spill] sm:$0xff] }
 0x23c   : > { %8272 = vmatprep.mubr.f32.mxu0 %v11005_v21  ;;  %v12646_v21 = vld [vmem:[#allocation34_spill] sm:$0xff] }
 0x23f   : > { %8273 = vmatmul.mubr.f32.gmra.mrb[24].mxu0 %v11013_v23  ;;  %v9428_v23 = vpack.c.bf16 %v3005_v61, %v3004_v17  ;;  %v12662_v17 = vld [vmem:[#allocation56_spill] sm:$0xff]  ;;  %v11328_v61 = vld [vmem:[#allocation2 + $0x1e8] sm:$0xff] }
 0x240   : > { %8275 = vmatprep.mubr.f32.mxu0 %v12640_v50  ;;  %v12652_v50 = vld [vmem:[#allocation46_spill] sm:$0xff]  ;;  %12663 = vst [vmem:[#allocation16_spill] sm:$0xff] %v11328_v61 }
 0x243   : > { %8276 = vmatmul.mubr.f32.gmra.mrb[26].mxu0 %v12641_v53  ;;  %v12654_v53 = vld [vmem:[#allocation48_spill] sm:$0xff] }
 0x244   : > { %8278 = vmatprep.mubr.f32.mxu0 %v12642_v55  ;;  %v12655_v55 = vld [vmem:[#allocation49_spill] sm:$0xff] }
 0x247   : > { %8279 = vmatmul.mubr.f32.gmra.mrb[28].mxu0 %v12643_v15  ;;  %v12657_v15 = vld [vmem:[#allocation51_spill] sm:$0xff] }
 0x248   : > { %8281 = vmatprep.mubr.f32.mxu0 %v394_v10  ;;  %v12656_v10 = vld [vmem:[#allocation50_spill] sm:$0xff] }
 0x24b   : > { %8282 = vmatmul.mubr.f32.gmra.mrb[30].mxu0 %v395_v56  ;;  %v12658_v56 = vld [vmem:[#allocation52_spill] sm:$0xff] }
 0x24c   : > { %8316 = vmatprep.mubr.f32.mxu0 %v12644_v59  ;;  %v4694_v59 = vld [vmem:[#allocation9 + $0x198] sm:$0xff] }
 0x24f   : > { %8317 = vmatmul.mubr.f32.vlgmr.msra.gmra.mrb[0].mxu0 %v12645_v62  ;;  %v4693_v62 = vld [vmem:[#allocation9 + $0x190] sm:$0xff] }
 0x250   : > { %9423 = vmatpush3.bf16.msra.mxu0 %v9420_v42  ;;  %8319 = vmatprep.mubr.f32.mxu0 %v12646_v21  ;;  %v9448_v42 = vpack.c.bf16 %v3015_v43, %v3014_v31  ;;  %v3898_v43 = vld [vmem:[#allocation9 + $0xe0] sm:$0xff] }
 0x251   : > { %9425 = vmatprep.subr.bf16.mxu0 %v9424_v60 }
 0x253   : > { %8320 = vmatmul.mubr.f32.gmra.mrb[2].mxu0 %v12647_v63 }
 0x254   : > { %8322 = vmatprep.mubr.f32.mxu0 %v12648_v33  ;;  %9427 = vmatpush3.bf16.msra.mxu0 %v9424_v60  ;;  %v12661_v60 = vld [vmem:[#allocation55_spill] sm:$0xff] }
 0x255   : > { %9429 = vmatprep.subr.bf16.mxu0 %v9428_v23 }
 0x257   : > { %8323 = vmatmul.mubr.f32.gmra.mrb[4].mxu0 %v12649_v0 }
 0x258   : > { %8325 = vmatprep.mubr.f32.mxu0 %v12650_v1  ;;  %9431 = vmatpush3.bf16.msra.mxu0 %v9428_v23  ;;  %v11331_v23 = vld [vmem:[#allocation2 + $0x1f0] sm:$0xff] }
 0x259   : > { %9433 = vmatprep.subr.bf16.mxu0 %v9432_v24  ;;  %12664 = vst [vmem:[#allocation17_spill] sm:$0xff] %v11331_v23 }
 0x25b   : > { %8326 = vmatmul.mubr.f32.gmra.mrb[6].mxu0 %v12651_v27 }
 0x25c   : > { %8328 = vmatprep.mubr.f32.mxu0 %v11178_v36  ;;  %9435 = vmatpush3.bf16.msra.mxu0 %v9432_v24  ;;  %v467_v24 = vld [vmem:[#allocation2 + $0x230] sm:$0xff] }
 0x25d   : > { %9437 = vmatprep.subr.bf16.mxu0 %v9436_v38 }
 0x25f   : > { %8329 = vmatmul.mubr.f32.gmra.mrb[8].mxu0 %v11181_v45 }
 0x260   : > { %8331 = vmatprep.mubr.f32.mxu0 %v11184_v25  ;;  %9439 = vmatpush3.bf16.msra.mxu0 %v9436_v38  ;;  %v3893_v38 = vld [vmem:[#allocation9 + $0xb8] sm:$0xff] }
 0x261   : > { %9441 = vmatprep.subr.bf16.mxu0 %v9440_v12  ;;  %v9464_v5 = vpack.c.bf16 %v3893_v38, %v3892_v4 }
 0x263   : > { %8332 = vmatmul.mubr.f32.gmra.mrb[10].mxu0 %v11187_v51 }
 0x264   : > { %8334 = vmatprep.mubr.f32.mxu0 %v11190_v35  ;;  %9443 = vmatpush3.bf16.msra.mxu0 %v9440_v12  ;;  %v3895_v12 = vld [vmem:[#allocation9 + $0xc8] sm:$0xff] }
 0x265   : > { %9445 = vmatprep.subr.bf16.mxu0 %v9444_v30  ;;  %v9468_v18 = vpack.c.bf16 %v3895_v12, %v3894_v6 }
 0x267   : > { %8335 = vmatmul.mubr.f32.gmra.mrb[12].mxu0 %v11193_v37 }
 0x268   : > { %8337 = vmatprep.mubr.f32.mxu0 %v12652_v50  ;;  %9447 = vmatpush3.bf16.msra.mxu0 %v9444_v30  ;;  %v3897_v30 = vld [vmem:[#allocation9 + $0xd8] sm:$0xff] }
 0x269   : > { %9449 = vmatprep.subr.bf16.mxu0 %v9448_v42  ;;  %v9472_v31 = vpack.c.bf16 %v3897_v30, %v3896_v26 }
 0x26b   : > { %8338 = vmatmul.mubr.f32.gmra.mrb[14].mxu0 %v12653_v52 }
 0x26c   : > { %8340 = vmatprep.mubr.f32.mxu0 %v12654_v53  ;;  %9451 = vmatpush3.bf16.msra.mxu0 %v9448_v42  ;;  %v3899_v42 = vld [vmem:[#allocation9 + $0xe8] sm:$0xff] }
 0x26f   : > { %8341 = vmatmul.mubr.f32.gmra.mrb[16].mxu0 %v12655_v55 }
 0x270   : > { %8343 = vmatprep.mubr.f32.mxu0 %v12656_v10 }
 0x273   : > { %8344 = vmatmul.mubr.f32.gmra.mrb[18].mxu0 %v12657_v15 }
 0x274   : > { %8346 = vmatprep.mubr.f32.mxu0 %v12658_v56 }
 0x277   : > { %8347 = vmatmul.mubr.f32.gmra.mrb[20].mxu0 %v12659_v57 }
 0x278   : > { %8349 = vmatprep.mubr.f32.mxu0 %v12660_v58 }
 0x27b   : > { %8350 = vmatmul.mubr.f32.gmra.mrb[22].mxu0 %v12661_v60 }
 0x27c   : > { %8352 = vmatprep.mubr.f32.mxu0 %v12662_v17 }
 0x27f   : > { %8353 = vmatmul.mubr.f32.gmra.mrb[24].mxu0 %v11229_v14 }
 0x280   : > { %8355 = vmatprep.mubr.f32.mxu0 %v11328_v61 }
 0x283   : > { %8356 = vmatmul.mubr.f32.gmra.mrb[26].mxu0 %v11331_v23 }
 0x284   : > { %8358 = vmatprep.mubr.f32.mxu0 %v10992_v16 }
 0x287   : > { %8359 = vmatmul.mubr.f32.gmra.mrb[28].mxu0 %v12665_v28 }
 0x288   : > { %8361 = vmatprep.mubr.f32.mxu0 %v466_v48  ;;  %v9476_v48 = vpack.c.bf16 %v3899_v42, %v3898_v43 }
 0x28b   : > { %8362 = vmatmul.mubr.f32.gmra.mrb[30].mxu0 %v467_v24  ;;  %v3900_v24 = vld [vmem:[#allocation9 + $0xf0] sm:$0xff] }
 0x28c   : > { %8396 = vmatprep.mubr.f32.mxu0 %v11027_v39  ;;  %v12666_v39 = vld [vmem:[#allocation19_spill] sm:$0xff] }
 0x28f   : > { %8397 = vmatmul.mubr.f32.vlgmr.msra.gmra.mrb[0].mxu0 %v11031_v2  ;;  %v12667_v2 = vld [vmem:[#allocation20_spill] sm:$0xff] }
 0x290   : > { %8399 = vmatprep.mubr.f32.mxu0 %v11033_v3  ;;  %v12668_v3 = vld [vmem:[#allocation21_spill] sm:$0xff] }
 0x293   : > { %8400 = vmatmul.mubr.f32.gmra.mrb[2].mxu0 %v11037_v11  ;;  %v12669_v11 = vld [vmem:[#allocation22_spill] sm:$0xff] }
 0x294   : > { %8402 = vmatprep.mubr.f32.mxu0 %v11039_v19  ;;  %v12670_v19 = vld [vmem:[#allocation23_spill] sm:$0xff] }
 0x297   : > { %8403 = vmatmul.mubr.f32.gmra.mrb[4].mxu0 %v11043_v41  ;;  %v12671_v41 = vld [vmem:[#allocation24_spill] sm:$0xff] }
 0x298   : > { %8405 = vmatprep.mubr.f32.mxu0 %v11045_v13  ;;  %v12672_v13 = vld [vmem:[#allocation26_spill] sm:$0xff] }
 0x29b   : > { %8406 = vmatmul.mubr.f32.gmra.mrb[6].mxu0 %v11049_v54  ;;  %v12673_v54 = vld [vmem:[#allocation27_spill] sm:$0xff] }
 0x29c   : > { %8408 = vmatprep.mubr.f32.mxu0 %v11051_v22  ;;  %v12674_v22 = vld [vmem:[#allocation18_spill] sm:$0xff] }
 0x29f   : > { %8409 = vmatmul.mubr.f32.gmra.mrb[8].mxu0 %v11055_v32  ;;  %v539_v32 = vld [vmem:[#allocation2 + $0x229] sm:$0xff] }
 0x2a0   : > { %8411 = vmatprep.mubr.f32.mxu0 %v11057_v34  ;;  %v12675_v34 = vld [vmem:[#allocation25_spill] sm:$0xff] }
 0x2a3   : > { %8412 = vmatmul.mubr.f32.gmra.mrb[10].mxu0 %v11061_v46  ;;  %v540_v46 = vld [vmem:[#allocation2 + $0x231] sm:$0xff] }
 0x2a4   : > { %8414 = vmatprep.mubr.f32.mxu0 %v11063_v47  ;;  %v3886_v47 = vld [vmem:[#allocation9 + $0x80] sm:$0xff] }
 0x2a7   : > { %8415 = vmatmul.mubr.f32.gmra.mrb[12].mxu0 %v11067_v7  ;;  %v3887_v7 = vld [vmem:[#allocation9 + $0x88] sm:$0xff] }
 0x2a8   : > { %8417 = vmatprep.mubr.f32.mxu0 %v11069_v8  ;;  %v9452_v8 = vpack.c.bf16 %v3887_v7, %v3886_v47 }
 0x2aa   : > { %9453 = vmatprep.subr.bf16.mxu1 %v9452_v8 }
 0x2ab   : > { %8418 = vmatmul.mubr.f32.gmra.mrb[14].mxu0 %v11073_v20  ;;  %9455 = vmatpush3.bf16.msra.mxu1 %v9452_v8  ;;  %v3888_v20 = vld [vmem:[#allocation9 + $0x90] sm:$0xff] }
 0x2ac   : > { %8420 = vmatprep.mubr.f32.mxu0 %v11075_v29  ;;  %v3889_v29 = vld [vmem:[#allocation9 + $0x98] sm:$0xff] }
 0x2af   : > { %8421 = vmatmul.mubr.f32.gmra.mrb[16].mxu0 %v11079_v40  ;;  %v9456_v40 = vpack.c.bf16 %v3889_v29, %v3888_v20 }
 0x2b0   : > { %8423 = vmatprep.mubr.f32.mxu0 %v12628_v9  ;;  %v3890_v9 = vld [vmem:[#allocation9 + $0xa0] sm:$0xff] }
 0x2b1   : > { %9457 = vmatprep.subr.bf16.mxu1 %v9456_v40 }
 0x2b2   : > { %9459 = vmatpush3.bf16.msra.mxu1 %v9456_v40 }
 0x2b3   : > { %8424 = vmatmul.mubr.f32.gmra.mrb[18].mxu0 %v12666_v39  ;;  %v3901_v39 = vld [vmem:[#allocation9 + $0xf8] sm:$0xff] }
 0x2b4   : > { %8426 = vmatprep.mubr.f32.mxu0 %v12667_v2  ;;  %v9480_v2 = vpack.c.bf16 %v3901_v39, %v3900_v24 }
 0x2b7   : > { %8427 = vmatmul.mubr.f32.gmra.mrb[20].mxu0 %v12668_v3  ;;  %v3837_v3 = vld [vmem:[#allocation9] sm:$0xff] }
 0x2b8   : > { %8429 = vmatprep.mubr.f32.mxu0 %v12669_v11  ;;  %v3838_v11 = vld [vmem:[#allocation9 + $0x8] sm:$0xff] }
 0x2bb   : > { %8430 = vmatmul.mubr.f32.gmra.mrb[22].mxu0 %v12670_v19  ;;  %v11366_v19 = vpack.c.bf16 %v3838_v11, %v3837_v3 }
 0x2bc   : > { %8432 = vmatprep.mubr.f32.mxu0 %v12671_v41 }
 0x2bf   : > { %8433 = vmatmul.mubr.f32.gmra.mrb[24].mxu0 %v12635_v49  ;;  %v3891_v49 = vld [vmem:[#allocation9 + $0xa8] sm:$0xff] }
 0x2c0   : > { %8435 = vmatprep.mubr.f32.mxu0 %v12672_v13  ;;  %v9460_v44 = vpack.c.bf16 %v3891_v49, %v3890_v9 }
 0x2c2   : > { %9461 = vmatprep.subr.bf16.mxu1 %v9460_v44 }
 0x2c3   : > { %8436 = vmatmul.mubr.f32.gmra.mrb[26].mxu0 %v12673_v54  ;;  %9463 = vmatpush3.bf16.msra.mxu1 %v9460_v44 }
 0x2c4   : > { %8438 = vmatprep.mubr.f32.mxu0 %v12674_v22  ;;  %9465 = vmatprep.subr.bf16.mxu1 %v9464_v5 }
 0x2c7   : > { %8439 = vmatmul.mubr.f32.gmra.mrb[28].mxu0 %v12675_v34  ;;  %9467 = vmatpush3.bf16.msra.mxu1 %v9464_v5 }
 0x2c8   : > { %8441 = vmatprep.mubr.f32.mxu0 %v539_v32  ;;  %9469 = vmatprep.subr.bf16.mxu1 %v9468_v18 }
 0x2cb   : > { %8442 = vmatmul.mubr.f32.gmra.mrb[30].mxu0 %v540_v46  ;;  %9471 = vmatpush3.bf16.msra.mxu1 %v9468_v18 }
 0x2cc   : > { %9473 = vmatprep.subr.bf16.mxu1 %v9472_v31 }
 0x2cf   : > { %9475 = vmatpush3.bf16.msra.mxu1 %v9472_v31 }
 0x2d0   : > { %9477 = vmatprep.subr.bf16.mxu1 %v9476_v48 }
 0x2d3   : > { %9479 = vmatpush3.bf16.msra.mxu1 %v9476_v48 }
 0x2d4   : > { %9481 = vmatprep.subr.bf16.mxu1 %v9480_v2 }
 0x2d7   : > { %9483 = vmatpush3.bf16.msra.mxu1 %v9480_v2 }
 0x2d8   : > { %9485 = vmatprep.subr.bf16.mxu1 %v11366_v19 }
 0x362   : > { %v11369_v41 = vpop.f32.mrb[0].mxu0 }
 0x363   : > { %v3312_v13 = vmul.f32 %v11369_v41, %v11369_v41  ;;  %v11373_v54 = vpop.f32.mrb[1].mxu0 }
 0x364   : > { %v3273_v22 = vadd.f32 %v11369_v41, %v11373_v54  ;;  %v3311_v32 = vmul.f32 %v11373_v54, %v11373_v54 }
 0x366   : > { %v3343_v34 = vadd.f32 %v3312_v13, %v3311_v32  ;;  %v11379_v46 = vpop.f32.mrb[2].mxu0 }
 0x367   : > { %v11381_v47 = vpop.f32.mrb[3].mxu0  ;;  %v3314_v20 = vmul.f32 %v11379_v46, %v11379_v46 }
 0x368   : > { %v3274_v7 = vadd.f32 %v3273_v22, %v11381_v47  ;;  %v3313_v8 = vmul.f32 %v11381_v47, %v11381_v47 }
 0x36a   : > { %v3344_v29 = vadd.f32 %v3343_v34, %v3313_v8  ;;  %v11388_v40 = vpop.f32.mrb[4].mxu0  ;;  %v3275_v9 = vadd.f32 %v11379_v46, %v3274_v7 }
 0x36b   : > { %v11391_v49 = vpop.f32.mrb[5].mxu0  ;;  %v3316_v5 = vmul.f32 %v11388_v40, %v11388_v40 }
 0x36c   : > { %v3276_v44 = vadd.f32 %v3275_v9, %v11391_v49  ;;  %v3315_v4 = vmul.f32 %v11391_v49, %v11391_v49  ;;  %v3345_v38 = vadd.f32 %v3344_v29, %v3314_v20 }
 0x36e   : > { %v3346_v6 = vadd.f32 %v3345_v38, %v3315_v4  ;;  %v11398_v12 = vpop.f32.mrb[6].mxu0  ;;  %v3277_v18 = vadd.f32 %v11388_v40, %v3276_v44 }
 0x36f   : > { %v11401_v26 = vpop.f32.mrb[7].mxu0  ;;  %v3318_v42 = vmul.f32 %v11398_v12, %v11398_v12 }
 0x370   : > { %v3278_v30 = vadd.f32 %v3277_v18, %v11401_v26  ;;  %v3317_v31 = vmul.f32 %v11401_v26, %v11401_v26  ;;  %v3347_v43 = vadd.f32 %v3346_v6, %v3316_v5 }
 0x372   : > { %v3348_v48 = vadd.f32 %v3347_v43, %v3317_v31  ;;  %v11408_v24 = vpop.f32.mrb[8].mxu0  ;;  %v3279_v39 = vadd.f32 %v11398_v12, %v3278_v30 }
 0x373   : > { %v11411_v2 = vpop.f32.mrb[9].mxu0  ;;  %v3320_v22 = vmul.f32 %v11408_v24, %v11408_v24 }
 0x374   : > { %v3280_v3 = vadd.f32 %v3279_v39, %v11411_v2  ;;  %v3319_v11 = vmul.f32 %v11411_v2, %v11411_v2  ;;  %v3349_v13 = vadd.f32 %v3348_v48, %v3318_v42 }
 0x376   : > { %v3350_v32 = vadd.f32 %v3349_v13, %v3319_v11  ;;  %v11418_v34 = vpop.f32.mrb[10].mxu0  ;;  %v3281_v7 = vadd.f32 %v11408_v24, %v3280_v3 }
 0x377   : > { %v11421_v8 = vpop.f32.mrb[11].mxu0  ;;  %v3322_v44 = vmul.f32 %v11418_v34, %v11418_v34 }
 0x378   : > { %v3282_v20 = vadd.f32 %v3281_v7, %v11421_v8  ;;  %v3321_v29 = vmul.f32 %v11421_v8, %v11421_v8  ;;  %v3351_v9 = vadd.f32 %v3350_v32, %v3320_v22 }
 0x37a   : > { %v3352_v4 = vadd.f32 %v3351_v9, %v3321_v29  ;;  %v11428_v38 = vpop.f32.mrb[12].mxu0  ;;  %v3283_v5 = vadd.f32 %v11418_v34, %v3282_v20 }
 0x37b   : > { %v11431_v6 = vpop.f32.mrb[13].mxu0  ;;  %v3324_v43 = vmul.f32 %v11428_v38, %v11428_v38 }
 0x37c   : > { %v3284_v18 = vadd.f32 %v3283_v5, %v11431_v6  ;;  %v3323_v30 = vmul.f32 %v11431_v6, %v11431_v6  ;;  %v3353_v31 = vadd.f32 %v3352_v4, %v3322_v44 }
 0x37e   : > { %v3354_v42 = vadd.f32 %v3353_v31, %v3323_v30  ;;  %v11438_v48 = vpop.f32.mrb[14].mxu0  ;;  %v3285_v39 = vadd.f32 %v11428_v38, %v3284_v18 }
 0x37f   : > { %v11441_v3 = vpop.f32.mrb[15].mxu0  ;;  %v3326_v32 = vmul.f32 %v11438_v48, %v11438_v48 }
 0x380   : > { %v3286_v11 = vadd.f32 %v3285_v39, %v11441_v3  ;;  %v3325_v13 = vmul.f32 %v11441_v3, %v11441_v3  ;;  %v3355_v22 = vadd.f32 %v3354_v42, %v3324_v43 }
 0x382   : > { %v3356_v7 = vadd.f32 %v3355_v22, %v3325_v13  ;;  %v11448_v20 = vpop.f32.mrb[16].mxu0  ;;  %v3287_v29 = vadd.f32 %v11438_v48, %v3286_v11 }
 0x383   : > { %v11451_v9 = vpop.f32.mrb[17].mxu0  ;;  %v3328_v18 = vmul.f32 %v11448_v20, %v11448_v20 }
 0x384   : > { %v3288_v44 = vadd.f32 %v3287_v29, %v11451_v9  ;;  %v3327_v4 = vmul.f32 %v11451_v9, %v11451_v9  ;;  %v3357_v5 = vadd.f32 %v3356_v7, %v3326_v32 }
 0x386   : > { %v3358_v30 = vadd.f32 %v3357_v5, %v3327_v4  ;;  %v11458_v31 = vpop.f32.mrb[18].mxu0  ;;  %v3289_v43 = vadd.f32 %v11448_v20, %v3288_v44 }
 0x387   : > { %v11461_v42 = vpop.f32.mrb[19].mxu0  ;;  %v3330_v22 = vmul.f32 %v11458_v31, %v11458_v31 }
 0x388   : > { %v3290_v39 = vadd.f32 %v3289_v43, %v11461_v42  ;;  %v3329_v11 = vmul.f32 %v11461_v42, %v11461_v42  ;;  %v3359_v13 = vadd.f32 %v3358_v30, %v3328_v18 }
 0x38a   : > { %v3360_v32 = vadd.f32 %v3359_v13, %v3329_v11  ;;  %v11468_v7 = vpop.f32.mrb[20].mxu0  ;;  %v3291_v29 = vadd.f32 %v11458_v31, %v3290_v39 }
 0x38b   : > { %v11471_v4 = vpop.f32.mrb[21].mxu0  ;;  %v3332_v28 = vmul.f32 %v11468_v7, %v11468_v7 }
 0x38c   : > { %v3292_v44 = vadd.f32 %v3291_v29, %v11471_v4  ;;  %v3331_v5 = vmul.f32 %v11471_v4, %v11471_v4  ;;  %v3361_v43 = vadd.f32 %v3360_v32, %v3330_v22 }
 0x38e   : > { %v3362_v18 = vadd.f32 %v3361_v43, %v3331_v5  ;;  %v11478_v30 = vpop.f32.mrb[22].mxu0  ;;  %v3293_v11 = vadd.f32 %v11468_v7, %v3292_v44 }
 0x38f   : > { %v11481_v13 = vpop.f32.mrb[23].mxu0  ;;  %v3334_v61 = vmul.f32 %v11478_v30, %v11478_v30 }
 0x390   : > { %v3294_v39 = vadd.f32 %v3293_v11, %v11481_v13  ;;  %v3333_v23 = vmul.f32 %v11481_v13, %v11481_v13  ;;  %v3363_v29 = vadd.f32 %v3362_v18, %v3332_v28 }
 0x392   : > { %v3364_v22 = vadd.f32 %v3363_v29, %v3333_v23  ;;  %v11488_v32 = vpop.f32.mrb[24].mxu0  ;;  %v3295_v5 = vadd.f32 %v11478_v30, %v3294_v39 }
 0x393   : > { %v11491_v43 = vpop.f32.mrb[25].mxu0  ;;  %v3336_v17 = vmul.f32 %v11488_v32, %v11488_v32 }
 0x394   : > { %v3296_v44 = vadd.f32 %v3295_v5, %v11491_v43  ;;  %v3335_v14 = vmul.f32 %v11491_v43, %v11491_v43  ;;  %v3365_v11 = vadd.f32 %v3364_v22, %v3334_v61 }
 0x396   : > { %v3366_v28 = vadd.f32 %v3365_v11, %v3335_v14  ;;  %v11498_v18 = vpop.f32.mrb[26].mxu0  ;;  %v3297_v23 = vadd.f32 %v11488_v32, %v3296_v44 }
 0x397   : > { %v11501_v29 = vpop.f32.mrb[27].mxu0  ;;  %v3338_v58 = vmul.f32 %v11498_v18, %v11498_v18 }
 0x398   : > { %v3298_v39 = vadd.f32 %v3297_v23, %v11501_v29  ;;  %v3337_v60 = vmul.f32 %v11501_v29, %v11501_v29  ;;  %v3367_v5 = vadd.f32 %v3366_v28, %v3336_v17 }
 0x39a   : > { %v3368_v61 = vadd.f32 %v3367_v5, %v3337_v60  ;;  %v11508_v22 = vpop.f32.mrb[28].mxu0  ;;  %v3299_v14 = vadd.f32 %v11498_v18, %v3298_v39 }
 0x39b   : > { %v11511_v11 = vpop.f32.mrb[29].mxu0  ;;  %v3340_v56 = vmul.f32 %v11508_v22, %v11508_v22 }
 0x39c   : > { %v3300_v44 = vadd.f32 %v3299_v14, %v11511_v11  ;;  %v3339_v57 = vmul.f32 %v11511_v11, %v11511_v11  ;;  %v3369_v23 = vadd.f32 %v3368_v61, %v3338_v58 }
 0x39e   : > { %v3370_v17 = vadd.f32 %v3369_v23, %v3339_v57  ;;  %v11518_v28 = vpop.f32.mrb[30].mxu0  ;;  %v3301_v60 = vadd.f32 %v11508_v22, %v3300_v44 }
 0x39f   : > { %v11521_v5 = vpop.f32.mrb[31].mxu0  ;;  %v3342_v10 = vmul.f32 %v11518_v28, %v11518_v28 }
 0x3a0   : > { %v3302_v39 = vadd.f32 %v3301_v60, %v11521_v5  ;;  %v3341_v15 = vmul.f32 %v11521_v5, %v11521_v5  ;;  %v3371_v14 = vadd.f32 %v3370_v17, %v3340_v56 }
 0x3a2   : > { %v3303_v58 = vadd.f32 %v11518_v28, %v3302_v39  ;;  %v3372_v61 = vadd.f32 %v3371_v14, %v3341_v15  ;;  %v3841_v14 = vld [vmem:[#allocation9 + $0x20] sm:$0xff] }
 0x3a4   : > { %v3304_v55 = vrot.slane %v3303_v58, 4  ;;  %v3373_v57 = vadd.f32 %v3372_v61, %v3342_v10 }
 0x3a6   : > { %v3305_v23 = vadd.f32 %v3304_v55, %v3303_v58  ;;  %v3374_v53 = vrot.slane %v3373_v57, 4  ;;  %v3842_v58 = vld [vmem:[#allocation9 + $0x28] sm:$0xff] }
 0x3a8   : > { %v3306_v52 = vrot.slane %v3305_v23, 2  ;;  %v3375_v44 = vadd.f32 %v3374_v53, %v3373_v57 }
 0x3aa   : > { %v3307_v50 = vadd.f32 %v3306_v52, %v3305_v23  ;;  %v3376_v37 = vrot.slane %v3375_v44, 2 }
 0x3ac   : > { %v3308_v35 = vrot.slane %v3307_v50, 1  ;;  %v3377_v60 = vadd.f32 %v3376_v37, %v3375_v44 }
 0x3ae   : > { %v3309_v51 = vadd.f32 %v3308_v35, %v3307_v50  ;;  %v3378_v25 = vrot.slane %v3377_v60, 1 }
 0x3b0   : > { %v11529_v45 = vmul.f32 0.00390625, %v3309_v51  ;;  %v3379_v56 = vadd.f32 %v3378_v25, %v3377_v60 }
 0x3b2   : > { %v3380_v17 = vmul.f32 0.00390625, %v3379_v56  ;;  %v3381_v39 = vmul.f32 %v11529_v45, %v11529_v45  ;;  %v3413_v10 = vsub.f32 %v11521_v5, %v11529_v45  ;;  %v3383_v55 = vsub.f32 %v11373_v54, %v11529_v45  ;;  %v3839_v5 = vld [vmem:[#allocation9 + $0x10] sm:$0xff] }
 0x3b3   : > { %v3384_v52 = vsub.f32 %v11369_v41, %v11529_v45  ;;  %v3385_v35 = vsub.f32 %v11381_v47, %v11529_v45  ;;  %v3386_v51 = vsub.f32 %v11379_v46, %v11529_v45  ;;  %v3387_v25 = vsub.f32 %v11391_v49, %v11529_v45 }
 0x3b4   : > { %v3382_v37 = vsub.f32 %v3380_v17, %v3381_v39  ;;  %v3388_v50 = vsub.f32 %v11388_v40, %v11529_v45  ;;  %v3389_v53 = vsub.f32 %v11401_v26, %v11529_v45  ;;  %v3390_v15 = vsub.f32 %v11398_v12, %v11529_v45 }
 0x3b5   : > { %v3391_v41 = vsub.f32 %v11411_v2, %v11529_v45  ;;  %v3392_v54 = vsub.f32 %v11408_v24, %v11529_v45  ;;  %v3393_v46 = vsub.f32 %v11421_v8, %v11529_v45  ;;  %v3394_v47 = vsub.f32 %v11418_v34, %v11529_v45 }
 0x3b6   : > { %v3415_v49 = vadd.f32 1e-05, %v3382_v37  ;;  %v3395_v40 = vsub.f32 %v11431_v6, %v11529_v45  ;;  %v3396_v26 = vsub.f32 %v11428_v38, %v11529_v45  ;;  %v3397_v12 = vsub.f32 %v11441_v3, %v11529_v45 }
 0x3b7   : > { %v3398_v2 = vsub.f32 %v11438_v48, %v11529_v45  ;;  %v3399_v24 = vsub.f32 %v11451_v9, %v11529_v45  ;;  %v3400_v8 = vsub.f32 %v11448_v20, %v11529_v45  ;;  %v3401_v34 = vsub.f32 %v11461_v42, %v11529_v45 }
 0x3b8   : > { %10323 = vrsqrt.f32 %v3415_v49  ;;  %v3402_v6 = vsub.f32 %v11458_v31, %v11529_v45  ;;  %v3403_v38 = vsub.f32 %v11471_v4, %v11529_v45  ;;  %v3404_v3 = vsub.f32 %v11468_v7, %v11529_v45 }
 0x3b9   : > { %v3405_v48 = vsub.f32 %v11481_v13, %v11529_v45  ;;  %v3406_v9 = vsub.f32 %v11478_v30, %v11529_v45  ;;  %v3407_v20 = vsub.f32 %v11491_v43, %v11529_v45  ;;  %v3408_v42 = vsub.f32 %v11488_v32, %v11529_v45  ;;  %v3840_v43 = vld [vmem:[#allocation9 + $0x18] sm:$0xff] }
 0x3ba   : > { %v3409_v31 = vsub.f32 %v11501_v29, %v11529_v45  ;;  %v3410_v4 = vsub.f32 %v11498_v18, %v11529_v45  ;;  %v3411_v7 = vsub.f32 %v11511_v11, %v11529_v45  ;;  %v3412_v13 = vsub.f32 %v11508_v22, %v11529_v45 }
 0x3bb   : > { %v3414_v30 = vsub.f32 %v11518_v28, %v11529_v45  ;;  %v11597_v61 = vpack.c.bf16 %v3840_v43, %v3839_v5  ;;  %v11599_v29 = vpack.c.bf16 %v3842_v58, %v3841_v14 }
 0x3c2   : > { %v10324_v32 = vpop.eup %10323 }
 0x3c3   : > { %v3447_v57 = vmul.f32 %v10324_v32, %v3413_v10  ;;  %v3417_v18 = vmul.f32 %v10324_v32, %v3383_v55  ;;  %v3418_v23 = vmul.f32 %v10324_v32, %v3384_v52  ;;  %v3419_v44 = vmul.f32 %v10324_v32, %v3385_v35 }
 0x3c4   : > { %v3420_v11 = vmul.f32 %v10324_v32, %v3386_v51  ;;  %v3421_v60 = vmul.f32 %v10324_v32, %v3387_v25  ;;  %v3422_v56 = vmul.f32 %v10324_v32, %v3388_v50  ;;  %v3423_v22 = vmul.f32 %v10324_v32, %v3389_v53 }
 0x3c5   : > { %v3479_v17 = vmax.f32 %v3447_v57, 0.0  ;;  %v3424_v39 = vmul.f32 %v10324_v32, %v3390_v15  ;;  %v3425_v45 = vmul.f32 %v10324_v32, %v3391_v41  ;;  %v3426_v28 = vmul.f32 %v10324_v32, %v3392_v54 }
 0x3c6   : > { %v3427_v37 = vmul.f32 %v10324_v32, %v3393_v46  ;;  %v3428_v49 = vmul.f32 %v10324_v32, %v3394_v47  ;;  %v3429_v36 = vmul.f32 %v10324_v32, %v3395_v40  ;;  %v3430_v27 = vmul.f32 %v10324_v32, %v3396_v26 }
 0x3c7   : > { %3511 = vst [vmem:[#allocation2 + $0x208] sm:$0xff] %v3479_v17  ;;  %v3431_v5 = vmul.f32 %v10324_v32, %v3397_v12  ;;  %v3432_v43 = vmul.f32 %v10324_v32, %v3398_v2  ;;  %v3433_v14 = vmul.f32 %v10324_v32, %v3399_v24  ;;  %v3434_v10 = vmul.f32 %v10324_v32, %v3400_v8 }
 0x3c8   : > { %v3435_v55 = vmul.f32 %v10324_v32, %v3401_v34  ;;  %v3436_v52 = vmul.f32 %v10324_v32, %v3402_v6  ;;  %v3437_v35 = vmul.f32 %v10324_v32, %v3403_v38  ;;  %v3438_v51 = vmul.f32 %v10324_v32, %v3404_v3 }
 0x3c9   : > { %v3439_v25 = vmul.f32 %v10324_v32, %v3405_v48  ;;  %v3440_v50 = vmul.f32 %v10324_v32, %v3406_v9  ;;  %v3441_v53 = vmul.f32 %v10324_v32, %v3407_v20  ;;  %v3442_v58 = vmul.f32 %v10324_v32, %v3408_v42 }
 0x3ca   : > { %v3443_v15 = vmul.f32 %v10324_v32, %v3409_v31  ;;  %v3444_v41 = vmul.f32 %v10324_v32, %v3410_v4  ;;  %v3445_v54 = vmul.f32 %v10324_v32, %v3411_v7  ;;  %v3446_v46 = vmul.f32 %v10324_v32, %v3412_v13 }
 0x3cb   : > { %v11601_v47 = vmul.f32 %v10324_v32, %v3414_v30  ;;  %v11603_v40 = vmax.f32 %v3417_v18, 0.0  ;;  %v11605_v26 = vmax.f32 %v3418_v23, 0.0  ;;  %v11607_v12 = vmax.f32 %v3419_v44, 0.0 }
 0x3cc   : > { %v11609_v2 = vmax.f32 %v3420_v11, 0.0  ;;  %v11611_v24 = vmax.f32 %v3421_v60, 0.0  ;;  %v11613_v8 = vmax.f32 %v3422_v56, 0.0  ;;  %v11615_v34 = vmax.f32 %v3423_v22, 0.0  ;;  %v3843_v60 = vld [vmem:[#allocation9 + $0x30] sm:$0xff]  ;;  %v3844_v56 = vld [vmem:[#allocation9 + $0x38] sm:$0xff] }
 0x3cd   : > { %v11617_v6 = vmax.f32 %v3424_v39, 0.0  ;;  %v11619_v38 = vmax.f32 %v3425_v45, 0.0  ;;  %v11621_v3 = vmax.f32 %v3426_v28, 0.0  ;;  %v11623_v48 = vmax.f32 %v3427_v37, 0.0  ;;  %3481 = vst [vmem:[#allocation2 + $0x28] sm:$0xff] %v11603_v40  ;;  %3482 = vst [vmem:[#allocation2 + $0x30] sm:$0xff] %v11605_v26  ;;  %8476 = vmatprep.mubr.f32.mxu1 %v11607_v12 }
 0x3ce   : > { %3483 = vst [vmem:[#allocation2 + $0x48] sm:$0xff] %v11607_v12  ;;  %3513 = vst [vmem:[#allocation2 + $0x8] sm:$0xff] %v11607_v12  ;;  %v11630_v9 = vmax.f32 %v3428_v49, 0.0  ;;  %v11632_v20 = vmax.f32 %v3429_v36, 0.0  ;;  %v11634_v42 = vmax.f32 %v3430_v27, 0.0  ;;  %v11636_v31 = vmax.f32 %v3431_v5, 0.0  ;;  %8477 = vmatmul.mubr.f32.vlgmr.msra.gmra.mrb[0].mxu1 %v11609_v2 }
 0x3cf   : > { %3484 = vst [vmem:[#allocation2 + $0x50] sm:$0xff] %v11609_v2  ;;  %3485 = vst [vmem:[#allocation2 + $0x68] sm:$0xff] %v11611_v24  ;;  %v11644_v4 = vmax.f32 %v3432_v43, 0.0  ;;  %v11646_v36 = vmax.f32 %v3433_v14, 0.0  ;;  %v11648_v27 = vmax.f32 %v3434_v10, 0.0  ;;  %v11650_v7 = vmax.f32 %v3435_v55, 0.0  ;;  %8479 = vmatprep.mubr.f32.mxu1 %v11603_v40  ;;  %9487 = vmatpush3.bf16.msra.mxu1 %v11366_v19 }
 0x3d0   : > { %3486 = vst [vmem:[#allocation2 + $0x70] sm:$0xff] %v11613_v8  ;;  %3487 = vst [vmem:[#allocation2 + $0x88] sm:$0xff] %v11615_v34  ;;  %v3533_v13 = vld [vmem:[#allocation2 + $0x209] sm:$0x1]  ;;  %v11658_v30 = vmax.f32 %v3436_v52, 0.0  ;;  %v11660_v32 = vmax.f32 %v3437_v35, 0.0  ;;  %9489 = vmatprep.subr.bf16.mxu1 %v11597_v61  ;;  %v9496_v28 = vpack.c.bf16 %v3844_v56, %v3843_v60 }
 0x3d1   : > { %3514 = vst [vmem:[#allocation2 + $0x10] sm:$0xff] %v11609_v2  ;;  %3488 = vst [vmem:[#allocation2 + $0x90] sm:$0xff] %v11617_v6  ;;  %v11662_v57 = vmax.f32 %v3438_v51, 0.0  ;;  %v11664_v18 = vmax.f32 %v3439_v25, 0.0  ;;  %v11671_v19 = vmax.f32 %v3440_v50, 0.0  ;;  %v11673_v23 = vmax.f32 %v3441_v53, 0.0 }
 0x3d2   : > { %3489 = vst [vmem:[#allocation2 + $0xa8] sm:$0xff] %v11619_v38  ;;  %3490 = vst [vmem:[#allocation2 + $0xb0] sm:$0xff] %v11621_v3  ;;  %v11675_v44 = vmax.f32 %v3442_v58, 0.0  ;;  %v11677_v11 = vmax.f32 %v3443_v15, 0.0  ;;  %v11683_v22 = vmax.f32 %v3444_v41, 0.0  ;;  %v11685_v17 = vmax.f32 %v3445_v54, 0.0  ;;  %8480 = vmatmul.mubr.f32.gmra.mrb[2].mxu1 %v11605_v26 }
 0x3d3   : > { %3491 = vst [vmem:[#allocation2 + $0xc8] sm:$0xff] %v11623_v48  ;;  %12676 = vst [vmem:[#allocation28_spill] sm:$0xff] %v11660_v32  ;;  %v11687_v39 = vmax.f32 %v3446_v46, 0.0  ;;  %v3480_v45 = vmax.f32 %v11601_v47, 0.0  ;;  %8482 = vmatprep.mubr.f32.mxu1 %v11607_v12  ;;  %9491 = vmatpush3.bf16.msra.mxu1 %v11597_v61  ;;  %v3845_v5 = vld [vmem:[#allocation9 + $0x40] sm:$0xff]  ;;  %v3846_v43 = vld [vmem:[#allocation9 + $0x48] sm:$0xff] }
 0x3d4   : > { %12677 = vst [vmem:[#allocation29_spill] sm:$0xff] %v11662_v57  ;;  %12678 = vst [vmem:[#allocation19_spill] sm:$0xff] %v11664_v18  ;;  %9493 = vmatprep.subr.bf16.mxu1 %v11599_v29  ;;  %v3518_v49 = vld [vmem:[#allocation2 + $0x29] sm:$0x1]  ;;  %v9500_v52 = vpack.c.bf16 %v3846_v43, %v3845_v5  ;;  %v3847_v25 = vld [vmem:[#allocation9 + $0x50] sm:$0xff] }
 0x3d5   : > { %3492 = vst [vmem:[#allocation2 + $0xd0] sm:$0xff] %v11630_v9  ;;  %3493 = vst [vmem:[#allocation2 + $0xe8] sm:$0xff] %v11632_v20  ;;  %v3517_v37 = vld [vmem:[#allocation2 + $0x9] sm:$0x1]  ;;  %v3848_v50 = vld [vmem:[#allocation9 + $0x58] sm:$0xff] }
 0x3d6   : > { %3494 = vst [vmem:[#allocation2 + $0xf0] sm:$0xff] %v11634_v42  ;;  %3495 = vst [vmem:[#allocation2 + $0x108] sm:$0xff] %v11636_v31  ;;  %v3519_v61 = vld [vmem:[#allocation2 + $0x49] sm:$0x1]  ;;  %8483 = vmatmul.mubr.f32.gmra.mrb[4].mxu1 %v11609_v2  ;;  %v9504_v41 = vpack.c.bf16 %v3848_v50, %v3847_v25  ;;  %v3849_v46 = vld [vmem:[#allocation9 + $0x60] sm:$0xff] }
 0x3d7   : > { %3551 = vst [vmem:[#allocation2 + $0x207] sm:$0x1] %v3533_v13  ;;  %12679 = vst [vmem:[#allocation20_spill] sm:$0xff] %v11671_v19  ;;  %v3520_v14 = vld [vmem:[#allocation2 + $0x69] sm:$0x1]  ;;  %8485 = vmatprep.mubr.f32.mxu1 %v11611_v24  ;;  %9495 = vmatpush3.bf16.msra.mxu1 %v11599_v29 }
 0x3d8   : > { %12680 = vst [vmem:[#allocation21_spill] sm:$0xff] %v11673_v23  ;;  %12681 = vst [vmem:[#allocation22_spill] sm:$0xff] %v11675_v44  ;;  %v3521_v10 = vld [vmem:[#allocation2 + $0x89] sm:$0x1]  ;;  %9497 = vmatprep.subr.bf16.mxu1 %v9496_v28  ;;  %v3554_v5 = vld [vmem:[#allocation2 + $0x36] sm:$0x1] }
 0x3d9   : > { %12682 = vst [vmem:[#allocation23_spill] sm:$0xff] %v11677_v11  ;;  %3496 = vst [vmem:[#allocation2 + $0x110] sm:$0xff] %v11644_v4  ;;  %v3522_v55 = vld [vmem:[#allocation2 + $0xa9] sm:$0x1] }
 0x3da   : > { %3497 = vst [vmem:[#allocation2 + $0x128] sm:$0xff] %v11646_v36  ;;  %3498 = vst [vmem:[#allocation2 + $0x130] sm:$0xff] %v11648_v27  ;;  %v3523_v35 = vld [vmem:[#allocation2 + $0xc9] sm:$0x1]  ;;  %8486 = vmatmul.mubr.f32.gmra.mrb[6].mxu1 %v11613_v8 }
 0x3db   : > { %3499 = vst [vmem:[#allocation2 + $0x148] sm:$0xff] %v11650_v7  ;;  %12683 = vst [vmem:[#allocation24_spill] sm:$0xff] %v11683_v22  ;;  %8488 = vmatprep.mubr.f32.mxu1 %v11615_v34  ;;  %9499 = vmatpush3.bf16.msra.mxu1 %v9496_v28  ;;  %v3850_v47 = vld [vmem:[#allocation9 + $0x68] sm:$0xff]  ;;  %v3851_v28 = vld [vmem:[#allocation9 + $0x70] sm:$0xff] }
 0x3dc   : > { %12684 = vst [vmem:[#allocation26_spill] sm:$0xff] %v11685_v17  ;;  %12685 = vst [vmem:[#allocation27_spill] sm:$0xff] %v11687_v39  ;;  %v3524_v51 = vld [vmem:[#allocation2 + $0xe9] sm:$0x1]  ;;  %9501 = vmatprep.subr.bf16.mxu1 %v9500_v52  ;;  %v9508_v56 = vpack.c.bf16 %v3850_v47, %v3849_v46  ;;  %v3559_v25 = vld [vmem:[#allocation2 + $0xd6] sm:$0x1] }
 0x3dd   : > { %3500 = vst [vmem:[#allocation2 + $0x150] sm:$0xff] %v11658_v30  ;;  %3501 = vst [vmem:[#allocation2 + $0x168] sm:$0xff] %v11660_v32  ;;  %v3525_v53 = vld [vmem:[#allocation2 + $0x109] sm:$0x1]  ;;  %v3560_v50 = vld [vmem:[#allocation2 + $0xf6] sm:$0x1] }
 0x3de   : > { %3502 = vst [vmem:[#allocation2 + $0x170] sm:$0xff] %v11662_v57  ;;  %3503 = vst [vmem:[#allocation2 + $0x188] sm:$0xff] %v11664_v18  ;;  %8489 = vmatmul.mubr.f32.gmra.mrb[8].mxu1 %v11617_v6  ;;  %v3733_v16 = vld [vmem:[#allocation2 + $0x9] sm:$0xff] }
 0x3df   : > { %3504 = vst [vmem:[#allocation2 + $0x190] sm:$0xff] %v11671_v19  ;;  %3505 = vst [vmem:[#allocation2 + $0x1a8] sm:$0xff] %v11673_v23  ;;  %8491 = vmatprep.mubr.f32.mxu1 %v11619_v38  ;;  %9503 = vmatpush3.bf16.msra.mxu1 %v9500_v52  ;;  %v3557_v52 = vld [vmem:[#allocation2 + $0x96] sm:$0x1] }
 0x3e0   : > { %3506 = vst [vmem:[#allocation2 + $0x1b0] sm:$0xff] %v11675_v44  ;;  %3507 = vst [vmem:[#allocation2 + $0x1c8] sm:$0xff] %v11677_v11  ;;  %9505 = vmatprep.subr.bf16.mxu1 %v9504_v41 }
 0x3e1   : > { %3508 = vst [vmem:[#allocation2 + $0x1d0] sm:$0xff] %v11683_v22  ;;  %3509 = vst [vmem:[#allocation2 + $0x1e8] sm:$0xff] %v11685_v17  ;;  %v3526_v58 = vld [vmem:[#allocation2 + $0x129] sm:$0x1] }
 0x3e2   : > { %3510 = vst [vmem:[#allocation2 + $0x1f0] sm:$0xff] %v11687_v39  ;;  %3512 = vst [vmem:[#allocation2 + $0x210] sm:$0xff] %v3480_v45  ;;  %v3527_v15 = vld [vmem:[#allocation2 + $0x149] sm:$0x1]  ;;  %8492 = vmatmul.mubr.f32.gmra.mrb[10].mxu1 %v11621_v3 }
 0x3e3   : > { %3515 = vst [vmem:[#allocation2 + $0x228] sm:$0xff] %v11685_v17  ;;  %3516 = vst [vmem:[#allocation2 + $0x230] sm:$0xff] %v11687_v39  ;;  %8494 = vmatprep.mubr.f32.mxu1 %v11623_v48  ;;  %9507 = vmatpush3.bf16.msra.mxu1 %v9504_v41 }
 0x3e4   : > { %3535 = vst [vmem:[#allocation2 + $0x7] sm:$0x1] %v3517_v37  ;;  %3536 = vst [vmem:[#allocation2 + $0x27] sm:$0x1] %v3518_v49  ;;  %v3528_v29 = vld [vmem:[#allocation2 + $0x169] sm:$0x1]  ;;  %9509 = vmatprep.subr.bf16.mxu1 %v9508_v56 }
 0x3e5   : > { %3537 = vst [vmem:[#allocation2 + $0x47] sm:$0x1] %v3519_v61  ;;  %3538 = vst [vmem:[#allocation2 + $0x67] sm:$0x1] %v3520_v14  ;;  %v3529_v54 = vld [vmem:[#allocation2 + $0x189] sm:$0x1] }
 0x3e6   : > { %3539 = vst [vmem:[#allocation2 + $0x87] sm:$0x1] %v3521_v10  ;;  %3540 = vst [vmem:[#allocation2 + $0xa7] sm:$0x1] %v3522_v55  ;;  %v3530_v13 = vld [vmem:[#allocation2 + $0x1a9] sm:$0x1]  ;;  %8495 = vmatmul.mubr.f32.gmra.mrb[12].mxu1 %v11630_v9 }
 0x3e7   : > { %3541 = vst [vmem:[#allocation2 + $0xc7] sm:$0x1] %v3523_v35  ;;  %3542 = vst [vmem:[#allocation2 + $0xe7] sm:$0x1] %v3524_v51  ;;  %v3531_v60 = vld [vmem:[#allocation2 + $0x1c9] sm:$0x1]  ;;  %8497 = vmatprep.mubr.f32.mxu1 %v11632_v20  ;;  %9511 = vmatpush3.bf16.msra.mxu1 %v9508_v56 }
 0x3e8   : > { %3543 = vst [vmem:[#allocation2 + $0x107] sm:$0x1] %v3525_v53  ;;  %3544 = vst [vmem:[#allocation2 + $0x127] sm:$0x1] %v3526_v58  ;;  %v3532_v45 = vld [vmem:[#allocation2 + $0x1e9] sm:$0x1] }
 0x3e9   : > { %3545 = vst [vmem:[#allocation2 + $0x147] sm:$0x1] %v3527_v15  ;;  %3546 = vst [vmem:[#allocation2 + $0x167] sm:$0x1] %v3528_v29  ;;  %v3852_v37 = vld [vmem:[#allocation9 + $0x78] sm:$0xff]  ;;  %v4385_v14 = vld [vmem:[#allocation9 + $0x100] sm:$0xff] }
 0x3ea   : > { %3547 = vst [vmem:[#allocation2 + $0x187] sm:$0x1] %v3529_v54  ;;  %3548 = vst [vmem:[#allocation2 + $0x1a7] sm:$0x1] %v3530_v13  ;;  %v3553_v49 = vld [vmem:[#allocation2 + $0x16] sm:$0x1]  ;;  %v9512_v43 = vpack.c.bf16 %v3852_v37, %v3851_v28  ;;  %8498 = vmatmul.mubr.f32.gmra.mrb[14].mxu1 %v11634_v42 }
 0x3eb   : > { %3549 = vst [vmem:[#allocation2 + $0x1c7] sm:$0x1] %v3531_v60  ;;  %3550 = vst [vmem:[#allocation2 + $0x1e7] sm:$0x1] %v3532_v45  ;;  %v3555_v61 = vld [vmem:[#allocation2 + $0x56] sm:$0x1]  ;;  %8500 = vmatprep.mubr.f32.mxu1 %v11636_v31 }
 0x3ec   : > { %3571 = vst [vmem:[#allocation2 + $0x18] sm:$0x1] %v3553_v49  ;;  %3572 = vst [vmem:[#allocation2 + $0x38] sm:$0x1] %v3554_v5  ;;  %v4386_v10 = vld [vmem:[#allocation9 + $0x108] sm:$0xff]  ;;  %9513 = vmatprep.subr.bf16.mxu1 %v9512_v43  ;;  %v4387_v45 = vld [vmem:[#allocation9 + $0x110] sm:$0xff] }
 0x3ed   : > { %3573 = vst [vmem:[#allocation2 + $0x58] sm:$0x1] %v3555_v61  ;;  %v3556_v55 = vld [vmem:[#allocation2 + $0x76] sm:$0x1]  ;;  %v9516_v35 = vpack.c.bf16 %v4386_v10, %v4385_v14  ;;  %3575 = vst [vmem:[#allocation2 + $0x98] sm:$0x1] %v3557_v52  ;;  %9515 = vmatpush3.bf16.msra.mxu1 %v9512_v43 }
 0x3ee   : > { %3574 = vst [vmem:[#allocation2 + $0x78] sm:$0x1] %v3556_v55  ;;  %v3558_v51 = vld [vmem:[#allocation2 + $0xb6] sm:$0x1]  ;;  %3577 = vst [vmem:[#allocation2 + $0xd8] sm:$0x1] %v3559_v25  ;;  %8501 = vmatmul.mubr.f32.gmra.mrb[16].mxu1 %v11644_v4 }
 0x3ef   : > { %3576 = vst [vmem:[#allocation2 + $0xb8] sm:$0x1] %v3558_v51  ;;  %9517 = vmatprep.subr.bf16.mxu1 %v9516_v35  ;;  %3578 = vst [vmem:[#allocation2 + $0xf8] sm:$0x1] %v3560_v50  ;;  %v3561_v53 = vld [vmem:[#allocation2 + $0x116] sm:$0x1]  ;;  %8503 = vmatprep.mubr.f32.mxu1 %v11646_v36 }
 0x3f0   : > { %3579 = vst [vmem:[#allocation2 + $0x118] sm:$0x1] %v3561_v53  ;;  %v3562_v58 = vld [vmem:[#allocation2 + $0x136] sm:$0x1]  ;;  %v3534_v60 = vld [vmem:[#allocation2 + $0x229] sm:$0x1] }
 0x3f1   : > { %3580 = vst [vmem:[#allocation2 + $0x138] sm:$0x1] %v3562_v58  ;;  %v3563_v15 = vld [vmem:[#allocation2 + $0x156] sm:$0x1]  ;;  %3552 = vst [vmem:[#allocation2 + $0x227] sm:$0x1] %v3534_v60 }
 0x3f2   : > { %3581 = vst [vmem:[#allocation2 + $0x158] sm:$0x1] %v3563_v15  ;;  %v3564_v29 = vld [vmem:[#allocation2 + $0x176] sm:$0x1]  ;;  %8504 = vmatmul.mubr.f32.gmra.mrb[18].mxu1 %v11648_v27  ;;  %v4388_v28 = vld [vmem:[#allocation9 + $0x118] sm:$0xff]  ;;  %v3589_v37 = vld [vmem:[#allocation2 + $0x7] sm:$0xff] }
 0x3f3   : > { %v3565_v41 = vld [vmem:[#allocation2 + $0x196] sm:$0x1]  ;;  %3582 = vst [vmem:[#allocation2 + $0x178] sm:$0x1] %v3564_v29  ;;  %8506 = vmatprep.mubr.f32.mxu1 %v11650_v7  ;;  %v9520_v49 = vpack.c.bf16 %v4388_v28, %v4387_v45  ;;  %v4389_v43 = vld [vmem:[#allocation9 + $0x120] sm:$0xff]  ;;  %v4390_v61 = vld [vmem:[#allocation9 + $0x128] sm:$0xff] }
 0x3f4   : > { %3583 = vst [vmem:[#allocation2 + $0x198] sm:$0x1] %v3565_v41  ;;  %v3566_v54 = vld [vmem:[#allocation2 + $0x1b6] sm:$0x1]  ;;  %v11735_v14 = vld [vmem:[#allocation2 + $0x27] sm:$0xff]  ;;  %v9524_v10 = vpack.c.bf16 %v4390_v61, %v4389_v43  ;;  %v4392_v51 = vld [vmem:[#allocation9 + $0x138] sm:$0xff] }
 0x3f5   : > { %v3567_v46 = vld [vmem:[#allocation2 + $0x1d6] sm:$0x1]  ;;  %3584 = vst [vmem:[#allocation2 + $0x1b8] sm:$0x1] %v3566_v54  ;;  %v11741_v25 = vld [vmem:[#allocation2 + $0x47] sm:$0xff]  ;;  %v4400_v43 = vld [vmem:[#allocation9 + $0x178] sm:$0xff] }
 0x3f6   : > { %3585 = vst [vmem:[#allocation2 + $0x1d8] sm:$0x1] %v3567_v46  ;;  %v3568_v47 = vld [vmem:[#allocation2 + $0x1f6] sm:$0x1]  ;;  %8507 = vmatmul.mubr.f32.gmra.mrb[20].mxu1 %v11658_v30  ;;  %v4393_v58 = vld [vmem:[#allocation9 + $0x140] sm:$0xff]  ;;  %v4394_v15 = vld [vmem:[#allocation9 + $0x148] sm:$0xff] }
 0x3f7   : > { %3586 = vst [vmem:[#allocation2 + $0x1f8] sm:$0x1] %v3568_v47  ;;  %v3569_v13 = vld [vmem:[#allocation2 + $0x216] sm:$0x1]  ;;  %8509 = vmatprep.mubr.f32.mxu1 %v11660_v32  ;;  %v9532_v29 = vpack.c.bf16 %v4394_v15, %v4393_v58  ;;  %v4396_v46 = vld [vmem:[#allocation9 + $0x158] sm:$0xff]  ;;  %v11753_v47 = vld [vmem:[#allocation2 + $0x87] sm:$0xff] }
 0x3f8   : > { %3587 = vst [vmem:[#allocation2 + $0x218] sm:$0x1] %v3569_v13  ;;  %v3570_v56 = vld [vmem:[#allocation2 + $0x236] sm:$0x1]  ;;  %v4398_v45 = vld [vmem:[#allocation9 + $0x168] sm:$0xff] }
 0x3f9   : > { %3588 = vst [vmem:[#allocation2 + $0x238] sm:$0x1] %v3570_v56  ;;  %v3590_v5 = vld [vmem:[#allocation2 + $0xf] sm:$0xff]  ;;  %v4397_v56 = vld [vmem:[#allocation9 + $0x160] sm:$0xff] }
 0x3fa   : > { %8510 = vmatmul.mubr.f32.gmra.mrb[22].mxu1 %v11662_v57  ;;  %v11738_v55 = vld [vmem:[#allocation2 + $0x2f] sm:$0xff]  ;;  %v11759_v28 = vld [vmem:[#allocation2 + $0xa7] sm:$0xff]  ;;  %v4698_v57 = vld [vmem:[#allocation9 + $0x1b8] sm:$0xff] }
 0x3fb   : > { %8512 = vmatprep.mubr.f32.mxu1 %v11664_v18  ;;  %v4391_v52 = vld [vmem:[#allocation9 + $0x130] sm:$0xff]  ;;  %v11765_v61 = vld [vmem:[#allocation2 + $0xc7] sm:$0xff] }
 0x3fc   : > { %v9528_v50 = vpack.c.bf16 %v4392_v51, %v4391_v52  ;;  %v11744_v53 = vld [vmem:[#allocation2 + $0x4f] sm:$0xff]  ;;  %v4691_v51 = vld [vmem:[#allocation9 + $0x180] sm:$0xff] }
 0x3fd   : > { %v11750_v41 = vld [vmem:[#allocation2 + $0x6f] sm:$0xff]  ;;  %v11771_v58 = vld [vmem:[#allocation2 + $0xe7] sm:$0xff] }
 0x3fe   : > { %8513 = vmatmul.mubr.f32.gmra.mrb[24].mxu1 %v11671_v19  ;;  %v4395_v54 = vld [vmem:[#allocation9 + $0x150] sm:$0xff]  ;;  %v11813_v0 = vld [vmem:[#allocation2 + $0x1c7] sm:$0xff] }
 0x3ff   : > { %8515 = vmatprep.mubr.f32.mxu1 %v11673_v23  ;;  %v9536_v13 = vpack.c.bf16 %v4396_v46, %v4395_v54  ;;  %v11756_v60 = vld [vmem:[#allocation2 + $0x8f] sm:$0xff]  ;;  %v11777_v54 = vld [vmem:[#allocation2 + $0x107] sm:$0xff] }
 0x400   : > { %v11768_v52 = vld [vmem:[#allocation2 + $0xcf] sm:$0xff]  ;;  %v11819_v63 = vld [vmem:[#allocation2 + $0x1e7] sm:$0xff] }
 0x401   : > { %v11780_v46 = vld [vmem:[#allocation2 + $0x10f] sm:$0xff] }
 0x402   : > { %8516 = vmatmul.mubr.f32.gmra.mrb[26].mxu1 %v11675_v44  ;;  %v11810_v1 = vld [vmem:[#allocation2 + $0x1af] sm:$0xff] }
 0x403   : > { %8518 = vmatprep.mubr.f32.mxu1 %v11677_v11  ;;  %v11816_v33 = vld [vmem:[#allocation2 + $0x1cf] sm:$0xff] }
 0x404   : > { %v11822_v21 = vld [vmem:[#allocation2 + $0x1ef] sm:$0xff] }
 0x405   : > { %v4696_v11 = vld [vmem:[#allocation9 + $0x1a8] sm:$0xff]  ;;  %v11828_v19 = vld [vmem:[#allocation2 + $0x31] sm:$0xff] }
 0x406   : > { %8519 = vmatmul.mubr.f32.gmra.mrb[28].mxu1 %v11683_v22  ;;  %v4695_v22 = vld [vmem:[#allocation9 + $0x1a0] sm:$0xff]  ;;  %v11825_v44 = vld [vmem:[#allocation2 + $0x29] sm:$0xff]  ;;  %12686 = vst [vmem:[#allocation18_spill] sm:$0xff] %v11828_v19 }
 0x407   : > { %8521 = vmatprep.mubr.f32.mxu1 %v11685_v17  ;;  %v3734_v17 = vld [vmem:[#allocation2 + $0x11] sm:$0xff]  ;;  %v9556_v23 = vpack.c.bf16 %v4696_v11, %v4695_v22  ;;  %v11831_v32 = vld [vmem:[#allocation2 + $0x49] sm:$0xff] }
 0x408   : > { %v4697_v18 = vld [vmem:[#allocation9 + $0x1b0] sm:$0xff]  ;;  %12687 = vst [vmem:[#allocation25_spill] sm:$0xff] %v11831_v32 }
 0x409   : > { %v11837_v11 = vld [vmem:[#allocation2 + $0x69] sm:$0xff] }
 0x40a   : > { %8522 = vmatmul.mubr.f32.gmra.mrb[30].mxu1 %v11687_v39  ;;  %v9552_v39 = vpack.c.bf16 %v4694_v59, %v4693_v62  ;;  %v11834_v59 = vld [vmem:[#allocation2 + $0x51] sm:$0xff]  ;;  %v4699_v62 = vld [vmem:[#allocation9 + $0x1c0] sm:$0xff]  ;;  %12689 = vst [vmem:[#allocation59_spill] sm:$0xff] %v11837_v11 }
 0x40b   : > { %8556 = vmatprep.mubr.f32.mxu1 %v3589_v37  ;;  %v9540_v37 = vpack.c.bf16 %v4398_v45, %v4397_v56  ;;  %v11786_v56 = vld [vmem:[#allocation2 + $0x12f] sm:$0xff]  ;;  %v11789_v45 = vld [vmem:[#allocation2 + $0x147] sm:$0xff]  ;;  %12688 = vst [vmem:[#allocation58_spill] sm:$0xff] %v11834_v59 }
 0x40e   : > { %8557 = vmatmul.mubr.f32.vlgmr.msra.gmra.mrb[0].mxu1 %v3590_v5  ;;  %v4399_v5 = vld [vmem:[#allocation9 + $0x170] sm:$0xff] }
 0x40f   : > { %8559 = vmatprep.mubr.f32.mxu1 %v11735_v14  ;;  %9519 = vmatpush3.bf16.msra.mxu1 %v9516_v35  ;;  %v11747_v35 = vld [vmem:[#allocation2 + $0x67] sm:$0xff] }
 0x410   : > { %9521 = vmatprep.subr.bf16.mxu1 %v9520_v49 }
 0x412   : > { %8560 = vmatmul.mubr.f32.gmra.mrb[2].mxu1 %v11738_v55 }
 0x413   : > { %8562 = vmatprep.mubr.f32.mxu1 %v11741_v25  ;;  %9523 = vmatpush3.bf16.msra.mxu1 %v9520_v49  ;;  %v11762_v49 = vld [vmem:[#allocation2 + $0xaf] sm:$0xff] }
 0x414   : > { %9525 = vmatprep.subr.bf16.mxu1 %v9524_v10 }
 0x416   : > { %8563 = vmatmul.mubr.f32.gmra.mrb[4].mxu1 %v11744_v53 }
 0x417   : > { %8565 = vmatprep.mubr.f32.mxu1 %v11747_v35  ;;  %9527 = vmatpush3.bf16.msra.mxu1 %v9524_v10  ;;  %v9544_v10 = vpack.c.bf16 %v4400_v43, %v4399_v5  ;;  %v11795_v5 = vld [vmem:[#allocation2 + $0x167] sm:$0xff]  ;;  %v11798_v43 = vld [vmem:[#allocation2 + $0x16f] sm:$0xff] }
 0x418   : > { %9529 = vmatprep.subr.bf16.mxu1 %v9528_v50 }
 0x41a   : > { %8566 = vmatmul.mubr.f32.gmra.mrb[6].mxu1 %v11750_v41 }
 0x41b   : > { %8568 = vmatprep.mubr.f32.mxu1 %v11753_v47  ;;  %9531 = vmatpush3.bf16.msra.mxu1 %v9528_v50  ;;  %v4692_v50 = vld [vmem:[#allocation9 + $0x188] sm:$0xff] }
 0x41c   : > { %9533 = vmatprep.subr.bf16.mxu1 %v9532_v29  ;;  %v9548_v15 = vpack.c.bf16 %v4692_v50, %v4691_v51  ;;  %v11804_v51 = vld [vmem:[#allocation2 + $0x18f] sm:$0xff]  ;;  %v11807_v50 = vld [vmem:[#allocation2 + $0x1a7] sm:$0xff] }
 0x41e   : > { %8569 = vmatmul.mubr.f32.gmra.mrb[8].mxu1 %v11756_v60 }
 0x41f   : > { %8571 = vmatprep.mubr.f32.mxu1 %v11759_v28  ;;  %9535 = vmatpush3.bf16.msra.mxu1 %v9532_v29  ;;  %v11774_v29 = vld [vmem:[#allocation2 + $0xef] sm:$0xff] }
 0x420   : > { %9537 = vmatprep.subr.bf16.mxu1 %v9536_v13 }
 0x422   : > { %8572 = vmatmul.mubr.f32.gmra.mrb[10].mxu1 %v11762_v49 }
 0x423   : > { %8574 = vmatprep.mubr.f32.mxu1 %v11765_v61  ;;  %9539 = vmatpush3.bf16.msra.mxu1 %v9536_v13  ;;  %v11783_v13 = vld [vmem:[#allocation2 + $0x127] sm:$0xff] }
 0x424   : > { %9541 = vmatprep.subr.bf16.mxu1 %v9540_v37 }
 0x426   : > { %8575 = vmatmul.mubr.f32.gmra.mrb[12].mxu1 %v11768_v52 }
 0x427   : > { %8577 = vmatprep.mubr.f32.mxu1 %v11771_v58  ;;  %9543 = vmatpush3.bf16.msra.mxu1 %v9540_v37  ;;  %v11792_v37 = vld [vmem:[#allocation2 + $0x14f] sm:$0xff] }
 0x428   : > { %9545 = vmatprep.subr.bf16.mxu1 %v9544_v10 }
 0x42a   : > { %8578 = vmatmul.mubr.f32.gmra.mrb[14].mxu1 %v11774_v29 }
 0x42b   : > { %8580 = vmatprep.mubr.f32.mxu1 %v11777_v54  ;;  %9547 = vmatpush3.bf16.msra.mxu1 %v9544_v10  ;;  %v11801_v10 = vld [vmem:[#allocation2 + $0x187] sm:$0xff] }
 0x42c   : > { %9549 = vmatprep.subr.bf16.mxu1 %v9548_v15 }
 0x42e   : > { %8581 = vmatmul.mubr.f32.gmra.mrb[16].mxu1 %v11780_v46 }
 0x42f   : > { %8583 = vmatprep.mubr.f32.mxu1 %v11783_v13 }
 0x432   : > { %8584 = vmatmul.mubr.f32.gmra.mrb[18].mxu1 %v11786_v56 }
 0x433   : > { %8586 = vmatprep.mubr.f32.mxu1 %v11789_v45 }
 0x436   : > { %8587 = vmatmul.mubr.f32.gmra.mrb[20].mxu1 %v11792_v37 }
 0x437   : > { %8589 = vmatprep.mubr.f32.mxu1 %v11795_v5 }
 0x43a   : > { %8590 = vmatmul.mubr.f32.gmra.mrb[22].mxu1 %v11798_v43 }
 0x43b   : > { %8592 = vmatprep.mubr.f32.mxu1 %v11801_v10 }
 0x43e   : > { %8593 = vmatmul.mubr.f32.gmra.mrb[24].mxu1 %v11804_v51 }
 0x43f   : > { %8595 = vmatprep.mubr.f32.mxu1 %v11807_v50 }
 0x442   : > { %8596 = vmatmul.mubr.f32.gmra.mrb[26].mxu1 %v11810_v1 }
 0x443   : > { %8598 = vmatprep.mubr.f32.mxu1 %v11813_v0 }
 0x446   : > { %8599 = vmatmul.mubr.f32.gmra.mrb[28].mxu1 %v11816_v33 }
 0x447   : > { %8601 = vmatprep.mubr.f32.mxu1 %v11819_v63 }
 0x44a   : > { %8602 = vmatmul.mubr.f32.gmra.mrb[30].mxu1 %v11822_v21 }
 0x44b   : > { %8636 = vmatprep.mubr.f32.mxu1 %v3733_v16  ;;  %v9560_v16 = vpack.c.bf16 %v4698_v57, %v4697_v18  ;;  %v11843_v57 = vld [vmem:[#allocation2 + $0x89] sm:$0xff] }
 0x44c   : > { %12691 = vst [vmem:[#allocation61_spill] sm:$0xff] %v11843_v57 }
 0x44e   : > { %8637 = vmatmul.mubr.f32.vlgmr.msra.gmra.mrb[0].mxu1 %v3734_v17  ;;  %v4700_v17 = vld [vmem:[#allocation9 + $0x1c8] sm:$0xff] }
 0x44f   : > { %8639 = vmatprep.mubr.f32.mxu1 %v11825_v44  ;;  %9551 = vmatpush3.bf16.msra.mxu1 %v9548_v15  ;;  %v9564_v22 = vpack.c.bf16 %v4700_v17, %v4699_v62  ;;  %v11840_v15 = vld [vmem:[#allocation2 + $0x71] sm:$0xff] }
 0x450   : > { %9553 = vmatprep.subr.bf16.mxu1 %v9552_v39  ;;  %12690 = vst [vmem:[#allocation60_spill] sm:$0xff] %v11840_v15  ;;  %v11852_v17 = vld [vmem:[#allocation2 + $0xb1] sm:$0xff] }
 0x452   : > { %8640 = vmatmul.mubr.f32.gmra.mrb[2].mxu1 %v11828_v19  ;;  %v4701_v19 = vld [vmem:[#allocation9 + $0x1d0] sm:$0xff] }
 0x453   : > { %8642 = vmatprep.mubr.f32.mxu1 %v11831_v32  ;;  %9555 = vmatpush3.bf16.msra.mxu1 %v9552_v39  ;;  %v4702_v32 = vld [vmem:[#allocation9 + $0x1d8] sm:$0xff] }
 0x454   : > { %9557 = vmatprep.subr.bf16.mxu1 %v9556_v23  ;;  %v9568_v18 = vpack.c.bf16 %v4702_v32, %v4701_v19  ;;  %v11846_v39 = vld [vmem:[#allocation2 + $0x91] sm:$0xff]  ;;  %v11855_v32 = vld [vmem:[#allocation2 + $0xc9] sm:$0xff] }
 0x455   : > { %12692 = vst [vmem:[#allocation62_spill] sm:$0xff] %v11846_v39 }
 0x456   : > { %8643 = vmatmul.mubr.f32.gmra.mrb[4].mxu1 %v11834_v59  ;;  %v4703_v59 = vld [vmem:[#allocation9 + $0x1e0] sm:$0xff] }
 0x457   : > { %8645 = vmatprep.mubr.f32.mxu1 %v11837_v11  ;;  %9559 = vmatpush3.bf16.msra.mxu1 %v9556_v23  ;;  %v4704_v11 = vld [vmem:[#allocation9 + $0x1e8] sm:$0xff] }
 0x458   : > { %9561 = vmatprep.subr.bf16.mxu1 %v9560_v16  ;;  %v11849_v23 = vld [vmem:[#allocation2 + $0xa9] sm:$0xff]  ;;  %v9572_v62 = vpack.c.bf16 %v4704_v11, %v4703_v59 }
 0x459   : > { %12693 = vst [vmem:[#allocation63_spill] sm:$0xff] %v11849_v23  ;;  %v11861_v59 = vld [vmem:[#allocation2 + $0xe9] sm:$0xff] }
 0x45a   : > { %8646 = vmatmul.mubr.f32.gmra.mrb[6].mxu1 %v11840_v15  ;;  %v4705_v15 = vld [vmem:[#allocation9 + $0x1f0] sm:$0xff]  ;;  %12694 = vst [vmem:[#allocation64_spill] sm:$0xff] %v11861_v59 }
 0x45b   : > { %8648 = vmatprep.mubr.f32.mxu1 %v11843_v57  ;;  %9563 = vmatpush3.bf16.msra.mxu1 %v9560_v16  ;;  %v4706_v57 = vld [vmem:[#allocation9 + $0x1f8] sm:$0xff] }
 0x45c   : > { %9565 = vmatprep.subr.bf16.mxu1 %v9564_v22  ;;  %v9576_v19 = vpack.c.bf16 %v4706_v57, %v4705_v15  ;;  %v11858_v16 = vld [vmem:[#allocation2 + $0xd1] sm:$0xff]  ;;  %v11873_v57 = vld [vmem:[#allocation2 + $0x129] sm:$0xff] }
 0x45d   : > { %v11870_v15 = vld [vmem:[#allocation2 + $0x111] sm:$0xff]  ;;  %12698 = vst [vmem:[#allocation68_spill] sm:$0xff] %v11873_v57 }
 0x45e   : > { %8649 = vmatmul.mubr.f32.gmra.mrb[8].mxu1 %v11846_v39  ;;  %v4997_v39 = vld [vmem:[#allocation9 + $0x200] sm:$0xff]  ;;  %12697 = vst [vmem:[#allocation67_spill] sm:$0xff] %v11870_v15 }
 0x45f   : > { %8651 = vmatprep.mubr.f32.mxu1 %v11849_v23  ;;  %9567 = vmatpush3.bf16.msra.mxu1 %v9564_v22  ;;  %v4998_v23 = vld [vmem:[#allocation9 + $0x208] sm:$0xff]  ;;  %v11864_v22 = vld [vmem:[#allocation2 + $0xf1] sm:$0xff] }
 0x460   : > { %9569 = vmatprep.subr.bf16.mxu1 %v9568_v18  ;;  %v9580_v11 = vpack.c.bf16 %v4998_v23, %v4997_v39  ;;  %12695 = vst [vmem:[#allocation65_spill] sm:$0xff] %v11864_v22  ;;  %v11879_v39 = vld [vmem:[#allocation2 + $0x149] sm:$0xff]  ;;  %v11882_v23 = vld [vmem:[#allocation2 + $0x151] sm:$0xff] }
 0x461   : > { %12700 = vst [vmem:[#allocation70_spill] sm:$0xff] %v11879_v39  ;;  %12701 = vst [vmem:[#allocation71_spill] sm:$0xff] %v11882_v23 }
 0x462   : > { %8652 = vmatmul.mubr.f32.gmra.mrb[10].mxu1 %v11852_v17 }
 0x463   : > { %8654 = vmatprep.mubr.f32.mxu1 %v11855_v32  ;;  %9571 = vmatpush3.bf16.msra.mxu1 %v9568_v18  ;;  %v11867_v18 = vld [vmem:[#allocation2 + $0x109] sm:$0xff] }
 0x464   : > { %9573 = vmatprep.subr.bf16.mxu1 %v9572_v62  ;;  %12696 = vst [vmem:[#allocation66_spill] sm:$0xff] %v11867_v18 }
 0x466   : > { %8655 = vmatmul.mubr.f32.gmra.mrb[12].mxu1 %v11858_v16 }
 0x467   : > { %8657 = vmatprep.mubr.f32.mxu1 %v11861_v59  ;;  %9575 = vmatpush3.bf16.msra.mxu1 %v9572_v62  ;;  %v11876_v62 = vld [vmem:[#allocation2 + $0x131] sm:$0xff]  ;;  %v5002_v59 = vld [vmem:[#allocation9 + $0x228] sm:$0xff] }
 0x468   : > { %9577 = vmatprep.subr.bf16.mxu1 %v9576_v19  ;;  %12699 = vst [vmem:[#allocation69_spill] sm:$0xff] %v11876_v62 }
 0x46a   : > { %8658 = vmatmul.mubr.f32.gmra.mrb[14].mxu1 %v11864_v22  ;;  %v5001_v22 = vld [vmem:[#allocation9 + $0x220] sm:$0xff] }
 0x46b   : > { %8660 = vmatprep.mubr.f32.mxu1 %v11867_v18  ;;  %9579 = vmatpush3.bf16.msra.mxu1 %v9576_v19  ;;  %v11885_v19 = vld [vmem:[#allocation2 + $0x169] sm:$0xff] }
 0x46c   : > { %9581 = vmatprep.subr.bf16.mxu1 %v9580_v11  ;;  %12702 = vst [vmem:[#allocation72_spill] sm:$0xff] %v11885_v19  ;;  %v4999_v18 = vld [vmem:[#allocation9 + $0x210] sm:$0xff] }
 0x46e   : > { %8661 = vmatmul.mubr.f32.gmra.mrb[16].mxu1 %v11870_v15  ;;  %v11888_v15 = vld [vmem:[#allocation2 + $0x171] sm:$0xff] }
 0x46f   : > { %8663 = vmatprep.mubr.f32.mxu1 %v11873_v57  ;;  %12703 = vst [vmem:[#allocation73_spill] sm:$0xff] %v11888_v15  ;;  %v11891_v57 = vld [vmem:[#allocation2 + $0x189] sm:$0xff] }
 0x470   : > { %12704 = vst [vmem:[#allocation74_spill] sm:$0xff] %v11891_v57 }
 0x472   : > { %8664 = vmatmul.mubr.f32.gmra.mrb[18].mxu1 %v11876_v62  ;;  %v11894_v62 = vld [vmem:[#allocation2 + $0x191] sm:$0xff] }
 0x473   : > { %8666 = vmatprep.mubr.f32.mxu1 %v11879_v39  ;;  %12705 = vst [vmem:[#allocation75_spill] sm:$0xff] %v11894_v62  ;;  %v11897_v39 = vld [vmem:[#allocation2 + $0x1a9] sm:$0xff] }
 0x474   : > { %12706 = vst [vmem:[#allocation76_spill] sm:$0xff] %v11897_v39 }
 0x476   : > { %8667 = vmatmul.mubr.f32.gmra.mrb[20].mxu1 %v11882_v23  ;;  %v11900_v23 = vld [vmem:[#allocation2 + $0x1b1] sm:$0xff] }
 0x477   : > { %8669 = vmatprep.mubr.f32.mxu1 %v11885_v19  ;;  %12707 = vst [vmem:[#allocation77_spill] sm:$0xff] %v11900_v23  ;;  %v11903_v19 = vld [vmem:[#allocation2 + $0x1c9] sm:$0xff] }
 0x478   : > { %12708 = vst [vmem:[#allocation78_spill] sm:$0xff] %v11903_v19 }
 0x47a   : > { %8670 = vmatmul.mubr.f32.gmra.mrb[22].mxu1 %v11888_v15  ;;  %v11906_v15 = vld [vmem:[#allocation2 + $0x1d1] sm:$0xff] }
 0x47b   : > { %8672 = vmatprep.mubr.f32.mxu1 %v11891_v57  ;;  %12709 = vst [vmem:[#allocation79_spill] sm:$0xff] %v11906_v15  ;;  %v11909_v57 = vld [vmem:[#allocation2 + $0x1e9] sm:$0xff] }
 0x47c   : > { %12710 = vst [vmem:[#allocation80_spill] sm:$0xff] %v11909_v57 }
 0x47e   : > { %8673 = vmatmul.mubr.f32.gmra.mrb[24].mxu1 %v11894_v62  ;;  %v11912_v62 = vld [vmem:[#allocation2 + $0x1f1] sm:$0xff] }
 0x47f   : > { %8675 = vmatprep.mubr.f32.mxu1 %v11897_v39  ;;  %12711 = vst [vmem:[#allocation81_spill] sm:$0xff] %v11912_v62  ;;  %v5000_v39 = vld [vmem:[#allocation9 + $0x218] sm:$0xff] }
 0x482   : > { %8676 = vmatmul.mubr.f32.gmra.mrb[26].mxu1 %v11900_v23  ;;  %v9584_v23 = vpack.c.bf16 %v5000_v39, %v4999_v18  ;;  %v5006_v18 = vld [vmem:[#allocation9 + $0x248] sm:$0xff]  ;;  %v5009_v39 = vld [vmem:[#allocation9 + $0x260] sm:$0xff] }
 0x483   : > { %8678 = vmatprep.mubr.f32.mxu1 %v11903_v19  ;;  %v5003_v19 = vld [vmem:[#allocation9 + $0x230] sm:$0xff] }
 0x486   : > { %8679 = vmatmul.mubr.f32.gmra.mrb[28].mxu1 %v11906_v15  ;;  %v9588_v15 = vpack.c.bf16 %v5002_v59, %v5001_v22  ;;  %v5008_v59 = vld [vmem:[#allocation9 + $0x258] sm:$0xff] }
 0x487   : > { %8681 = vmatprep.mubr.f32.mxu1 %v11909_v57  ;;  %v5004_v57 = vld [vmem:[#allocation9 + $0x238] sm:$0xff] }
 0x48a   : > { %8682 = vmatmul.mubr.f32.gmra.mrb[30].mxu1 %v11912_v62  ;;  %v9592_v62 = vpack.c.bf16 %v5004_v57, %v5003_v19  ;;  %v5010_v57 = vld [vmem:[#allocation9 + $0x268] sm:$0xff]  ;;  %v5012_v19 = vld [vmem:[#allocation9 + $0x278] sm:$0xff] }
 0x48b   : > { %8716 = vmatprep.mubr.f32.mxu1 %v11735_v14  ;;  %v5005_v14 = vld [vmem:[#allocation9 + $0x240] sm:$0xff] }
 0x48e   : > { %8717 = vmatmul.mubr.f32.vlgmr.msra.gmra.mrb[0].mxu1 %v11738_v55  ;;  %v9596_v55 = vpack.c.bf16 %v5006_v18, %v5005_v14  ;;  %v5303_v14 = vld [vmem:[#allocation9 + $0x280] sm:$0xff]  ;;  %v5304_v18 = vld [vmem:[#allocation9 + $0x288] sm:$0xff] }
 0x48f   : > { %8719 = vmatprep.mubr.f32.mxu1 %v11741_v25  ;;  %9583 = vmatpush3.bf16.msra.mxu1 %v9580_v11  ;;  %v5007_v11 = vld [vmem:[#allocation9 + $0x250] sm:$0xff] }
 0x490   : > { %9585 = vmatprep.subr.bf16.mxu1 %v9584_v23  ;;  %v9600_v22 = vpack.c.bf16 %v5008_v59, %v5007_v11  ;;  %v11945_v11 = vld [vmem:[#allocation2 + $0x207] sm:$0xff]  ;;  %v11948_v59 = vld [vmem:[#allocation2 + $0x20f] sm:$0xff] }
 0x492   : > { %8720 = vmatmul.mubr.f32.gmra.mrb[2].mxu1 %v11744_v53 }
 0x493   : > { %8722 = vmatprep.mubr.f32.mxu1 %v11747_v35  ;;  %9587 = vmatpush3.bf16.msra.mxu1 %v9584_v23  ;;  %v5011_v23 = vld [vmem:[#allocation9 + $0x270] sm:$0xff] }
 0x494   : > { %9589 = vmatprep.subr.bf16.mxu1 %v9588_v15 }
 0x496   : > { %8723 = vmatmul.mubr.f32.gmra.mrb[4].mxu1 %v11750_v41 }
 0x497   : > { %8725 = vmatprep.mubr.f32.mxu1 %v11753_v47  ;;  %9591 = vmatpush3.bf16.msra.mxu1 %v9588_v15  ;;  %v9604_v15 = vpack.c.bf16 %v5010_v57, %v5009_v39  ;;  %v5306_v39 = vld [vmem:[#allocation9 + $0x298] sm:$0xff] }
 0x498   : > { %9593 = vmatprep.subr.bf16.mxu1 %v9592_v62 }
 0x49a   : > { %8726 = vmatmul.mubr.f32.gmra.mrb[6].mxu1 %v11756_v60 }
 0x49b   : > { %8728 = vmatprep.mubr.f32.mxu1 %v11759_v28  ;;  %9595 = vmatpush3.bf16.msra.mxu1 %v9592_v62  ;;  %v9608_v62 = vpack.c.bf16 %v5012_v19, %v5011_v23  ;;  %v5308_v23 = vld [vmem:[#allocation9 + $0x2a8] sm:$0xff] }
 0x49c   : > { %9597 = vmatprep.subr.bf16.mxu1 %v9596_v55 }
 0x49e   : > { %8729 = vmatmul.mubr.f32.gmra.mrb[8].mxu1 %v11762_v49 }
 0x49f   : > { %8731 = vmatprep.mubr.f32.mxu1 %v11765_v61  ;;  %9599 = vmatpush3.bf16.msra.mxu1 %v9596_v55  ;;  %v9612_v55 = vpack.c.bf16 %v5304_v18, %v5303_v14  ;;  %v5310_v14 = vld [vmem:[#allocation9 + $0x2b8] sm:$0xff] }
 0x4a0   : > { %9601 = vmatprep.subr.bf16.mxu1 %v9600_v22 }
 0x4a2   : > { %8732 = vmatmul.mubr.f32.gmra.mrb[10].mxu1 %v11768_v52 }
 0x4a3   : > { %8734 = vmatprep.mubr.f32.mxu1 %v11771_v58  ;;  %9603 = vmatpush3.bf16.msra.mxu1 %v9600_v22  ;;  %v5305_v22 = vld [vmem:[#allocation9 + $0x290] sm:$0xff] }
 0x4a4   : > { %9605 = vmatprep.subr.bf16.mxu1 %v9604_v15  ;;  %v9616_v57 = vpack.c.bf16 %v5306_v39, %v5305_v22  ;;  %v5312_v22 = vld [vmem:[#allocation9 + $0x2c8] sm:$0xff] }
 0x4a5   : > { %v5316_v39 = vld [vmem:[#allocation9 + $0x2e8] sm:$0xff] }
 0x4a6   : > { %8735 = vmatmul.mubr.f32.gmra.mrb[12].mxu1 %v11774_v29 }
 0x4a7   : > { %8737 = vmatprep.mubr.f32.mxu1 %v11777_v54  ;;  %9607 = vmatpush3.bf16.msra.mxu1 %v9604_v15  ;;  %v5307_v15 = vld [vmem:[#allocation9 + $0x2a0] sm:$0xff] }
 0x4a8   : > { %9609 = vmatprep.subr.bf16.mxu1 %v9608_v62  ;;  %v9620_v19 = vpack.c.bf16 %v5308_v23, %v5307_v15  ;;  %v5610_v15 = vld [vmem:[#allocation9 + $0x308] sm:$0xff]  ;;  %v12719_v23 = vld [vmem:[#allocation24_spill] sm:$0xff] }
 0x4aa   : > { %8738 = vmatmul.mubr.f32.gmra.mrb[14].mxu1 %v11780_v46 }
 0x4ab   : > { %8740 = vmatprep.mubr.f32.mxu1 %v11783_v13  ;;  %9611 = vmatpush3.bf16.msra.mxu1 %v9608_v62  ;;  %v5309_v62 = vld [vmem:[#allocation9 + $0x2b0] sm:$0xff] }
 0x4ac   : > { %9613 = vmatprep.subr.bf16.mxu1 %v9612_v55  ;;  %v9624_v18 = vpack.c.bf16 %v5310_v14, %v5309_v62  ;;  %v5611_v62 = vld [vmem:[#allocation9 + $0x310] sm:$0xff]  ;;  %v5612_v14 = vld [vmem:[#allocation9 + $0x318] sm:$0xff] }
 0x4ae   : > { %8741 = vmatmul.mubr.f32.gmra.mrb[16].mxu1 %v11786_v56 }
 0x4af   : > { %8743 = vmatprep.mubr.f32.mxu1 %v11789_v45 }
 0x4b2   : > { %8744 = vmatmul.mubr.f32.gmra.mrb[18].mxu1 %v11792_v37 }
 0x4b3   : > { %8746 = vmatprep.mubr.f32.mxu1 %v11795_v5 }
 0x4b6   : > { %8747 = vmatmul.mubr.f32.gmra.mrb[20].mxu1 %v11798_v43 }
 0x4b7   : > { %8749 = vmatprep.mubr.f32.mxu1 %v11801_v10 }
 0x4ba   : > { %8750 = vmatmul.mubr.f32.gmra.mrb[22].mxu1 %v11804_v51 }
 0x4bb   : > { %8752 = vmatprep.mubr.f32.mxu1 %v11807_v50 }
 0x4be   : > { %8753 = vmatmul.mubr.f32.gmra.mrb[24].mxu1 %v11810_v1 }
 0x4bf   : > { %8755 = vmatprep.mubr.f32.mxu1 %v11813_v0 }
 0x4c2   : > { %8756 = vmatmul.mubr.f32.gmra.mrb[26].mxu1 %v11816_v33 }
 0x4c3   : > { %8758 = vmatprep.mubr.f32.mxu1 %v11819_v63 }
 0x4c6   : > { %8759 = vmatmul.mubr.f32.gmra.mrb[28].mxu1 %v11822_v21 }
 0x4c7   : > { %8761 = vmatprep.mubr.f32.mxu1 %v11945_v11 }
 0x4ca   : > { %8762 = vmatmul.mubr.f32.gmra.mrb[30].mxu1 %v11948_v59 }
 0x4cb   : > { %8796 = vmatprep.mubr.f32.mxu1 %v11603_v40  ;;  %v5311_v40 = vld [vmem:[#allocation9 + $0x2c0] sm:$0xff] }
 0x4ce   : > { %8797 = vmatmul.mubr.f32.vlgmr.msra.gmra.mrb[0].mxu1 %v11605_v26  ;;  %v9628_v26 = vpack.c.bf16 %v5312_v22, %v5311_v40  ;;  %v5613_v40 = vld [vmem:[#allocation9 + $0x320] sm:$0xff]  ;;  %v5614_v22 = vld [vmem:[#allocation9 + $0x328] sm:$0xff] }
 0x4cf   : > { %8799 = vmatprep.mubr.f32.mxu1 %v11607_v12  ;;  %9615 = vmatpush3.bf16.msra.mxu1 %v9612_v55  ;;  %v5313_v12 = vld [vmem:[#allocation9 + $0x2d0] sm:$0xff]  ;;  %v5314_v55 = vld [vmem:[#allocation9 + $0x2d8] sm:$0xff] }
 0x4d0   : > { %9617 = vmatprep.subr.bf16.mxu1 %v9616_v57 }
 0x4d2   : > { %8800 = vmatmul.mubr.f32.gmra.mrb[2].mxu1 %v11609_v2  ;;  %v9632_v2 = vpack.c.bf16 %v5314_v55, %v5313_v12  ;;  %v12723_v12 = vld [vmem:[#allocation25_spill] sm:$0xff]  ;;  %v9652_v55 = vpack.c.bf16 %v5614_v22, %v5613_v40  ;;  %v12732_v22 = vld [vmem:[#allocation66_spill] sm:$0xff] }
 0x4d3   : > { %8802 = vmatprep.mubr.f32.mxu1 %v11611_v24  ;;  %9619 = vmatpush3.bf16.msra.mxu1 %v9616_v57  ;;  %v5315_v24 = vld [vmem:[#allocation9 + $0x2e0] sm:$0xff]  ;;  %v5318_v57 = vld [vmem:[#allocation9 + $0x2f8] sm:$0xff] }
 0x4d4   : > { %9621 = vmatprep.subr.bf16.mxu1 %v9620_v19  ;;  %v12731_v40 = vld [vmem:[#allocation65_spill] sm:$0xff] }
 0x4d6   : > { %8803 = vmatmul.mubr.f32.gmra.mrb[4].mxu1 %v11613_v8  ;;  %v9636_v8 = vpack.c.bf16 %v5316_v39, %v5315_v24  ;;  %v5616_v24 = vld [vmem:[#allocation9 + $0x338] sm:$0xff]  ;;  %v12724_v39 = vld [vmem:[#allocation58_spill] sm:$0xff] }
 0x4d7   : > { %8805 = vmatprep.mubr.f32.mxu1 %v11615_v34  ;;  %9623 = vmatpush3.bf16.msra.mxu1 %v9620_v19  ;;  %v5317_v34 = vld [vmem:[#allocation9 + $0x2f0] sm:$0xff] }
 0x4d8   : > { %9625 = vmatprep.subr.bf16.mxu1 %v9624_v18  ;;  %v11984_v19 = vld [vmem:[#allocation2 + $0x210] sm:$0xff] }
 0x4da   : > { %8806 = vmatmul.mubr.f32.gmra.mrb[6].mxu1 %v11617_v6  ;;  %v9640_v6 = vpack.c.bf16 %v5318_v57, %v5317_v34  ;;  %v5618_v57 = vld [vmem:[#allocation9 + $0x348] sm:$0xff] }
 0x4db   : > { %8808 = vmatprep.mubr.f32.mxu1 %v11619_v38  ;;  %9627 = vmatpush3.bf16.msra.mxu1 %v9624_v18  ;;  %v5609_v38 = vld [vmem:[#allocation9 + $0x300] sm:$0xff]  ;;  %v9648_v18 = vpack.c.bf16 %v5612_v14, %v5611_v62 }
 0x4dc   : > { %9629 = vmatprep.subr.bf16.mxu1 %v9628_v26  ;;  %v5915_v14 = vld [vmem:[#allocation9 + $0x380] sm:$0xff] }
 0x4de   : > { %8809 = vmatmul.mubr.f32.gmra.mrb[8].mxu1 %v11621_v3  ;;  %v9644_v3 = vpack.c.bf16 %v5610_v15, %v5609_v38  ;;  %v12727_v38 = vld [vmem:[#allocation61_spill] sm:$0xff] }
 0x4df   : > { %8811 = vmatprep.mubr.f32.mxu1 %v11623_v48  ;;  %9631 = vmatpush3.bf16.msra.mxu1 %v9628_v26  ;;  %v12712_v48 = vld [vmem:[#allocation28_spill] sm:$0xff]  ;;  %v12722_v26 = vld [vmem:[#allocation18_spill] sm:$0xff] }
 0x4e0   : > { %9633 = vmatprep.subr.bf16.mxu1 %v9632_v2 }
 0x4e2   : > { %8812 = vmatmul.mubr.f32.gmra.mrb[10].mxu1 %v11630_v9  ;;  %v12713_v9 = vld [vmem:[#allocation29_spill] sm:$0xff] }
 0x4e3   : > { %8814 = vmatprep.mubr.f32.mxu1 %v11632_v20  ;;  %9635 = vmatpush3.bf16.msra.mxu1 %v9632_v2  ;;  %v12714_v20 = vld [vmem:[#allocation19_spill] sm:$0xff]  ;;  %v5615_v2 = vld [vmem:[#allocation9 + $0x330] sm:$0xff] }
 0x4e4   : > { %9637 = vmatprep.subr.bf16.mxu1 %v9636_v8  ;;  %v9656_v34 = vpack.c.bf16 %v5616_v24, %v5615_v2  ;;  %v12734_v2 = vld [vmem:[#allocation68_spill] sm:$0xff]  ;;  %v12735_v24 = vld [vmem:[#allocation69_spill] sm:$0xff] }
 0x4e6   : > { %8815 = vmatmul.mubr.f32.gmra.mrb[12].mxu1 %v11634_v42  ;;  %v12715_v42 = vld [vmem:[#allocation20_spill] sm:$0xff] }
 0x4e7   : > { %8817 = vmatprep.mubr.f32.mxu1 %v11636_v31  ;;  %9639 = vmatpush3.bf16.msra.mxu1 %v9636_v8  ;;  %v12716_v31 = vld [vmem:[#allocation21_spill] sm:$0xff]  ;;  %v12725_v8 = vld [vmem:[#allocation59_spill] sm:$0xff] }
 0x4e8   : > { %9641 = vmatprep.subr.bf16.mxu1 %v9640_v6 }
 0x4ea   : > { %8818 = vmatmul.mubr.f32.gmra.mrb[14].mxu1 %v11644_v4  ;;  %v12717_v4 = vld [vmem:[#allocation22_spill] sm:$0xff] }
 0x4eb   : > { %8820 = vmatprep.mubr.f32.mxu1 %v11646_v36  ;;  %9643 = vmatpush3.bf16.msra.mxu1 %v9640_v6  ;;  %v12718_v36 = vld [vmem:[#allocation23_spill] sm:$0xff]  ;;  %v12726_v6 = vld [vmem:[#allocation60_spill] sm:$0xff] }
 0x4ec   : > { %9645 = vmatprep.subr.bf16.mxu1 %v9644_v3 }
 0x4ee   : > { %8821 = vmatmul.mubr.f32.gmra.mrb[16].mxu1 %v11648_v27  ;;  %v12720_v27 = vld [vmem:[#allocation26_spill] sm:$0xff] }
 0x4ef   : > { %8823 = vmatprep.mubr.f32.mxu1 %v11650_v7  ;;  %v12721_v7 = vld [vmem:[#allocation27_spill] sm:$0xff] }
 0x4f2   : > { %8824 = vmatmul.mubr.f32.gmra.mrb[18].mxu1 %v11658_v30  ;;  %v11981_v30 = vld [vmem:[#allocation2 + $0x208] sm:$0xff] }
 0x4f3   : > { %8826 = vmatprep.mubr.f32.mxu1 %v12712_v48  ;;  %v5620_v48 = vld [vmem:[#allocation9 + $0x358] sm:$0xff] }
 0x4f6   : > { %8827 = vmatmul.mubr.f32.gmra.mrb[20].mxu1 %v12713_v9  ;;  %v12728_v9 = vld [vmem:[#allocation62_spill] sm:$0xff] }
 0x4f7   : > { %8829 = vmatprep.mubr.f32.mxu1 %v12714_v20  ;;  %v12729_v20 = vld [vmem:[#allocation63_spill] sm:$0xff] }
 0x4fa   : > { %8830 = vmatmul.mubr.f32.gmra.mrb[22].mxu1 %v12715_v42 }
 0x4fb   : > { %8832 = vmatprep.mubr.f32.mxu1 %v12716_v31  ;;  %v5621_v31 = vld [vmem:[#allocation9 + $0x360] sm:$0xff] }
 0x4fe   : > { %8833 = vmatmul.mubr.f32.gmra.mrb[24].mxu1 %v12717_v4  ;;  %v5622_v4 = vld [vmem:[#allocation9 + $0x368] sm:$0xff] }
 0x4ff   : > { %8835 = vmatprep.mubr.f32.mxu1 %v12718_v36  ;;  %v9668_v36 = vpack.c.bf16 %v5622_v4, %v5621_v31  ;;  %v12743_v31 = vld [vmem:[#allocation77_spill] sm:$0xff]  ;;  %v12744_v4 = vld [vmem:[#allocation78_spill] sm:$0xff] }
 0x502   : > { %8836 = vmatmul.mubr.f32.gmra.mrb[26].mxu1 %v12719_v23  ;;  %v5623_v23 = vld [vmem:[#allocation9 + $0x370] sm:$0xff] }
 0x503   : > { %8838 = vmatprep.mubr.f32.mxu1 %v12720_v27  ;;  %v5624_v27 = vld [vmem:[#allocation9 + $0x378] sm:$0xff] }
 0x504   : > { %v9672_v62 = vpack.c.bf16 %v5624_v27, %v5623_v23  ;;  %v12746_v23 = vld [vmem:[#allocation80_spill] sm:$0xff]  ;;  %v12747_v27 = vld [vmem:[#allocation81_spill] sm:$0xff] }
 0x506   : > { %8839 = vmatmul.mubr.f32.gmra.mrb[28].mxu1 %v12721_v7  ;;  %v12730_v7 = vld [vmem:[#allocation64_spill] sm:$0xff] }
 0x507   : > { %8841 = vmatprep.mubr.f32.mxu1 %v11981_v30 }
 0x50a   : > { %8842 = vmatmul.mubr.f32.gmra.mrb[30].mxu1 %v11984_v19 }
 0x50b   : > { %8876 = vmatprep.mubr.f32.mxu1 %v11825_v44  ;;  %v5617_v44 = vld [vmem:[#allocation9 + $0x340] sm:$0xff] }
 0x50c   : > { %v9660_v15 = vpack.c.bf16 %v5618_v57, %v5617_v44  ;;  %v12737_v44 = vld [vmem:[#allocation71_spill] sm:$0xff]  ;;  %v12738_v57 = vld [vmem:[#allocation72_spill] sm:$0xff] }
 0x50e   : > { %8877 = vmatmul.mubr.f32.vlgmr.msra.gmra.mrb[0].mxu1 %v12722_v26 }
 0x50f   : > { %8879 = vmatprep.mubr.f32.mxu1 %v12723_v12  ;;  %9647 = vmatpush3.bf16.msra.mxu1 %v9644_v3  ;;  %v5619_v3 = vld [vmem:[#allocation9 + $0x350] sm:$0xff] }
 0x510   : > { %9649 = vmatprep.subr.bf16.mxu1 %v9648_v18  ;;  %v9664_v42 = vpack.c.bf16 %v5620_v48, %v5619_v3  ;;  %v12740_v3 = vld [vmem:[#allocation74_spill] sm:$0xff]  ;;  %v12741_v48 = vld [vmem:[#allocation75_spill] sm:$0xff] }
 0x512   : > { %8880 = vmatmul.mubr.f32.gmra.mrb[2].mxu1 %v12724_v39 }
 0x513   : > { %8882 = vmatprep.mubr.f32.mxu1 %v12725_v8  ;;  %9651 = vmatpush3.bf16.msra.mxu1 %v9648_v18  ;;  %v5916_v18 = vld [vmem:[#allocation9 + $0x388] sm:$0xff] }
 0x514   : > { %9653 = vmatprep.subr.bf16.mxu1 %v9652_v55  ;;  %v9676_v26 = vpack.c.bf16 %v5916_v18, %v5915_v14  ;;  %v12020_v14 = vld [vmem:[#allocation2 + $0x211] sm:$0xff] }
 0x515   : > { %12749 = vst [vmem:[#allocation29_spill] sm:$0xff] %v12020_v14  ;;  %v5917_v18 = vld [vmem:[#allocation9 + $0x390] sm:$0xff] }
 0x516   : > { %8883 = vmatmul.mubr.f32.gmra.mrb[4].mxu1 %v12726_v6 }
 0x517   : > { %8885 = vmatprep.mubr.f32.mxu1 %v12727_v38  ;;  %9655 = vmatpush3.bf16.msra.mxu1 %v9652_v55  ;;  %v12733_v55 = vld [vmem:[#allocation67_spill] sm:$0xff] }
 0x518   : > { %9657 = vmatprep.subr.bf16.mxu1 %v9656_v34 }
 0x51a   : > { %8886 = vmatmul.mubr.f32.gmra.mrb[6].mxu1 %v12728_v9 }
 0x51b   : > { %8888 = vmatprep.mubr.f32.mxu1 %v12729_v20  ;;  %9659 = vmatpush3.bf16.msra.mxu1 %v9656_v34  ;;  %v12736_v34 = vld [vmem:[#allocation70_spill] sm:$0xff] }
 0x51c   : > { %9661 = vmatprep.subr.bf16.mxu1 %v9660_v15 }
 0x51e   : > { %8889 = vmatmul.mubr.f32.gmra.mrb[8].mxu1 %v11852_v17 }
 0x51f   : > { %8891 = vmatprep.mubr.f32.mxu1 %v11855_v32  ;;  %9663 = vmatpush3.bf16.msra.mxu1 %v9660_v15  ;;  %v12739_v15 = vld [vmem:[#allocation73_spill] sm:$0xff] }
 0x520   : > { %9665 = vmatprep.subr.bf16.mxu1 %v9664_v42 }
 0x522   : > { %8892 = vmatmul.mubr.f32.gmra.mrb[10].mxu1 %v11858_v16 }
 0x523   : > { %8894 = vmatprep.mubr.f32.mxu1 %v12730_v7  ;;  %9667 = vmatpush3.bf16.msra.mxu1 %v9664_v42  ;;  %v12742_v42 = vld [vmem:[#allocation76_spill] sm:$0xff] }
 0x524   : > { %9669 = vmatprep.subr.bf16.mxu1 %v9668_v36 }
 0x526   : > { %8895 = vmatmul.mubr.f32.gmra.mrb[12].mxu1 %v12731_v40 }
 0x527   : > { %8897 = vmatprep.mubr.f32.mxu1 %v12732_v22  ;;  %9671 = vmatpush3.bf16.msra.mxu1 %v9668_v36  ;;  %v12745_v36 = vld [vmem:[#allocation79_spill] sm:$0xff] }
 0x528   : > { %9673 = vmatprep.subr.bf16.mxu1 %v9672_v62 }
 0x52a   : > { %8898 = vmatmul.mubr.f32.gmra.mrb[14].mxu1 %v12733_v55 }
 0x52b   : > { %8900 = vmatprep.mubr.f32.mxu1 %v12734_v2  ;;  %9675 = vmatpush3.bf16.msra.mxu1 %v9672_v62  ;;  %v12017_v62 = vld [vmem:[#allocation2 + $0x209] sm:$0xff] }
 0x52c   : > { %9677 = vmatprep.subr.bf16.mxu1 %v9676_v26  ;;  %12748 = vst [vmem:[#allocation28_spill] sm:$0xff] %v12017_v62 }
 0x52e   : > { %8901 = vmatmul.mubr.f32.gmra.mrb[16].mxu1 %v12735_v24 }
 0x52f   : > { %8903 = vmatprep.mubr.f32.mxu1 %v12736_v34 }
 0x532   : > { %8904 = vmatmul.mubr.f32.gmra.mrb[18].mxu1 %v12737_v44 }
 0x533   : > { %8906 = vmatprep.mubr.f32.mxu1 %v12738_v57 }
 0x536   : > { %8907 = vmatmul.mubr.f32.gmra.mrb[20].mxu1 %v12739_v15 }
 0x537   : > { %8909 = vmatprep.mubr.f32.mxu1 %v12740_v3 }
 0x53a   : > { %8910 = vmatmul.mubr.f32.gmra.mrb[22].mxu1 %v12741_v48  ;;  %v5918_v48 = vld [vmem:[#allocation9 + $0x398] sm:$0xff] }
 0x53b   : > { %8912 = vmatprep.mubr.f32.mxu1 %v12742_v42  ;;  %v5920_v42 = vld [vmem:[#allocation9 + $0x3a8] sm:$0xff] }
 0x53e   : > { %8913 = vmatmul.mubr.f32.gmra.mrb[24].mxu1 %v12743_v31  ;;  %v9680_v31 = vpack.c.bf16 %v5918_v48, %v5917_v18  ;;  %v5924_v48 = vld [vmem:[#allocation9 + $0x3c8] sm:$0xff] }
 0x53f   : > { %8915 = vmatprep.mubr.f32.mxu1 %v12744_v4  ;;  %v5919_v4 = vld [vmem:[#allocation9 + $0x3a0] sm:$0xff]  ;;  %v10365_v18 = vld [vmem:[#allocation2 + $0xc8] sm:$0xff] }
 0x542   : > { %8916 = vmatmul.mubr.f32.gmra.mrb[26].mxu1 %v12745_v36 }
 0x543   : > { %8918 = vmatprep.mubr.f32.mxu1 %v12746_v23  ;;  %v5921_v23 = vld [vmem:[#allocation9 + $0x3b0] sm:$0xff] }
 0x546   : > { %8919 = vmatmul.mubr.f32.gmra.mrb[28].mxu1 %v12747_v27  ;;  %v9684_v27 = vpack.c.bf16 %v5920_v42, %v5919_v4  ;;  %v5928_v42 = vld [vmem:[#allocation9 + $0x3e8] sm:$0xff] }
 0x547   : > { %8921 = vmatprep.mubr.f32.mxu1 %v12017_v62  ;;  %v5922_v62 = vld [vmem:[#allocation9 + $0x3b8] sm:$0xff]  ;;  %v6222_v4 = vld [vmem:[#allocation9 + $0x408] sm:$0xff] }
 0x54a   : > { %8922 = vmatmul.mubr.f32.gmra.mrb[30].mxu1 %v12020_v14  ;;  %v9688_v14 = vpack.c.bf16 %v5922_v62, %v5921_v23  ;;  %v6232_v62 = vld [vmem:[#allocation9 + $0x458] sm:$0xff] }
 0x54b   : > { %8956 = vmatprep.mubr.f32.mxu1 %v11741_v25  ;;  %v5923_v25 = vld [vmem:[#allocation9 + $0x3c0] sm:$0xff] }
 0x54e   : > { %8957 = vmatmul.mubr.f32.vlgmr.msra.gmra.mrb[0].mxu1 %v11744_v53  ;;  %v9692_v53 = vpack.c.bf16 %v5924_v48, %v5923_v25  ;;  %v6233_v48 = vld [vmem:[#allocation9 + $0x460] sm:$0xff] }
 0x54f   : > { %8959 = vmatprep.mubr.f32.mxu1 %v11747_v35  ;;  %9679 = vmatpush3.bf16.msra.mxu1 %v9676_v26  ;;  %v5925_v35 = vld [vmem:[#allocation9 + $0x3d0] sm:$0xff]  ;;  %v5926_v26 = vld [vmem:[#allocation9 + $0x3d8] sm:$0xff] }
 0x550   : > { %9681 = vmatprep.subr.bf16.mxu1 %v9680_v31 }
 0x552   : > { %8960 = vmatmul.mubr.f32.gmra.mrb[2].mxu1 %v11750_v41  ;;  %v9696_v41 = vpack.c.bf16 %v5926_v26, %v5925_v35  ;;  %v10366_v35 = vld [vmem:[#allocation2 + $0xd0] sm:$0xff]  ;;  %v10367_v26 = vld [vmem:[#allocation2 + $0xe8] sm:$0xff] }
 0x553   : > { %8962 = vmatprep.mubr.f32.mxu1 %v11753_v47  ;;  %9683 = vmatpush3.bf16.msra.mxu1 %v9680_v31  ;;  %v5927_v47 = vld [vmem:[#allocation9 + $0x3e0] sm:$0xff]  ;;  %v5930_v31 = vld [vmem:[#allocation9 + $0x3f8] sm:$0xff] }
 0x554   : > { %9685 = vmatprep.subr.bf16.mxu1 %v9684_v27 }
 0x556   : > { %8963 = vmatmul.mubr.f32.gmra.mrb[4].mxu1 %v11756_v60  ;;  %v9700_v60 = vpack.c.bf16 %v5928_v42, %v5927_v47  ;;  %v6235_v47 = vld [vmem:[#allocation9 + $0x470] sm:$0xff]  ;;  %v6236_v42 = vld [vmem:[#allocation9 + $0x478] sm:$0xff] }
 0x557   : > { %8965 = vmatprep.mubr.f32.mxu1 %v11759_v28  ;;  %9687 = vmatpush3.bf16.msra.mxu1 %v9684_v27  ;;  %v5929_v28 = vld [vmem:[#allocation9 + $0x3f0] sm:$0xff] }
 0x558   : > { %9689 = vmatprep.subr.bf16.mxu1 %v9688_v14  ;;  %v6231_v27 = vld [vmem:[#allocation9 + $0x450] sm:$0xff] }
 0x559   : > { %v9728_v25 = vpack.c.bf16 %v6232_v62, %v6231_v27 }
 0x55a   : > { %8966 = vmatmul.mubr.f32.gmra.mrb[6].mxu1 %v11762_v49  ;;  %v9704_v49 = vpack.c.bf16 %v5930_v31, %v5929_v28  ;;  %v10369_v28 = vld [vmem:[#allocation2 + $0x108] sm:$0xff]  ;;  %v9736_v31 = vpack.c.bf16 %v6236_v42, %v6235_v47 }
 0x55b   : > { %8968 = vmatprep.mubr.f32.mxu1 %v11765_v61  ;;  %9691 = vmatpush3.bf16.msra.mxu1 %v9688_v14  ;;  %v6221_v61 = vld [vmem:[#allocation9 + $0x400] sm:$0xff]  ;;  %v10364_v14 = vld [vmem:[#allocation2 + $0xb0] sm:$0xff] }
 0x55c   : > { %9693 = vmatprep.subr.bf16.mxu1 %v9692_v53 }
 0x55e   : > { %8969 = vmatmul.mubr.f32.gmra.mrb[8].mxu1 %v11768_v52  ;;  %v9708_v52 = vpack.c.bf16 %v6222_v4, %v6221_v61  ;;  %v10371_v61 = vld [vmem:[#allocation2 + $0x128] sm:$0xff]  ;;  %v10372_v4 = vld [vmem:[#allocation2 + $0x130] sm:$0xff] }
 0x55f   : > { %8971 = vmatprep.mubr.f32.mxu1 %v11771_v58  ;;  %9695 = vmatpush3.bf16.msra.mxu1 %v9692_v53  ;;  %v3623_v58 = vld [vmem:[#allocation2 + $0x227] sm:$0xff] }
 0x560   : > { %9697 = vmatprep.subr.bf16.mxu1 %v9696_v41  ;;  %v6234_v53 = vld [vmem:[#allocation9 + $0x468] sm:$0xff] }
 0x562   : > { %8972 = vmatmul.mubr.f32.gmra.mrb[10].mxu1 %v11774_v29  ;;  %v3624_v29 = vld [vmem:[#allocation2 + $0x22f] sm:$0xff] }
 0x563   : > { %8974 = vmatprep.mubr.f32.mxu1 %v11777_v54  ;;  %9699 = vmatpush3.bf16.msra.mxu1 %v9696_v41  ;;  %v6223_v54 = vld [vmem:[#allocation9 + $0x410] sm:$0xff]  ;;  %v9732_v41 = vpack.c.bf16 %v6234_v53, %v6233_v48 }
 0x564   : > { %9701 = vmatprep.subr.bf16.mxu1 %v9700_v60 }
 0x566   : > { %8975 = vmatmul.mubr.f32.gmra.mrb[12].mxu1 %v11780_v46  ;;  %v6224_v46 = vld [vmem:[#allocation9 + $0x418] sm:$0xff] }
 0x567   : > { %8977 = vmatprep.mubr.f32.mxu1 %v11783_v13  ;;  %9703 = vmatpush3.bf16.msra.mxu1 %v9700_v60  ;;  %v10357_v13 = vld [vmem:[#allocation2 + $0x48] sm:$0xff]  ;;  %v10368_v60 = vld [vmem:[#allocation2 + $0xf0] sm:$0xff] }
 0x568   : > { %9705 = vmatprep.subr.bf16.mxu1 %v9704_v49 }
 0x56a   : > { %8978 = vmatmul.mubr.f32.gmra.mrb[14].mxu1 %v11786_v56  ;;  %v6226_v56 = vld [vmem:[#allocation9 + $0x428] sm:$0xff] }
 0x56b   : > { %8980 = vmatprep.mubr.f32.mxu1 %v11789_v45  ;;  %9707 = vmatpush3.bf16.msra.mxu1 %v9704_v49  ;;  %v6227_v45 = vld [vmem:[#allocation9 + $0x430] sm:$0xff] }
 0x56c   : > { %9709 = vmatprep.subr.bf16.mxu1 %v9708_v52  ;;  %v10370_v49 = vld [vmem:[#allocation2 + $0x110] sm:$0xff] }
 0x56e   : > { %8981 = vmatmul.mubr.f32.gmra.mrb[16].mxu1 %v11792_v37  ;;  %v6228_v37 = vld [vmem:[#allocation9 + $0x438] sm:$0xff] }
 0x56f   : > { %8983 = vmatprep.mubr.f32.mxu1 %v11795_v5  ;;  %v10360_v5 = vld [vmem:[#allocation2 + $0x70] sm:$0xff] }
 0x572   : > { %8984 = vmatmul.mubr.f32.gmra.mrb[18].mxu1 %v11798_v43  ;;  %v10361_v43 = vld [vmem:[#allocation2 + $0x88] sm:$0xff] }
 0x573   : > { %8986 = vmatprep.mubr.f32.mxu1 %v11801_v10  ;;  %v9720_v10 = vpack.c.bf16 %v6228_v37, %v6227_v45  ;;  %v3695_v45 = vld [vmem:[#allocation2 + $0x228] sm:$0xff]  ;;  %v3696_v37 = vld [vmem:[#allocation2 + $0x230] sm:$0xff] }
 0x576   : > { %8987 = vmatmul.mubr.f32.gmra.mrb[20].mxu1 %v11804_v51  ;;  %v6229_v51 = vld [vmem:[#allocation9 + $0x440] sm:$0xff] }
 0x577   : > { %8989 = vmatprep.mubr.f32.mxu1 %v11807_v50  ;;  %v6230_v50 = vld [vmem:[#allocation9 + $0x448] sm:$0xff] }
 0x578   : > { %v9724_v23 = vpack.c.bf16 %v6230_v50, %v6229_v51 }
 0x57a   : > { %8990 = vmatmul.mubr.f32.gmra.mrb[22].mxu1 %v11810_v1  ;;  %v9712_v1 = vpack.c.bf16 %v6224_v46, %v6223_v54  ;;  %v10376_v54 = vld [vmem:[#allocation2 + $0x170] sm:$0xff]  ;;  %v10377_v46 = vld [vmem:[#allocation2 + $0x188] sm:$0xff] }
 0x57b   : > { %8992 = vmatprep.mubr.f32.mxu1 %v11813_v0  ;;  %v6225_v0 = vld [vmem:[#allocation9 + $0x420] sm:$0xff] }
 0x57e   : > { %8993 = vmatmul.mubr.f32.gmra.mrb[24].mxu1 %v11816_v33  ;;  %v10358_v33 = vld [vmem:[#allocation2 + $0x50] sm:$0xff] }
 0x57f   : > { %8995 = vmatprep.mubr.f32.mxu1 %v11819_v63  ;;  %v10359_v63 = vld [vmem:[#allocation2 + $0x68] sm:$0xff] }
 0x582   : > { %8996 = vmatmul.mubr.f32.gmra.mrb[26].mxu1 %v11822_v21  ;;  %v9716_v21 = vpack.c.bf16 %v6226_v56, %v6225_v0  ;;  %v10380_v0 = vld [vmem:[#allocation2 + $0x1b0] sm:$0xff]  ;;  %v10381_v56 = vld [vmem:[#allocation2 + $0x1c8] sm:$0xff] }
 0x583   : > { %8998 = vmatprep.mubr.f32.mxu1 %v11945_v11  ;;  %v10362_v11 = vld [vmem:[#allocation2 + $0x90] sm:$0xff] }
 0x586   : > { %8999 = vmatmul.mubr.f32.gmra.mrb[28].mxu1 %v11948_v59  ;;  %v10363_v59 = vld [vmem:[#allocation2 + $0xa8] sm:$0xff] }
 0x587   : > { %9001 = vmatprep.mubr.f32.mxu1 %v3623_v58  ;;  %v10374_v58 = vld [vmem:[#allocation2 + $0x150] sm:$0xff] }
 0x58a   : > { %9002 = vmatmul.mubr.f32.gmra.mrb[30].mxu1 %v3624_v29  ;;  %v10375_v29 = vld [vmem:[#allocation2 + $0x168] sm:$0xff] }
 0x58b   : > { %9036 = vmatprep.mubr.f32.mxu1 %v10357_v13  ;;  %v10378_v13 = vld [vmem:[#allocation2 + $0x190] sm:$0xff] }
 0x58e   : > { %9037 = vmatmul.mubr.f32.vlgmr.msra.gmra.mrb[0].mxu1 %v10358_v33  ;;  %v10382_v33 = vld [vmem:[#allocation2 + $0x1d0] sm:$0xff] }
 0x58f   : > { %9039 = vmatprep.mubr.f32.mxu1 %v10359_v63  ;;  %9711 = vmatpush3.bf16.msra.mxu1 %v9708_v52  ;;  %v10373_v52 = vld [vmem:[#allocation2 + $0x148] sm:$0xff] }
 0x590   : > { %9713 = vmatprep.subr.bf16.mxu1 %v9712_v1  ;;  %v10383_v63 = vld [vmem:[#allocation2 + $0x1e8] sm:$0xff] }
 0x592   : > { %9040 = vmatmul.mubr.f32.gmra.mrb[2].mxu1 %v10360_v5 }
 0x593   : > { %9042 = vmatprep.mubr.f32.mxu1 %v10361_v43  ;;  %9715 = vmatpush3.bf16.msra.mxu1 %v9712_v1  ;;  %v10379_v1 = vld [vmem:[#allocation2 + $0x1a8] sm:$0xff] }
 0x594   : > { %9717 = vmatprep.subr.bf16.mxu1 %v9716_v21 }
 0x596   : > { %9043 = vmatmul.mubr.f32.gmra.mrb[4].mxu1 %v10362_v11 }
 0x597   : > { %9045 = vmatprep.mubr.f32.mxu1 %v10363_v59  ;;  %9719 = vmatpush3.bf16.msra.mxu1 %v9716_v21  ;;  %v10384_v21 = vld [vmem:[#allocation2 + $0x1f0] sm:$0xff] }
 0x598   : > { %9721 = vmatprep.subr.bf16.mxu1 %v9720_v10 }
 0x59a   : > { %9046 = vmatmul.mubr.f32.gmra.mrb[6].mxu1 %v10364_v14 }
 0x59b   : > { %9048 = vmatprep.mubr.f32.mxu1 %v10365_v18  ;;  %9723 = vmatpush3.bf16.msra.mxu1 %v9720_v10 }
 0x59c   : > { %9725 = vmatprep.subr.bf16.mxu1 %v9724_v23 }
 0x59e   : > { %9049 = vmatmul.mubr.f32.gmra.mrb[8].mxu1 %v10366_v35 }
 0x59f   : > { %9051 = vmatprep.mubr.f32.mxu1 %v10367_v26  ;;  %9727 = vmatpush3.bf16.msra.mxu1 %v9724_v23 }
 0x5a0   : > { %9729 = vmatprep.subr.bf16.mxu1 %v9728_v25 }
 0x5a2   : > { %9052 = vmatmul.mubr.f32.gmra.mrb[10].mxu1 %v10368_v60 }
 0x5a3   : > { %9054 = vmatprep.mubr.f32.mxu1 %v10369_v28  ;;  %9731 = vmatpush3.bf16.msra.mxu1 %v9728_v25 }
 0x5a4   : > { %9733 = vmatprep.subr.bf16.mxu1 %v9732_v41 }
 0x5a6   : > { %9055 = vmatmul.mubr.f32.gmra.mrb[12].mxu1 %v10370_v49 }
 0x5a7   : > { %9057 = vmatprep.mubr.f32.mxu1 %v10371_v61  ;;  %9735 = vmatpush3.bf16.msra.mxu1 %v9732_v41 }
 0x5a8   : > { %9737 = vmatprep.subr.bf16.mxu1 %v9736_v31 }
 0x5aa   : > { %9058 = vmatmul.mubr.f32.gmra.mrb[14].mxu1 %v10372_v4 }
 0x5ab   : > { %9060 = vmatprep.mubr.f32.mxu1 %v10373_v52  ;;  %9739 = vmatpush3.bf16.msra.mxu1 %v9736_v31 }
 0x5ae   : > { %9061 = vmatmul.mubr.f32.gmra.mrb[16].mxu1 %v10374_v58 }
 0x5af   : > { %9063 = vmatprep.mubr.f32.mxu1 %v10375_v29 }
 0x5b2   : > { %9064 = vmatmul.mubr.f32.gmra.mrb[18].mxu1 %v10376_v54 }
 0x5b3   : > { %9066 = vmatprep.mubr.f32.mxu1 %v10377_v46 }
 0x5b6   : > { %9067 = vmatmul.mubr.f32.gmra.mrb[20].mxu1 %v10378_v13 }
 0x5b7   : > { %9069 = vmatprep.mubr.f32.mxu1 %v10379_v1 }
 0x5ba   : > { %9070 = vmatmul.mubr.f32.gmra.mrb[22].mxu1 %v10380_v0 }
 0x5bb   : > { %9072 = vmatprep.mubr.f32.mxu1 %v10381_v56 }
 0x5be   : > { %9073 = vmatmul.mubr.f32.gmra.mrb[24].mxu1 %v10382_v33 }
 0x5bf   : > { %9075 = vmatprep.mubr.f32.mxu1 %v10383_v63 }
 0x5c2   : > { %9076 = vmatmul.mubr.f32.gmra.mrb[26].mxu1 %v10384_v21 }
 0x5c3   : > { %9078 = vmatprep.mubr.f32.mxu1 %v11981_v30  ;;  %v12753_v30 = vld [vmem:[#allocation78_spill] sm:$0xff] }
 0x5c6   : > { %9079 = vmatmul.mubr.f32.gmra.mrb[28].mxu1 %v11984_v19  ;;  %v12754_v19 = vld [vmem:[#allocation80_spill] sm:$0xff] }
 0x5c7   : > { %9081 = vmatprep.mubr.f32.mxu1 %v3695_v45 }
 0x5ca   : > { %9082 = vmatmul.mubr.f32.gmra.mrb[30].mxu1 %v3696_v37 }
 0x5cb   : > { %9116 = vmatprep.mubr.f32.mxu1 %v12723_v12  ;;  %v12755_v12 = vld [vmem:[#allocation81_spill] sm:$0xff] }
 0x5ce   : > { %9117 = vmatmul.mubr.f32.vlgmr.msra.gmra.mrb[0].mxu1 %v12724_v39  ;;  %v12756_v39 = vld [vmem:[#allocation28_spill] sm:$0xff] }
 0x5cf   : > { %9119 = vmatprep.mubr.f32.mxu1 %v12725_v8  ;;  %v12757_v8 = vld [vmem:[#allocation29_spill] sm:$0xff] }
 0x5d2   : > { %9120 = vmatmul.mubr.f32.gmra.mrb[2].mxu1 %v12726_v6  ;;  %v3767_v6 = vld [vmem:[#allocation2 + $0x229] sm:$0xff] }
 0x5d3   : > { %9122 = vmatprep.mubr.f32.mxu1 %v12727_v38  ;;  %v3768_v38 = vld [vmem:[#allocation2 + $0x231] sm:$0xff] }
 0x5d6   : > { %9123 = vmatmul.mubr.f32.gmra.mrb[4].mxu1 %v12728_v9 }
 0x5d7   : > { %9125 = vmatprep.mubr.f32.mxu1 %v12729_v20 }
 0x5da   : > { %9126 = vmatmul.mubr.f32.gmra.mrb[6].mxu1 %v11852_v17  ;;  %v12750_v17 = vld [vmem:[#allocation75_spill] sm:$0xff] }
 0x5db   : > { %9128 = vmatprep.mubr.f32.mxu1 %v11855_v32  ;;  %v12751_v32 = vld [vmem:[#allocation76_spill] sm:$0xff] }
 0x5de   : > { %9129 = vmatmul.mubr.f32.gmra.mrb[8].mxu1 %v11858_v16  ;;  %v12752_v16 = vld [vmem:[#allocation77_spill] sm:$0xff] }
 0x5df   : > { %9131 = vmatprep.mubr.f32.mxu1 %v12730_v7 }
 0x5e2   : > { %9132 = vmatmul.mubr.f32.gmra.mrb[10].mxu1 %v12731_v40 }
 0x5e3   : > { %9134 = vmatprep.mubr.f32.mxu1 %v12732_v22 }
 0x5e6   : > { %9135 = vmatmul.mubr.f32.gmra.mrb[12].mxu1 %v12733_v55 }
 0x5e7   : > { %9137 = vmatprep.mubr.f32.mxu1 %v12734_v2 }
 0x5ea   : > { %9138 = vmatmul.mubr.f32.gmra.mrb[14].mxu1 %v12735_v24 }
 0x5eb   : > { %9140 = vmatprep.mubr.f32.mxu1 %v12736_v34 }
 0x5ee   : > { %9141 = vmatmul.mubr.f32.gmra.mrb[16].mxu1 %v12737_v44 }
 0x5ef   : > { %9143 = vmatprep.mubr.f32.mxu1 %v12738_v57 }
 0x5f2   : > { %9144 = vmatmul.mubr.f32.gmra.mrb[18].mxu1 %v12739_v15 }
 0x5f3   : > { %9146 = vmatprep.mubr.f32.mxu1 %v12740_v3 }
 0x5f6   : > { %9147 = vmatmul.mubr.f32.gmra.mrb[20].mxu1 %v12750_v17 }
 0x5f7   : > { %9149 = vmatprep.mubr.f32.mxu1 %v12751_v32 }
 0x5fa   : > { %9150 = vmatmul.mubr.f32.gmra.mrb[22].mxu1 %v12752_v16 }
 0x5fb   : > { %9152 = vmatprep.mubr.f32.mxu1 %v12753_v30 }
 0x5fe   : > { %9153 = vmatmul.mubr.f32.gmra.mrb[24].mxu1 %v12745_v36 }
 0x5ff   : > { %9155 = vmatprep.mubr.f32.mxu1 %v12754_v19 }
 0x602   : > { %9156 = vmatmul.mubr.f32.gmra.mrb[26].mxu1 %v12755_v12 }
 0x603   : > { %9158 = vmatprep.mubr.f32.mxu1 %v12756_v39 }
 0x606   : > { %9159 = vmatmul.mubr.f32.gmra.mrb[28].mxu1 %v12757_v8 }
 0x607   : > { %9161 = vmatprep.mubr.f32.mxu1 %v3767_v6 }
 0x60a   : > { %9162 = vmatmul.mubr.f32.gmra.mrb[30].mxu1 %v3768_v38 }
 0x6a1   : > { %v12085_v9 = vpop.f32.mrb[0].mxu1 }
 0x6a2   : > { %v6533_v20 = vmul.f32 %v12085_v9, %v12085_v9  ;;  %v12089_v7 = vpop.f32.mrb[1].mxu1 }
 0x6a3   : > { %v6494_v40 = vadd.f32 %v12085_v9, %v12089_v7  ;;  %v6532_v22 = vmul.f32 %v12089_v7, %v12089_v7 }
 0x6a5   : > { %v6564_v55 = vadd.f32 %v6533_v20, %v6532_v22  ;;  %v12095_v2 = vpop.f32.mrb[2].mxu1 }
 0x6a6   : > { %v12097_v24 = vpop.f32.mrb[3].mxu1  ;;  %v6535_v57 = vmul.f32 %v12095_v2, %v12095_v2 }
 0x6a7   : > { %v6495_v34 = vadd.f32 %v6494_v40, %v12097_v24  ;;  %v6534_v44 = vmul.f32 %v12097_v24, %v12097_v24 }
 0x6a9   : > { %v6565_v15 = vadd.f32 %v6564_v55, %v6534_v44  ;;  %v12104_v3 = vpop.f32.mrb[4].mxu1  ;;  %v6496_v36 = vadd.f32 %v12095_v2, %v6495_v34 }
 0x6aa   : > { %v12107_v5 = vpop.f32.mrb[5].mxu1  ;;  %v6537_v50 = vmul.f32 %v12104_v3, %v12104_v3 }
 0x6ab   : > { %v6497_v43 = vadd.f32 %v6496_v36, %v12107_v5  ;;  %v6536_v10 = vmul.f32 %v12107_v5, %v12107_v5  ;;  %v6566_v51 = vadd.f32 %v6565_v15, %v6535_v57 }
 0x6ad   : > { %v6567_v11 = vadd.f32 %v6566_v51, %v6536_v10  ;;  %v12114_v59 = vpop.f32.mrb[6].mxu1  ;;  %v6498_v23 = vadd.f32 %v12104_v3, %v6497_v43 }
 0x6ae   : > { %v12117_v27 = vpop.f32.mrb[7].mxu1  ;;  %v6539_v25 = vmul.f32 %v12114_v59, %v12114_v59 }
 0x6af   : > { %v6499_v62 = vadd.f32 %v6498_v23, %v12117_v27  ;;  %v6538_v14 = vmul.f32 %v12117_v27, %v12117_v27  ;;  %v6568_v18 = vadd.f32 %v6567_v11, %v6537_v50 }
 0x6b1   : > { %v6569_v48 = vadd.f32 %v6568_v18, %v6538_v14  ;;  %v12124_v53 = vpop.f32.mrb[8].mxu1  ;;  %v6500_v35 = vadd.f32 %v12114_v59, %v6499_v62 }
 0x6b2   : > { %v12127_v26 = vpop.f32.mrb[9].mxu1  ;;  %v6541_v60 = vmul.f32 %v12124_v53, %v12124_v53 }
 0x6b3   : > { %v6501_v41 = vadd.f32 %v6500_v35, %v12127_v26  ;;  %v6540_v47 = vmul.f32 %v12127_v26, %v12127_v26  ;;  %v6570_v42 = vadd.f32 %v6569_v48, %v6539_v25 }
 0x6b5   : > { %v6571_v28 = vadd.f32 %v6570_v42, %v6540_v47  ;;  %v12134_v31 = vpop.f32.mrb[10].mxu1  ;;  %v6502_v49 = vadd.f32 %v12124_v53, %v6501_v41 }
 0x6b6   : > { %v12137_v61 = vpop.f32.mrb[11].mxu1  ;;  %v6543_v29 = vmul.f32 %v12134_v31, %v12134_v31 }
 0x6b7   : > { %v6503_v4 = vadd.f32 %v6502_v49, %v12137_v61  ;;  %v6542_v52 = vmul.f32 %v12137_v61, %v12137_v61  ;;  %v6572_v58 = vadd.f32 %v6571_v28, %v6541_v60 }
 0x6b9   : > { %v6573_v54 = vadd.f32 %v6572_v58, %v6542_v52  ;;  %v12144_v46 = vpop.f32.mrb[12].mxu1  ;;  %v6504_v13 = vadd.f32 %v12134_v31, %v6503_v4 }
 0x6ba   : > { %v12147_v1 = vpop.f32.mrb[13].mxu1  ;;  %v6545_v63 = vmul.f32 %v12144_v46, %v12144_v46 }
 0x6bb   : > { %v6505_v0 = vadd.f32 %v6504_v13, %v12147_v1  ;;  %v6544_v56 = vmul.f32 %v12147_v1, %v12147_v1  ;;  %v6574_v33 = vadd.f32 %v6573_v54, %v6543_v29 }
 0x6bd   : > { %v6575_v21 = vadd.f32 %v6574_v33, %v6544_v56  ;;  %v12154_v45 = vpop.f32.mrb[14].mxu1  ;;  %v6506_v37 = vadd.f32 %v12144_v46, %v6505_v0 }
 0x6be   : > { %v12157_v17 = vpop.f32.mrb[15].mxu1  ;;  %v6547_v19 = vmul.f32 %v12154_v45, %v12154_v45 }
 0x6bf   : > { %v6507_v32 = vadd.f32 %v6506_v37, %v12157_v17  ;;  %v6546_v16 = vmul.f32 %v12157_v17, %v12157_v17  ;;  %v6576_v30 = vadd.f32 %v6575_v21, %v6545_v63 }
 0x6c1   : > { %v6577_v12 = vadd.f32 %v6576_v30, %v6546_v16  ;;  %v12164_v39 = vpop.f32.mrb[16].mxu1  ;;  %v6508_v8 = vadd.f32 %v12154_v45, %v6507_v32 }
 0x6c2   : > { %v12167_v6 = vpop.f32.mrb[17].mxu1  ;;  %v6549_v22 = vmul.f32 %v12164_v39, %v12164_v39 }
 0x6c3   : > { %v6509_v38 = vadd.f32 %v6508_v8, %v12167_v6  ;;  %v6548_v20 = vmul.f32 %v12167_v6, %v12167_v6  ;;  %v6578_v40 = vadd.f32 %v6577_v12, %v6547_v19 }
 0x6c5   : > { %v6579_v55 = vadd.f32 %v6578_v40, %v6548_v20  ;;  %v12174_v34 = vpop.f32.mrb[18].mxu1  ;;  %v6510_v44 = vadd.f32 %v12164_v39, %v6509_v38 }
 0x6c6   : > { %v12177_v57 = vpop.f32.mrb[19].mxu1  ;;  %v6551_v10 = vmul.f32 %v12174_v34, %v12174_v34 }
 0x6c7   : > { %v6511_v15 = vadd.f32 %v6510_v44, %v12177_v57  ;;  %v6550_v36 = vmul.f32 %v12177_v57, %v12177_v57  ;;  %v6580_v43 = vadd.f32 %v6579_v55, %v6549_v22 }
 0x6c9   : > { %v6581_v51 = vadd.f32 %v6580_v43, %v6550_v36  ;;  %v12184_v50 = vpop.f32.mrb[20].mxu1  ;;  %v6512_v11 = vadd.f32 %v12174_v34, %v6511_v15 }
 0x6ca   : > { %v12187_v23 = vpop.f32.mrb[21].mxu1  ;;  %v6553_v25 = vmul.f32 %v12184_v50, %v12184_v50 }
 0x6cb   : > { %v6513_v62 = vadd.f32 %v6512_v11, %v12187_v23  ;;  %v6552_v14 = vmul.f32 %v12187_v23, %v12187_v23  ;;  %v6582_v18 = vadd.f32 %v6581_v51, %v6551_v10 }
 0x6cd   : > { %v6583_v48 = vadd.f32 %v6582_v18, %v6552_v14  ;;  %v12194_v35 = vpop.f32.mrb[22].mxu1  ;;  %v6514_v41 = vadd.f32 %v12184_v50, %v6513_v62 }
 0x6ce   : > { %v12197_v47 = vpop.f32.mrb[23].mxu1  ;;  %v6555_v49 = vmul.f32 %v12194_v35, %v12194_v35 }
 0x6cf   : > { %v6515_v42 = vadd.f32 %v6514_v41, %v12197_v47  ;;  %v6554_v60 = vmul.f32 %v12197_v47, %v12197_v47  ;;  %v6584_v28 = vadd.f32 %v6583_v48, %v6553_v25 }
 0x6d1   : > { %v6585_v4 = vadd.f32 %v6584_v28, %v6554_v60  ;;  %v12204_v52 = vpop.f32.mrb[24].mxu1  ;;  %v6516_v58 = vadd.f32 %v12194_v35, %v6515_v42 }
 0x6d2   : > { %v12207_v29 = vpop.f32.mrb[25].mxu1  ;;  %v6557_v56 = vmul.f32 %v12204_v52, %v12204_v52 }
 0x6d3   : > { %v6517_v54 = vadd.f32 %v6516_v58, %v12207_v29  ;;  %v6556_v13 = vmul.f32 %v12207_v29, %v12207_v29  ;;  %v6586_v0 = vadd.f32 %v6585_v4, %v6555_v49 }
 0x6d5   : > { %v6587_v33 = vadd.f32 %v6586_v0, %v6556_v13  ;;  %v12214_v63 = vpop.f32.mrb[26].mxu1  ;;  %v6518_v21 = vadd.f32 %v12204_v52, %v6517_v54 }
 0x6d6   : > { %v12217_v37 = vpop.f32.mrb[27].mxu1  ;;  %v6559_v19 = vmul.f32 %v12214_v63, %v12214_v63 }
 0x6d7   : > { %v6519_v32 = vadd.f32 %v6518_v21, %v12217_v37  ;;  %v6558_v16 = vmul.f32 %v12217_v37, %v12217_v37  ;;  %v6588_v30 = vadd.f32 %v6587_v33, %v6557_v56 }
 0x6d9   : > { %v6589_v12 = vadd.f32 %v6588_v30, %v6558_v16  ;;  %v12224_v8 = vpop.f32.mrb[28].mxu1  ;;  %v6520_v38 = vadd.f32 %v12214_v63, %v6519_v32 }
 0x6da   : > { %v12227_v20 = vpop.f32.mrb[29].mxu1  ;;  %v6561_v44 = vmul.f32 %v12224_v8, %v12224_v8 }
 0x6db   : > { %v6521_v40 = vadd.f32 %v6520_v38, %v12227_v20  ;;  %v6560_v22 = vmul.f32 %v12227_v20, %v12227_v20  ;;  %v6590_v55 = vadd.f32 %v6589_v12, %v6559_v19 }
 0x6dd   : > { %v6591_v15 = vadd.f32 %v6590_v55, %v6560_v22  ;;  %v12234_v36 = vpop.f32.mrb[30].mxu1  ;;  %v6522_v43 = vadd.f32 %v12224_v8, %v6521_v40 }
 0x6de   : > { %v6453_v10 = vpop.f32.mrb[31].mxu1  ;;  %v6563_v14 = vmul.f32 %v12234_v36, %v12234_v36 }
 0x6df   : > { %v6523_v51 = vadd.f32 %v6522_v43, %v6453_v10  ;;  %v6562_v11 = vmul.f32 %v6453_v10, %v6453_v10  ;;  %v6592_v62 = vadd.f32 %v6591_v15, %v6561_v44 }
 0x6e1   : > { %v6524_v18 = vadd.f32 %v12234_v36, %v6523_v51  ;;  %v6593_v25 = vadd.f32 %v6592_v62, %v6562_v11 }
 0x6e3   : > { %v6525_v48 = vrot.slane %v6524_v18, 4  ;;  %v6594_v41 = vadd.f32 %v6593_v25, %v6563_v14 }
 0x6e5   : > { %v6526_v42 = vadd.f32 %v6525_v48, %v6524_v18  ;;  %v6595_v60 = vrot.slane %v6594_v41, 4 }
 0x6e7   : > { %v6527_v28 = vrot.slane %v6526_v42, 2  ;;  %v6596_v49 = vadd.f32 %v6595_v60, %v6594_v41 }
 0x6e9   : > { %v6528_v4 = vadd.f32 %v6527_v28, %v6526_v42  ;;  %v6597_v58 = vrot.slane %v6596_v49, 2 }
 0x6eb   : > { %v6529_v54 = vrot.slane %v6528_v4, 1  ;;  %v6598_v13 = vadd.f32 %v6597_v58, %v6596_v49 }
 0x6ed   : > { %v6530_v0 = vadd.f32 %v6529_v54, %v6528_v4  ;;  %v6599_v56 = vrot.slane %v6598_v13, 1 }
 0x6ef   : > { %v12240_v33 = vmul.f32 0.00390625, %v6530_v0  ;;  %v6600_v21 = vadd.f32 %v6599_v56, %v6598_v13 }
 0x6f1   : > { %v6601_v32 = vmul.f32 0.00390625, %v6600_v21  ;;  %v6602_v16 = vmul.f32 %v12240_v33, %v12240_v33  ;;  %v6634_v30 = vsub.f32 %v6453_v10, %v12240_v33  ;;  %v6604_v19 = vsub.f32 %v12089_v7, %v12240_v33 }
 0x6f2   : > { %v6605_v12 = vsub.f32 %v12085_v9, %v12240_v33  ;;  %v6606_v38 = vsub.f32 %v12097_v24, %v12240_v33  ;;  %v6607_v40 = vsub.f32 %v12095_v2, %v12240_v33  ;;  %v6608_v22 = vsub.f32 %v12107_v5, %v12240_v33 }
 0x6f3   : > { %v6603_v55 = vsub.f32 %v6601_v32, %v6602_v16  ;;  %v6609_v44 = vsub.f32 %v12104_v3, %v12240_v33  ;;  %v6610_v15 = vsub.f32 %v12117_v27, %v12240_v33  ;;  %v6611_v7 = vsub.f32 %v12114_v59, %v12240_v33 }
 0x6f4   : > { %v6612_v9 = vsub.f32 %v12127_v26, %v12240_v33  ;;  %v6613_v24 = vsub.f32 %v12124_v53, %v12240_v33  ;;  %v6614_v2 = vsub.f32 %v12137_v61, %v12240_v33  ;;  %v6615_v5 = vsub.f32 %v12134_v31, %v12240_v33 }
 0x6f5   : > { %v6636_v43 = vadd.f32 1e-05, %v6603_v55  ;;  %v6616_v3 = vsub.f32 %v12147_v1, %v12240_v33  ;;  %v6617_v27 = vsub.f32 %v12144_v46, %v12240_v33  ;;  %v6618_v59 = vsub.f32 %v12157_v17, %v12240_v33 }
 0x6f6   : > { %v6619_v26 = vsub.f32 %v12154_v45, %v12240_v33  ;;  %v6620_v53 = vsub.f32 %v12167_v6, %v12240_v33  ;;  %v6621_v61 = vsub.f32 %v12164_v39, %v12240_v33  ;;  %v6622_v31 = vsub.f32 %v12177_v57, %v12240_v33 }
 0x6f7   : > { %10325 = vrsqrt.f32 %v6636_v43  ;;  %v6623_v1 = vsub.f32 %v12174_v34, %v12240_v33  ;;  %v6624_v46 = vsub.f32 %v12187_v23, %v12240_v33  ;;  %v6625_v17 = vsub.f32 %v12184_v50, %v12240_v33 }
 0x6f8   : > { %v6626_v45 = vsub.f32 %v12197_v47, %v12240_v33  ;;  %v6627_v6 = vsub.f32 %v12194_v35, %v12240_v33  ;;  %v6628_v39 = vsub.f32 %v12207_v29, %v12240_v33  ;;  %v6629_v57 = vsub.f32 %v12204_v52, %v12240_v33 }
 0x6f9   : > { %v6630_v34 = vsub.f32 %v12217_v37, %v12240_v33  ;;  %v6631_v23 = vsub.f32 %v12214_v63, %v12240_v33  ;;  %v6632_v50 = vsub.f32 %v12227_v20, %v12240_v33  ;;  %v6633_v47 = vsub.f32 %v12224_v8, %v12240_v33  ;;  %v12758_v63 = vld [vmem:[#allocation14_spill] sm:$0xff] }
 0x6fa   : > { %v6635_v35 = vsub.f32 %v12234_v36, %v12240_v33 }
 0x701   : > { %v10326_v10 = vpop.eup %10325 }
 0x702   : > { %v6668_v29 = vmul.f32 %v10326_v10, %v6634_v30  ;;  %v6638_v51 = vmul.f32 %v10326_v10, %v6604_v19  ;;  %v6639_v52 = vmul.f32 %v10326_v10, %v6605_v12  ;;  %v6640_v11 = vmul.f32 %v10326_v10, %v6606_v38 }
 0x703   : > { %v6641_v62 = vmul.f32 %v10326_v10, %v6607_v40  ;;  %v6642_v37 = vmul.f32 %v10326_v10, %v6608_v22  ;;  %v6643_v14 = vmul.f32 %v10326_v10, %v6609_v44  ;;  %v6644_v18 = vmul.f32 %v10326_v10, %v6610_v15  ;;  %v12759_v22 = vld [vmem:[#allocation30_spill] sm:$0xff]  ;;  %v12760_v44 = vld [vmem:[#allocation31_spill] sm:$0xff] }
 0x704   : > { %v6700_v25 = vadd.f32 %v6668_v29, %v12758_v63  ;;  %v6645_v48 = vmul.f32 %v10326_v10, %v6611_v7  ;;  %v6646_v20 = vmul.f32 %v10326_v10, %v6612_v9  ;;  %v6647_v41 = vmul.f32 %v10326_v10, %v6613_v24  ;;  %v12761_v7 = vld [vmem:[#allocation32_spill] sm:$0xff]  ;;  %v12762_v24 = vld [vmem:[#allocation33_spill] sm:$0xff] }
 0x705   : > { %v6648_v42 = vmul.f32 %v10326_v10, %v6614_v2  ;;  %v6649_v8 = vmul.f32 %v10326_v10, %v6615_v5  ;;  %v6650_v60 = vmul.f32 %v10326_v10, %v6616_v3  ;;  %v6651_v28 = vmul.f32 %v10326_v10, %v6617_v27  ;;  %v12763_v5 = vld [vmem:[#allocation34_spill] sm:$0xff]  ;;  %v12764_v3 = vld [vmem:[#allocation35_spill] sm:$0xff]  ;;  %v12774_v29 = vld [vmem:[#allocation45_spill] sm:$0xff] }
 0x706   : > { %6732 = vst [vmem:[%s12310_s18 + $0xf0] sm:$0xff] %v6700_v25  ;;  %v6652_v36 = vmul.f32 %v10326_v10, %v6618_v59  ;;  %v6653_v49 = vmul.f32 %v10326_v10, %v6619_v26  ;;  %v6654_v4 = vmul.f32 %v10326_v10, %v6620_v53  ;;  %v6655_v58 = vmul.f32 %v10326_v10, %v6621_v61  ;;  %v12765_v59 = vld [vmem:[#allocation36_spill] sm:$0xff]  ;;  %v12766_v53 = vld [vmem:[#allocation37_spill] sm:$0xff] }
 0x707   : > { %v6656_v54 = vmul.f32 %v10326_v10, %v6622_v31  ;;  %v6657_v13 = vmul.f32 %v10326_v10, %v6623_v1  ;;  %v6658_v0 = vmul.f32 %v10326_v10, %v6624_v46  ;;  %v6659_v56 = vmul.f32 %v10326_v10, %v6625_v17  ;;  %v12767_v31 = vld [vmem:[#allocation38_spill] sm:$0xff]  ;;  %v12768_v46 = vld [vmem:[#allocation39_spill] sm:$0xff]  ;;  %v12778_v63 = vld [vmem:[#allocation49_spill] sm:$0xff] }
 0x708   : > { %v6660_v33 = vmul.f32 %v10326_v10, %v6626_v45  ;;  %v6661_v21 = vmul.f32 %v10326_v10, %v6627_v6  ;;  %v6662_v32 = vmul.f32 %v10326_v10, %v6628_v39  ;;  %v6663_v16 = vmul.f32 %v10326_v10, %v6629_v57  ;;  %v12769_v45 = vld [vmem:[#allocation40_spill] sm:$0xff]  ;;  %v12770_v39 = vld [vmem:[#allocation41_spill] sm:$0xff] }
 0x709   : > { %v6664_v30 = vmul.f32 %v10326_v10, %v6630_v34  ;;  %v6665_v19 = vmul.f32 %v10326_v10, %v6631_v23  ;;  %v6666_v12 = vmul.f32 %v10326_v10, %v6632_v50  ;;  %v6667_v38 = vmul.f32 %v10326_v10, %v6633_v47  ;;  %v12771_v34 = vld [vmem:[#allocation42_spill] sm:$0xff]  ;;  %v12772_v50 = vld [vmem:[#allocation43_spill] sm:$0xff] }
 0x70a   : > { %v6669_v40 = vmul.f32 %v10326_v10, %v6635_v35  ;;  %v6670_v55 = vadd.f32 %v12759_v22, %v6638_v51  ;;  %v6671_v15 = vadd.f32 %v12760_v44, %v6639_v52  ;;  %v6672_v9 = vadd.f32 %v12761_v7, %v6640_v11  ;;  %v12773_v35 = vld [vmem:[#allocation44_spill] sm:$0xff]  ;;  %v12775_v52 = vld [vmem:[#allocation46_spill] sm:$0xff]  ;;  %v12789_v22 = vld [vmem:[#allocation15_spill] sm:$0xff] }
 0x70b   : > { %v6673_v2 = vadd.f32 %v12762_v24, %v6641_v62  ;;  %v6674_v43 = vadd.f32 %v12763_v5, %v6642_v37  ;;  %v6675_v27 = vadd.f32 %v12764_v3, %v6643_v14  ;;  %v6676_v26 = vadd.f32 %v12765_v59, %v6644_v18  ;;  %v12776_v62 = vld [vmem:[#allocation47_spill] sm:$0xff]  ;;  %v12777_v14 = vld [vmem:[#allocation48_spill] sm:$0xff] }
 0x70c   : > { %v6677_v61 = vadd.f32 %v12766_v53, %v6645_v48  ;;  %v6678_v1 = vadd.f32 %v12767_v31, %v6646_v20  ;;  %v6679_v17 = vadd.f32 %v12768_v46, %v6647_v41  ;;  %v6680_v6 = vadd.f32 %v12769_v45, %v6648_v42  ;;  %6702 = vst [vmem:[%s12310_s18] sm:$0xff] %v6670_v55  ;;  %v12779_v48 = vld [vmem:[#allocation50_spill] sm:$0xff]  ;;  %v12780_v41 = vld [vmem:[#allocation51_spill] sm:$0xff] }
 0x70d   : > { %6703 = vst [vmem:[%s12310_s18 + $0x8] sm:$0xff] %v6671_v15  ;;  %6704 = vst [vmem:[%s12310_s18 + $0x10] sm:$0xff] %v6672_v9  ;;  %v6681_v57 = vadd.f32 %v12770_v39, %v6649_v8  ;;  %v6682_v23 = vadd.f32 %v12771_v34, %v6650_v60  ;;  %v6683_v47 = vadd.f32 %v12772_v50, %v6651_v28  ;;  %v12781_v8 = vld [vmem:[#allocation52_spill] sm:$0xff]  ;;  %v12782_v28 = vld [vmem:[#allocation53_spill] sm:$0xff] }
 0x70e   : > { %v6684_v10 = vadd.f32 %v12773_v35, %v6652_v36  ;;  %6705 = vst [vmem:[%s12310_s18 + $0x18] sm:$0xff] %v6673_v2  ;;  %6706 = vst [vmem:[%s12310_s18 + $0x20] sm:$0xff] %v6674_v43  ;;  %v6685_v51 = vadd.f32 %v12774_v29, %v6653_v49  ;;  %v6686_v11 = vadd.f32 %v12775_v52, %v6654_v4  ;;  %v12783_v49 = vld [vmem:[#allocation54_spill] sm:$0xff] }
 0x70f   : > { %6707 = vst [vmem:[%s12310_s18 + $0x28] sm:$0xff] %v6675_v27  ;;  %6708 = vst [vmem:[%s12310_s18 + $0x30] sm:$0xff] %v6676_v26  ;;  %v6687_v37 = vadd.f32 %v12776_v62, %v6655_v58  ;;  %v6688_v18 = vadd.f32 %v12777_v14, %v6656_v54  ;;  %v6689_v25 = vadd.f32 %v12778_v63, %v6657_v13  ;;  %v12784_v58 = vld [vmem:[#allocation55_spill] sm:$0xff]  ;;  %v12785_v13 = vld [vmem:[#allocation56_spill] sm:$0xff] }
 0x710   : > { %6709 = vst [vmem:[%s12310_s18 + $0x38] sm:$0xff] %v6677_v61  ;;  %6710 = vst [vmem:[%s12310_s18 + $0x40] sm:$0xff] %v6678_v1  ;;  %v6690_v20 = vadd.f32 %v12779_v48, %v6658_v0  ;;  %v6691_v42 = vadd.f32 %v12780_v41, %v6659_v56  ;;  %v6692_v60 = vadd.f32 %v12781_v8, %v6660_v33  ;;  %v12786_v56 = vld [vmem:[#allocation57_spill] sm:$0xff] }
 0x711   : > { %6711 = vst [vmem:[%s12310_s18 + $0x48] sm:$0xff] %v6679_v17  ;;  %6712 = vst [vmem:[%s12310_s18 + $0x50] sm:$0xff] %v6680_v6  ;;  %v6693_v36 = vadd.f32 %v12782_v28, %v6661_v21  ;;  %v6694_v4 = vadd.f32 %v12783_v49, %v6662_v32  ;;  %v6695_v54 = vadd.f32 %v12784_v58, %v6663_v16  ;;  %v12787_v21 = vld [vmem:[#allocation16_spill] sm:$0xff]  ;;  %v12788_v16 = vld [vmem:[#allocation17_spill] sm:$0xff] }
 0x712   : > { %6713 = vst [vmem:[%s12310_s18 + $0x58] sm:$0xff] %v6681_v57  ;;  %6714 = vst [vmem:[%s12310_s18 + $0x60] sm:$0xff] %v6682_v23  ;;  %v6696_v0 = vadd.f32 %v12785_v13, %v6664_v30  ;;  %v6697_v33 = vadd.f32 %v12786_v56, %v6665_v19  ;;  %v6698_v32 = vadd.f32 %v12787_v21, %v6666_v12 }
 0x713   : > { %6715 = vst [vmem:[%s12310_s18 + $0x68] sm:$0xff] %v6683_v47  ;;  %6716 = vst [vmem:[%s12310_s18 + $0x70] sm:$0xff] %v6684_v10  ;;  %v6699_v30 = vadd.f32 %v12788_v16, %v6667_v38  ;;  %v6701_v55 = vadd.f32 %v6669_v40, %v12789_v22 }
 0x714   : > { %6717 = vst [vmem:[%s12310_s18 + $0x78] sm:$0xff] %v6685_v51  ;;  %6718 = vst [vmem:[%s12310_s18 + $0x80] sm:$0xff] %v6686_v11 }
 0x715   : > { %6719 = vst [vmem:[%s12310_s18 + $0x88] sm:$0xff] %v6687_v37  ;;  %6720 = vst [vmem:[%s12310_s18 + $0x90] sm:$0xff] %v6688_v18 }
 0x716   : > { %6721 = vst [vmem:[%s12310_s18 + $0x98] sm:$0xff] %v6689_v25  ;;  %6722 = vst [vmem:[%s12310_s18 + $0xa0] sm:$0xff] %v6690_v20 }
 0x717   : > { %6723 = vst [vmem:[%s12310_s18 + $0xa8] sm:$0xff] %v6691_v42  ;;  %6724 = vst [vmem:[%s12310_s18 + $0xb0] sm:$0xff] %v6692_v60 }
 0x718   : > { %6725 = vst [vmem:[%s12310_s18 + $0xb8] sm:$0xff] %v6693_v36  ;;  %6726 = vst [vmem:[%s12310_s18 + $0xc0] sm:$0xff] %v6694_v4 }
 0x719   : > { %6727 = vst [vmem:[%s12310_s18 + $0xc8] sm:$0xff] %v6695_v54  ;;  %6728 = vst [vmem:[%s12310_s18 + $0xd0] sm:$0xff] %v6696_v0 }
 0x71a   : > { %6729 = vst [vmem:[%s12310_s18 + $0xd8] sm:$0xff] %v6697_v33  ;;  %6730 = vst [vmem:[%s12310_s18 + $0xe0] sm:$0xff] %v6698_v32 }
 0x71b   : > { %6731 = vst [vmem:[%s12310_s18 + $0xe8] sm:$0xff] %v6699_v30  ;;  %6733 = vst [vmem:[%s12310_s18 + $0xf8] sm:$0xff] %v6701_v55 }
 0x71c   : > { %10484 = shalt.err (!%p10481_p1)
}
 0x71d   : > { %s10485_s10 = scalar_lea.hbm %s12364_s24, 4096  ;;  %s10489_s26 = scalar_lea.hbm %s12429_s3, 8192 }
 0x71e   : > { %p10486_p13 = scmp.ne.s32.totalorder %s12364_s24, %s10485_s10  ;;  %p10490_p4 = scmp.lt.u32.totalorder %s12364_s24, %s12429_s3 }
 0x71f   : > { %p10491_p5 = scmp.lt.u32.totalorder %s10489_s26, %s10485_s10  ;;  %p10493_p11 = scmp.lt.u32.totalorder %s10485_s10, %s12364_s24 }
 0x720   : > { %p10487_p6 = pnand %p10486_p13, %p12790_p0 }
 0x721   : > { %p10492_p8 = por %p10491_p5, %p10490_p4 }
 0x722   : > { %p10488_p10 = pneg %p10487_p6 }
 0x723   : > { %p10494_p2 = por %p10493_p11, %p10492_p8 }
 0x725   : > { %p10495_p3 = pnand %p10494_p2, %p10488_p10 }
 0x727   : > { %10498 = shalt.err (!%p10495_p3)
}
 0x728   : > { %s10549_s28 = smov 128   ;;  %s10550_s18 = smov 8  }
 0x729   : > { %10262 = dma.vmem_to_hbm [thread:$0]  (%p12790_p0), %s12366_s7, 4096, %s12364_s24, %s6735_s27, %s10549_s28, %s10549_s28, %s10550_s18  }
 0x72a PF: > { %s6763_s20 = sand.u32 1, %s10529_s12   ;;  %p12791_p7 = scmp.ne.s32.totalorder %s12575_s19, 0 }
 0x72b   : > { %p12792_p9 = scmp.ge.s32.totalorder %s10541_s15, 2  ;;  %s6764_s16 = scalar_lea.sflag [#allocation6], %s6763_s20 }
 0x72d   : > { %p10276_p12 = pnand %p12792_p9, %p12791_p7 }
 0x72f   : > { %10524 = dma.done.wait (!%p10276_p12), %s6764_s16, 4096  }
 0x730   : > { %10526 = vsyncadd (!%p10276_p12), %s6764_s16, 4294963200  ;;  %p17_p1 = scmp.ge.s32.totalorder %s10687_s23, 4   ;;  %s12793_s12 = smov %s10533_s13 }
 0x731   : > { %s12794_s13 = smov %s10537_s14  ;;  %s12795_s14 = smov %s10703_s9 }
 0x732   : > { %s12796_s15 = smov %s10687_s23  ;;  %19 = sbr.rel (!%p17_p1) target bundleno = 6 (0x6), region = 111 }
 0x739   :  { %6769 = vsyncpa [#allocation5], 1 }
 0x73a   :  { %6771 = vsyncpa [#allocation5 + $0x1], 1 }
 0x73b   :  { %6772 = vsyncpa [#allocation8], 1 }
 0x73c   :  { %6773 = vsyncpa [#allocation6], 1 }
 0x73d   :  { %6775 = vsyncpa [#allocation6 + $0x1], 1 }

</bundles_post_ra>
